<compile_context>
chip_gen: v6e
topology: v6e:2x2x1
jax: 0.10.0
libtpu: 0.0.40
codegen_flags: <defaults>
</compile_context>

<pallas_src>
import math

import jax
import jax.numpy as jnp
from jax import lax
from jax.experimental import pallas as pl
from jax.experimental.pallas import tpu as pltpu

# ---------------------------------------------------------------------------
# Scaled-down hyperparameters (original value in comments)
# ---------------------------------------------------------------------------
BATCH = 2
CHANNELS = 32          # model_dim = 128
N_EVENTS = 16          # n_events = 512
START_SIZE = 4         # Scheduler start_size
N_ATOMS = 64           # n_atoms = 1024  (== len(scale))
KERNEL_SIZE = 128      # kernel_size = 1024
N_SAMPLES = 512        # exp.n_samples = 2 ** 15
LN_EPS = 1e-5
LRELU_SLOPE = 0.2

MAX_ROW_TILE = 256     # row tile cap at larger scale (keeps a parallel axis)


# ---------------------------------------------------------------------------
# Pallas kernel: fused per-event MLP stacks + soft_dirac + atoms matmul +
#                amplitude scaling.  Output is (R, KERNEL_SIZE); the pad to
#                N_SAMPLES is handled by the (already required) FFT pad.
# ---------------------------------------------------------------------------
def scheduler_core_kernel(
    h_ref,       # (R, C)       per-event features, f32
    w_at_ref,    # (3, C, C)    to_atom hidden weights, f32
    w_sc_ref,    # (9, C, C)    scalar-head hidden weights [stack*3 + layer], bf16
    b_ref,       # (12, 1, C)   biases        [stack*3 + layer], stack 0 = to_atom
    g_ref,       # (12, 1, C)   LayerNorm gamma
    bt_ref,      # (12, 1, C)   LayerNorm beta
    wgo_ref,     # (C, A)       to_atom output linear (un-padded), f32
    bgo_ref,     # (1, A)
    wso_ref,     # (3, 1, C)    scalar-head output weights
    bso_ref,     # (3, 1, 1)
    atoms_ref,   # (A, K)       filterbank (fb), bf16
    sig_ref,     # out (R, K)   f32
    sched_ref,   # out (R, 1)   f32
):
    h0 = h_ref[...].astype(jnp.float32)

    def layer_norm(x, gamma, beta):
        mu = jnp.mean(x, axis=-1, keepdims=True)
        xc = x - mu
        var = jnp.mean(xc * xc, axis=-1, keepdims=True)
        return xc * lax.rsqrt(var + LN_EPS) * gamma + beta

    def lrelu(x):
        return jnp.where(x > 0, x, LRELU_SLOPE * x)

    def mlp_stack(stack_idx, get_w, mm_dtype):
        # Three (R,C)x(C,C) matmuls -> exactly the useful FLOPs, no zero blocks.
        z = h0
        for l in range(3):
            zl = jnp.dot(z.astype(mm_dtype), get_w(l),
                         preferred_element_type=jnp.float32)
            zl = zl + b_ref[stack_idx * 3 + l]
            z = lrelu(layer_norm(zl, g_ref[stack_idx * 3 + l],
                                 bt_ref[stack_idx * 3 + l]))
        return z

    # ---- generator.to_atom (stack 0): f32 path, hard first-argmax one-hot ----
    z_at = mlp_stack(0, lambda l: w_at_ref[l], jnp.float32)
    logits = jnp.dot(z_at, wgo_ref[...],
                     preferred_element_type=jnp.float32) + bgo_ref[...]

    n_a = logits.shape[-1]
    mx = jnp.max(logits, axis=-1, keepdims=True)
    iota = lax.broadcasted_iota(jnp.int32, logits.shape, 1)
    first = jnp.min(jnp.where(logits == mx, iota, n_a), axis=-1, keepdims=True)
    one_hot = (iota == first).astype(jnp.float32)

    # ---- scalar heads (stacks 1..3): bf16 matmuls, f32 LN / accumulation ----
    #   1 -> generator.to_amps, 2 -> scheduler.to_location, 3 -> scheduler.amps
    heads = []
    for s in range(3):
        z = mlp_stack(s + 1, lambda l, s=s: w_sc_ref[s * 3 + l], jnp.bfloat16)
        # C-wide lane reduction per head (tiny); could be packed into a single
        # (C, 8) matmul at real scale if the XLU ever became the bottleneck.
        heads.append(jnp.sum(z * wso_ref[s], axis=-1, keepdims=True) + bso_ref[s])
    gen_amp, loc, sched_amp = heads

    # ---- one_hot @ fb (bf16 operands), amplitude scaling ----
    # TODO(synk): on v5e replace this select-matmul with a row gather of the
    #             argmax index if the MXU is the binding slot at real scale.
    sig = jnp.dot(one_hot.astype(atoms_ref.dtype), atoms_ref[...],
                  preferred_element_type=jnp.float32)
    sig_ref[...] = sig * (gen_amp * jnp.abs(sched_amp))
    sched_ref[...] = jnp.sin(loc)


def scheduler_core(h, p):
    n_rows, C = h.shape
    A, K = N_ATOMS, KERNEL_SIZE

    row_tile = min(n_rows, MAX_ROW_TILE)
    assert n_rows % row_tile == 0 and row_tile % 8 == 0
    grid = (n_rows // row_tile,)

    def const(ndim):
        return lambda i: (0,) * ndim

    in_specs = [
        pl.BlockSpec((row_tile, C), lambda i: (i, 0)),
        pl.BlockSpec(p['w_atom'].shape, const(3)),   # (3, C, C)  f32
        pl.BlockSpec(p['w_sc'].shape, const(3)),     # (9, C, C)  bf16
        pl.BlockSpec(p['b'].shape, const(3)),        # (12, 1, C)
        pl.BlockSpec(p['gamma'].shape, const(3)),    # (12, 1, C)
        pl.BlockSpec(p['beta'].shape, const(3)),     # (12, 1, C)
        pl.BlockSpec(p['wgo'].shape, const(2)),      # (C, A)  un-padded
        pl.BlockSpec(p['bgo'].shape, const(2)),      # (1, A)
        pl.BlockSpec(p['wso'].shape, const(3)),      # (3, 1, C)
        pl.BlockSpec(p['bso'].shape, const(3)),      # (3, 1, 1)
        pl.BlockSpec(p['atoms'].shape, const(2)),    # (A, K)  bf16
    ]
    out_specs = [
        pl.BlockSpec((row_tile, K), lambda i: (i, 0)),
        pl.BlockSpec((row_tile, 1), lambda i: (i, 0)),
    ]
    out_shape = [
        jax.ShapeDtypeStruct((n_rows, K), jnp.float32),
        jax.ShapeDtypeStruct((n_rows, 1), jnp.float32),
    ]
    return pl.pallas_call(
        scheduler_core_kernel,
        out_shape=out_shape,
        grid_spec=pltpu.PrefetchScalarGridSpec(
            num_scalar_prefetch=0,
            grid=grid,
            in_specs=in_specs,
            out_specs=out_specs,
        ),
        compiler_params=pltpu.CompilerParams(
            dimension_semantics=("parallel",),
            # Sized with headroom for the scaled config; at real scale size
            # from resident weights + atoms + h/sig tiles (<= ~32 MiB).
            vmem_limit_bytes=32 * 1024 * 1024),
    )(h, p['w_atom'], p['w_sc'], p['b'], p['gamma'], p['beta'],
      p['wgo'], p['bgo'], p['wso'], p['bso'], p['atoms'])


# ---------------------------------------------------------------------------
# Pure-JAX reference of the kernel math on the UNFUSED parameters
# (used only for a correctness check)
# ---------------------------------------------------------------------------
def scheduler_core_ref(h, p):
    def ln(x, g, b):
        mu = x.mean(-1, keepdims=True)
        var = ((x - mu) ** 2).mean(-1, keepdims=True)
        return (x - mu) / jnp.sqrt(var + LN_EPS) * g + b

    def lrelu(x):
        return jnp.where(x > 0, x, LRELU_SLOPE * x)

    z = h
    for l in range(3):
        z = lrelu(ln(z @ p['wg'][l] + p['bg'][l], p['gg'][l], p['btg'][l]))
    logits = z @ p['wgo'] + p['bgo']
    one_hot = jax.nn.one_hot(jnp.argmax(logits, -1), logits.shape[-1],
                             dtype=jnp.float32)
    outs = []
    for s in range(3):
        z = h
        for l in range(3):
            z = lrelu(ln(z @ p['ws'][s, l] + p['bs'][s, l],
                         p['gs'][s, l], p['bts'][s, l]))
        outs.append((z * p['wso'][s]).sum(-1, keepdims=True) + p['bso'][s])
    gen_amp, loc, sched_amp = outs
    sig = (one_hot @ p['atoms']) * gen_amp * jnp.abs(sched_amp)
    return sig, jnp.sin(loc)


# ---------------------------------------------------------------------------
# Pack the unfused per-stack parameters into the kernel layout
# ---------------------------------------------------------------------------
def pack_core_params(raw, mm_dtype=jnp.bfloat16):
    C = CHANNELS
    # stack 0 = to_atom (kept f32), stacks 1..3 = scalar heads (bf16 operands)
    w_atom = raw['wg'].astype(jnp.float32)                     # (3, C, C)
    w_sc = raw['ws'].reshape(9, C, C).astype(mm_dtype)         # (9, C, C)

    b_all = jnp.concatenate([raw['bg'], raw['bs'].reshape(9, 1, C)], axis=0)
    g_all = jnp.concatenate([raw['gg'], raw['gs'].reshape(9, 1, C)], axis=0)
    bt_all = jnp.concatenate([raw['btg'], raw['bts'].reshape(9, 1, C)], axis=0)

    return dict(w_atom=w_atom, w_sc=w_sc,
                b=b_all, gamma=g_all, beta=bt_all,               # (12, 1, C)
                wgo=raw['wgo'].astype(jnp.float32),              # (C, A)
                bgo=raw['bgo'].astype(jnp.float32),              # (1, A)
                wso=raw['wso'].astype(jnp.float32),              # (3, 1, C)
                bso=raw['bso'].astype(jnp.float32),              # (3, 1, 1)
                atoms=raw['atoms'].astype(mm_dtype))             # (A, K)


# ---------------------------------------------------------------------------
# ConvUpsample ('learned', batch_norm=True)  -- plain-JAX glue
# ---------------------------------------------------------------------------
# TODO(synk): ConvUpsample (Linear begin + ConvTranspose1d/BatchNorm/LeakyReLU
#             stack + final Conv1d) is kept in plain JAX rather than Pallas.
def conv_transpose1d_k4s2p1(x, w, b):
    # x: (B, Cin, T); w: PyTorch ConvTranspose1d layout (Cin, Cout, 4)
    w_conv = jnp.flip(w, axis=-1).transpose(1, 0, 2)   # (Cout, Cin, 4)
    y = lax.conv_general_dilated(
        x, w_conv, window_strides=(1,), padding=[(2, 2)],
        lhs_dilation=(2,), rhs_dilation=(1,),
        dimension_numbers=('NCH', 'OIH', 'NCH'))
    return y + b[None, :, None]


def conv1d_k3p1(x, w, b):
    # w: (Cout, Cin, 3)
    y = lax.conv_general_dilated(
        x, w, window_strides=(1,), padding=[(1, 1)],
        dimension_numbers=('NCH', 'OIH', 'NCH'))
    return y + b[None, :, None]


def batch_norm_1d(x):
    # training-mode BatchNorm1d with default affine params (weight=1, bias=0)
    mu = jnp.mean(x, axis=(0, 2), keepdims=True)
    var = jnp.mean(jnp.square(x - mu), axis=(0, 2), keepdims=True)
    return (x - mu) * lax.rsqrt(var + 1e-5)


def conv_upsample(x, p):
    # layout: NCW (batch, channels, time), matching PyTorch Conv1d
    b = x.shape[0]
    h = x @ p['w_begin'] + p['b_begin']
    h = h.reshape(b, CHANNELS, START_SIZE)
    for l in range(p['n_up_layers']):
        h = conv_transpose1d_k4s2p1(h, p['wt'][l], p['bt'][l])
        h = batch_norm_1d(h)
        h = jnp.where(h > 0, h, LRELU_SLOPE * h)
    h = conv1d_k3p1(h, p['w_final'], p['b_final'])
    return h                                            # (B, C, N_EVENTS)


# ---------------------------------------------------------------------------
# fft_shift with the pad-to-N_SAMPLES folded into the FFT pad
# ---------------------------------------------------------------------------
# TODO(synk): rfft/irfft have no Pallas primitive; done with jnp.fft.
def fft_shift_from_kernel(sig_k, shift, n_target):
    # Equivalent to F.pad(sig_k, (0, n_target - K)) followed by the original
    # fft_shift (which pads by 2*n_target): a single pad K -> 3*n_target.
    k = sig_k.shape[-1]
    a = jnp.pad(sig_k, [(0, 0)] * (sig_k.ndim - 1) + [(0, n_target * 3 - k)])
    shift_samples = (shift * 0.5) * n_target
    spec = jnp.fft.rfft(a, axis=-1, norm='ortho')
    n_coeffs = spec.shape[-1]
    ramp = (jnp.arange(n_coeffs) * 2j * jnp.pi) / n_coeffs
    spec = spec * jnp.exp(-ramp * shift_samples)
    out = jnp.fft.irfft(spec, axis=-1, norm='ortho')
    return out[..., :n_target]


# ---------------------------------------------------------------------------
# Scheduler.forward / Model.forward
# ---------------------------------------------------------------------------
def scheduler_forward(x, params):
    # x layout: (batch, channels) latent
    batch = x.shape[0]
    expanded = conv_upsample(x, params['expand'])                        # (B, C, E)
    h = expanded.transpose(0, 2, 1).reshape(batch * N_EVENTS, CHANNELS)  # permute(0,2,1)

    # (B*E, KERNEL_SIZE) sig, (B*E, 1) sched
    sig_events, sched = scheduler_core(h, params['core'])

    sig = sig_events.reshape(batch, N_EVENTS, KERNEL_SIZE)
    sched = sched.reshape(batch, N_EVENTS, 1)

    # sched.shape[-1] == 1  ->  fft_shift branch
    # TODO(synk): ImpulseGenerator / fft_convolve branch (sched.shape[-1] > 1)
    #             is unreachable here (to_location has out_channels=1).
    final = fft_shift_from_kernel(sig, sched, N_SAMPLES)
    return final                                                         # (B, E, N_SAMPLES)


def model_forward(x, params):
    # Model.forward: run the Scheduler and mix the events (sum over dim 1).
    events = scheduler_forward(x, params)
    return jnp.sum(events, axis=1, keepdims=True)


# ---------------------------------------------------------------------------
# Deterministic parameter initialization (weight_init=0.1 style)
# ---------------------------------------------------------------------------
def init_params(key):
    keys = iter(jax.random.split(key, 64))
    scale = 0.1
    C, A, K = CHANNELS, N_ATOMS, KERNEL_SIZE

    def lin(in_d, out_d):
        w = jax.random.uniform(next(keys), (in_d, out_d), jnp.float32, -1.0, 1.0) * scale
        b = jax.random.uniform(next(keys), (out_d,), jnp.float32, -1.0, 1.0) * scale
        return w, b

    # generator.to_atom hidden stack + output linear
    wg, bg = [], []
    for _ in range(3):
        w, b = lin(C, C); wg.append(w); bg.append(b)
    wgo, bgo = lin(C, A)

    # 3 scalar stacks: [generator.to_amps, scheduler.to_location, scheduler.amps]
    ws, bs, wso, bso = [], [], [], []
    for _ in range(3):
        wl, bl = [], []
        for _ in range(3):
            w, b = lin(C, C); wl.append(w); bl.append(b)
        ws.append(jnp.stack(wl)); bs.append(jnp.stack(bl))
        w, b = lin(C, 1)
        wso.append(w.T)            # (1, C)
        bso.append(b)              # (1,)

    # synthetic deterministic filterbank standing in for `fb` (20..2000 Hz sines)
    freqs = jnp.linspace(20.0, 2000.0, A)
    t = jnp.arange(K, dtype=jnp.float32) / 22050.0
    window = 0.5 - 0.5 * jnp.cos(2.0 * jnp.pi * jnp.arange(K) / (K - 1))
    atoms = (jnp.sin(2.0 * jnp.pi * freqs[:, None] * t[None, :])
             * window[None, :]).astype(jnp.float32)

    core_raw = dict(
        wg=jnp.stack(wg),                            # (3,C,C)
        bg=jnp.stack(bg)[:, None, :],                # (3,1,C)
        gg=jnp.ones((3, 1, C), jnp.float32),         # LayerNorm gamma (default 1)
        btg=jnp.zeros((3, 1, C), jnp.float32),       # LayerNorm beta  (default 0)
        wgo=wgo, bgo=bgo[None, :],                   # (C,A),(1,A)
        ws=jnp.stack(ws),                            # (3,3,C,C)
        bs=jnp.stack(bs)[:, :, None, :],             # (3,3,1,C)
        gs=jnp.ones((3, 3, 1, C), jnp.float32),
        bts=jnp.zeros((3, 3, 1, C), jnp.float32),
        wso=jnp.stack(wso),                          # (3,1,C)
        bso=jnp.stack(bso)[:, :, None],              # (3,1,1)
        atoms=atoms,                                 # (A,K)
    )

    # ConvUpsample ('learned', batch_norm=True)
    n_up = int(math.log2(N_EVENTS) - math.log2(START_SIZE))
    w_begin, b_begin = lin(C, C * START_SIZE)
    wt, bt = [], []
    for _ in range(n_up):
        wt.append(jax.random.uniform(next(keys), (C, C, 4), jnp.float32, -1.0, 1.0) * scale)
        bt.append(jax.random.uniform(next(keys), (C,), jnp.float32, -1.0, 1.0) * scale)
    w_final = jax.random.uniform(next(keys), (C, C, 3), jnp.float32, -1.0, 1.0) * scale
    b_final = jax.random.uniform(next(keys), (C,), jnp.float32, -1.0, 1.0) * scale
    expand = dict(w_begin=w_begin, b_begin=b_begin, wt=wt, bt=bt,
                  w_final=w_final, b_final=b_final, n_up_layers=n_up)

    return dict(core=pack_core_params(core_raw), core_raw=core_raw, expand=expand)


# ---------------------------------------------------------------------------
if __name__ == "__main__":
    key = jax.random.PRNGKey(0)
    pkey, xkey = jax.random.split(key)
    params = init_params(pkey)
    x = jax.random.normal(xkey, (BATCH, CHANNELS), jnp.float32)

    events = jax.jit(lambda xx: scheduler_forward(xx, params))(x)
    events = jax.block_until_ready(events)
    assert events.shape == (BATCH, N_EVENTS, N_SAMPLES)
    assert bool(jnp.all(jnp.isfinite(events)))

    # Model.forward mixes the scheduled events down (sum over events, keepdim)
    mix = jnp.sum(events, axis=1, keepdims=True)
    assert mix.shape == (BATCH, 1, N_SAMPLES)
    assert bool(jnp.all(jnp.isfinite(mix)))

    # numerical check of the fused Pallas core against the unfused JAX reference
    expanded = conv_upsample(x, params['expand'])
    h = expanded.transpose(0, 2, 1).reshape(BATCH * N_EVENTS, CHANNELS)
    sig_k, sched_k = scheduler_core(h, params['core'])
    sig_r, sched_r = scheduler_core_ref(h, params['core_raw'])
    assert sig_k.shape == (BATCH * N_EVENTS, KERNEL_SIZE)
    assert jnp.allclose(sig_k, sig_r, atol=1e-2, rtol=1e-1)
    assert jnp.allclose(sched_k, sched_r, atol=1e-2, rtol=1e-1)

    print("KERNEL_OK")
</pallas_src>

<mosaic_0001>
module attributes {stable_mosaic.version = 11 : i64} {
  func.func @scheduler_core_kernel(%arg0: i32, %arg1: memref<32x32xf32, #tpu.memory_space<vmem>>, %arg2: memref<3x32x32xf32, #tpu.memory_space<vmem>>, %arg3: memref<9x32x32xbf16, #tpu.memory_space<vmem>>, %arg4: memref<12x1x32xf32, #tpu.memory_space<vmem>>, %arg5: memref<12x1x32xf32, #tpu.memory_space<vmem>>, %arg6: memref<12x1x32xf32, #tpu.memory_space<vmem>>, %arg7: memref<32x64xf32, #tpu.memory_space<vmem>>, %arg8: memref<1x64xf32, #tpu.memory_space<vmem>>, %arg9: memref<3x1x32xf32, #tpu.memory_space<vmem>>, %arg10: memref<3x1x1xf32, #tpu.memory_space<vmem>>, %arg11: memref<64x128xbf16, #tpu.memory_space<vmem>>, %arg12: memref<32x128xf32, #tpu.memory_space<vmem>>, %arg13: memref<32x1xf32, #tpu.memory_space<vmem>>) attributes {dimension_semantics = [#tpu.dimension_semantics<parallel>], iteration_bounds = array<i64: 1>, scalar_prefetch = 0 : i64, scratch_operands = 0 : i64, tpu.core_type = #tpu.core_type<tc>, window_params = [{transform_indices = @transform_0, window_bounds = array<i64: 32, 32>}, {pipeline_mode = #tpu.pipeline_mode<synchronous>, transform_indices = @transform_1, window_bounds = array<i64: 3, 32, 32>}, {pipeline_mode = #tpu.pipeline_mode<synchronous>, transform_indices = @transform_2, window_bounds = array<i64: 9, 32, 32>}, {pipeline_mode = #tpu.pipeline_mode<synchronous>, transform_indices = @transform_3, window_bounds = array<i64: 12, 1, 32>}, {pipeline_mode = #tpu.pipeline_mode<synchronous>, transform_indices = @transform_4, window_bounds = array<i64: 12, 1, 32>}, {pipeline_mode = #tpu.pipeline_mode<synchronous>, transform_indices = @transform_5, window_bounds = array<i64: 12, 1, 32>}, {pipeline_mode = #tpu.pipeline_mode<synchronous>, transform_indices = @transform_6, window_bounds = array<i64: 32, 64>}, {pipeline_mode = #tpu.pipeline_mode<synchronous>, transform_indices = @transform_7, window_bounds = array<i64: 1, 64>}, {pipeline_mode = #tpu.pipeline_mode<synchronous>, transform_indices = @transform_8, window_bounds = array<i64: 3, 1, 32>}, {pipeline_mode = #tpu.pipeline_mode<synchronous>, transform_indices = @transform_9, window_bounds = array<i64: 3, 1, 1>}, {pipeline_mode = #tpu.pipeline_mode<synchronous>, transform_indices = @transform_10, window_bounds = array<i64: 64, 128>}, {transform_indices = @transform_11, window_bounds = array<i64: 32, 128>}, {transform_indices = @transform_12, window_bounds = array<i64: 32, 1>}]} {
    %c0 = arith.constant 0 : index
    %c0_0 = arith.constant 0 : index
    %0 = vector.load %arg1[%c0, %c0_0] : memref<32x32xf32, #tpu.memory_space<vmem>>, vector<32x32xf32>
    %c0_1 = arith.constant 0 : index
    %c0_2 = arith.constant 0 : index
    %c0_3 = arith.constant 0 : index
    %1 = vector.load %arg2[%c0_1, %c0_2, %c0_3] : memref<3x32x32xf32, #tpu.memory_space<vmem>>, vector<1x32x32xf32>
    %2 = vector.shape_cast %1 : vector<1x32x32xf32> to vector<32x32xf32>
    %cst = arith.constant dense<0.000000e+00> : vector<32x32xf32>
    %3 = tpu.matmul %0, %2, %cst {dimension_numbers = #tpu.dot_dimension_numbers<[1], [0], [0], [1], [0, 0, 1, 1], [], []>} : vector<32x32xf32>, vector<32x32xf32>, vector<32x32xf32> -> vector<32x32xf32>
    %c0_4 = arith.constant 0 : index
    %c0_5 = arith.constant 0 : index
    %c0_6 = arith.constant 0 : index
    %4 = vector.load %arg4[%c0_4, %c0_5, %c0_6] : memref<12x1x32xf32, #tpu.memory_space<vmem>>, vector<1x1x32xf32>
    %5 = vector.shape_cast %4 : vector<1x1x32xf32> to vector<1x32xf32>
    %6 = vector.broadcast %5 : vector<1x32xf32> to vector<32x32xf32>
    %7 = arith.addf %3, %6 : vector<32x32xf32>
    %c0_7 = arith.constant 0 : index
    %c0_8 = arith.constant 0 : index
    %c0_9 = arith.constant 0 : index
    %8 = vector.load %arg5[%c0_7, %c0_8, %c0_9] : memref<12x1x32xf32, #tpu.memory_space<vmem>>, vector<1x1x32xf32>
    %9 = vector.shape_cast %8 : vector<1x1x32xf32> to vector<1x32xf32>
    %c0_10 = arith.constant 0 : index
    %c0_11 = arith.constant 0 : index
    %c0_12 = arith.constant 0 : index
    %10 = vector.load %arg6[%c0_10, %c0_11, %c0_12] : memref<12x1x32xf32, #tpu.memory_space<vmem>>, vector<1x1x32xf32>
    %11 = vector.shape_cast %10 : vector<1x1x32xf32> to vector<1x32xf32>
    %cst_13 = arith.constant dense<0.000000e+00> : vector<32xf32>
    %12 = vector.multi_reduction <add>, %7, %cst_13 [1] : vector<32x32xf32> to vector<32xf32>
    %13 = vector.shape_cast %12 : vector<32xf32> to vector<32x1xf32>
    %cst_14 = arith.constant 3.200000e+01 : f32
    %14 = vector.broadcast %cst_14 : f32 to vector<32x1xf32>
    %15 = arith.divf %13, %14 : vector<32x1xf32>
    %16 = vector.broadcast %15 : vector<32x1xf32> to vector<32x32xf32>
    %17 = arith.subf %7, %16 : vector<32x32xf32>
    %18 = arith.mulf %17, %17 : vector<32x32xf32>
    %cst_15 = arith.constant dense<0.000000e+00> : vector<32xf32>
    %19 = vector.multi_reduction <add>, %18, %cst_15 [1] : vector<32x32xf32> to vector<32xf32>
    %20 = vector.shape_cast %19 : vector<32xf32> to vector<32x1xf32>
    %cst_16 = arith.constant 3.200000e+01 : f32
    %21 = vector.broadcast %cst_16 : f32 to vector<32x1xf32>
    %22 = arith.divf %20, %21 : vector<32x1xf32>
    %cst_17 = arith.constant 9.99999974E-6 : f32
    %23 = vector.broadcast %cst_17 : f32 to vector<32x1xf32>
    %24 = arith.addf %22, %23 : vector<32x1xf32>
    %25 = math.rsqrt %24 : vector<32x1xf32>
    %26 = vector.broadcast %25 : vector<32x1xf32> to vector<32x32xf32>
    %27 = arith.mulf %17, %26 : vector<32x32xf32>
    %28 = vector.broadcast %9 : vector<1x32xf32> to vector<32x32xf32>
    %29 = arith.mulf %27, %28 : vector<32x32xf32>
    %30 = vector.broadcast %11 : vector<1x32xf32> to vector<32x32xf32>
    %31 = arith.addf %29, %30 : vector<32x32xf32>
    %cst_18 = arith.constant 0.000000e+00 : f32
    %32 = vector.broadcast %cst_18 : f32 to vector<32x32xf32>
    %33 = arith.cmpf ogt, %31, %32 : vector<32x32xf32>
    %cst_19 = arith.constant 2.000000e-01 : f32
    %34 = vector.broadcast %cst_19 : f32 to vector<32x32xf32>
    %35 = arith.mulf %34, %31 : vector<32x32xf32>
    %36 = arith.select %33, %31, %35 : vector<32x32xi1>, vector<32x32xf32>
    %c1 = arith.constant 1 : index
    %c0_20 = arith.constant 0 : index
    %c0_21 = arith.constant 0 : index
    %37 = vector.load %arg2[%c1, %c0_20, %c0_21] : memref<3x32x32xf32, #tpu.memory_space<vmem>>, vector<1x32x32xf32>
    %38 = vector.shape_cast %37 : vector<1x32x32xf32> to vector<32x32xf32>
    %cst_22 = arith.constant dense<0.000000e+00> : vector<32x32xf32>
    %39 = tpu.matmul %36, %38, %cst_22 {dimension_numbers = #tpu.dot_dimension_numbers<[1], [0], [0], [1], [0, 0, 1, 1], [], []>} : vector<32x32xf32>, vector<32x32xf32>, vector<32x32xf32> -> vector<32x32xf32>
    %c1_23 = arith.constant 1 : index
    %c0_24 = arith.constant 0 : index
    %c0_25 = arith.constant 0 : index
    %40 = vector.load %arg4[%c1_23, %c0_24, %c0_25] : memref<12x1x32xf32, #tpu.memory_space<vmem>>, vector<1x1x32xf32>
    %41 = vector.shape_cast %40 : vector<1x1x32xf32> to vector<1x32xf32>
    %42 = vector.broadcast %41 : vector<1x32xf32> to vector<32x32xf32>
    %43 = arith.addf %39, %42 : vector<32x32xf32>
    %c1_26 = arith.constant 1 : index
    %c0_27 = arith.constant 0 : index
    %c0_28 = arith.constant 0 : index
    %44 = vector.load %arg5[%c1_26, %c0_27, %c0_28] : memref<12x1x32xf32, #tpu.memory_space<vmem>>, vector<1x1x32xf32>
    %45 = vector.shape_cast %44 : vector<1x1x32xf32> to vector<1x32xf32>
    %c1_29 = arith.constant 1 : index
    %c0_30 = arith.constant 0 : index
    %c0_31 = arith.constant 0 : index
    %46 = vector.load %arg6[%c1_29, %c0_30, %c0_31] : memref<12x1x32xf32, #tpu.memory_space<vmem>>, vector<1x1x32xf32>
    %47 = vector.shape_cast %46 : vector<1x1x32xf32> to vector<1x32xf32>
    %cst_32 = arith.constant dense<0.000000e+00> : vector<32xf32>
    %48 = vector.multi_reduction <add>, %43, %cst_32 [1] : vector<32x32xf32> to vector<32xf32>
    %49 = vector.shape_cast %48 : vector<32xf32> to vector<32x1xf32>
    %cst_33 = arith.constant 3.200000e+01 : f32
    %50 = vector.broadcast %cst_33 : f32 to vector<32x1xf32>
    %51 = arith.divf %49, %50 : vector<32x1xf32>
    %52 = vector.broadcast %51 : vector<32x1xf32> to vector<32x32xf32>
    %53 = arith.subf %43, %52 : vector<32x32xf32>
    %54 = arith.mulf %53, %53 : vector<32x32xf32>
    %cst_34 = arith.constant dense<0.000000e+00> : vector<32xf32>
    %55 = vector.multi_reduction <add>, %54, %cst_34 [1] : vector<32x32xf32> to vector<32xf32>
    %56 = vector.shape_cast %55 : vector<32xf32> to vector<32x1xf32>
    %cst_35 = arith.constant 3.200000e+01 : f32
    %57 = vector.broadcast %cst_35 : f32 to vector<32x1xf32>
    %58 = arith.divf %56, %57 : vector<32x1xf32>
    %cst_36 = arith.constant 9.99999974E-6 : f32
    %59 = vector.broadcast %cst_36 : f32 to vector<32x1xf32>
    %60 = arith.addf %58, %59 : vector<32x1xf32>
    %61 = math.rsqrt %60 : vector<32x1xf32>
    %62 = vector.broadcast %61 : vector<32x1xf32> to vector<32x32xf32>
    %63 = arith.mulf %53, %62 : vector<32x32xf32>
    %64 = vector.broadcast %45 : vector<1x32xf32> to vector<32x32xf32>
    %65 = arith.mulf %63, %64 : vector<32x32xf32>
    %66 = vector.broadcast %47 : vector<1x32xf32> to vector<32x32xf32>
    %67 = arith.addf %65, %66 : vector<32x32xf32>
    %cst_37 = arith.constant 0.000000e+00 : f32
    %68 = vector.broadcast %cst_37 : f32 to vector<32x32xf32>
    %69 = arith.cmpf ogt, %67, %68 : vector<32x32xf32>
    %cst_38 = arith.constant 2.000000e-01 : f32
    %70 = vector.broadcast %cst_38 : f32 to vector<32x32xf32>
    %71 = arith.mulf %70, %67 : vector<32x32xf32>
    %72 = arith.select %69, %67, %71 : vector<32x32xi1>, vector<32x32xf32>
    %c2 = arith.constant 2 : index
    %c0_39 = arith.constant 0 : index
    %c0_40 = arith.constant 0 : index
    %73 = vector.load %arg2[%c2, %c0_39, %c0_40] : memref<3x32x32xf32, #tpu.memory_space<vmem>>, vector<1x32x32xf32>
    %74 = vector.shape_cast %73 : vector<1x32x32xf32> to vector<32x32xf32>
    %cst_41 = arith.constant dense<0.000000e+00> : vector<32x32xf32>
    %75 = tpu.matmul %72, %74, %cst_41 {dimension_numbers = #tpu.dot_dimension_numbers<[1], [0], [0], [1], [0, 0, 1, 1], [], []>} : vector<32x32xf32>, vector<32x32xf32>, vector<32x32xf32> -> vector<32x32xf32>
    %c2_42 = arith.constant 2 : index
    %c0_43 = arith.constant 0 : index
    %c0_44 = arith.constant 0 : index
    %76 = vector.load %arg4[%c2_42, %c0_43, %c0_44] : memref<12x1x32xf32, #tpu.memory_space<vmem>>, vector<1x1x32xf32>
    %77 = vector.shape_cast %76 : vector<1x1x32xf32> to vector<1x32xf32>
    %78 = vector.broadcast %77 : vector<1x32xf32> to vector<32x32xf32>
    %79 = arith.addf %75, %78 : vector<32x32xf32>
    %c2_45 = arith.constant 2 : index
    %c0_46 = arith.constant 0 : index
    %c0_47 = arith.constant 0 : index
    %80 = vector.load %arg5[%c2_45, %c0_46, %c0_47] : memref<12x1x32xf32, #tpu.memory_space<vmem>>, vector<1x1x32xf32>
    %81 = vector.shape_cast %80 : vector<1x1x32xf32> to vector<1x32xf32>
    %c2_48 = arith.constant 2 : index
    %c0_49 = arith.constant 0 : index
    %c0_50 = arith.constant 0 : index
    %82 = vector.load %arg6[%c2_48, %c0_49, %c0_50] : memref<12x1x32xf32, #tpu.memory_space<vmem>>, vector<1x1x32xf32>
    %83 = vector.shape_cast %82 : vector<1x1x32xf32> to vector<1x32xf32>
    %cst_51 = arith.constant dense<0.000000e+00> : vector<32xf32>
    %84 = vector.multi_reduction <add>, %79, %cst_51 [1] : vector<32x32xf32> to vector<32xf32>
    %85 = vector.shape_cast %84 : vector<32xf32> to vector<32x1xf32>
    %cst_52 = arith.constant 3.200000e+01 : f32
    %86 = vector.broadcast %cst_52 : f32 to vector<32x1xf32>
    %87 = arith.divf %85, %86 : vector<32x1xf32>
    %88 = vector.broadcast %87 : vector<32x1xf32> to vector<32x32xf32>
    %89 = arith.subf %79, %88 : vector<32x32xf32>
    %90 = arith.mulf %89, %89 : vector<32x32xf32>
    %cst_53 = arith.constant dense<0.000000e+00> : vector<32xf32>
    %91 = vector.multi_reduction <add>, %90, %cst_53 [1] : vector<32x32xf32> to vector<32xf32>
    %92 = vector.shape_cast %91 : vector<32xf32> to vector<32x1xf32>
    %cst_54 = arith.constant 3.200000e+01 : f32
    %93 = vector.broadcast %cst_54 : f32 to vector<32x1xf32>
    %94 = arith.divf %92, %93 : vector<32x1xf32>
    %cst_55 = arith.constant 9.99999974E-6 : f32
    %95 = vector.broadcast %cst_55 : f32 to vector<32x1xf32>
    %96 = arith.addf %94, %95 : vector<32x1xf32>
    %97 = math.rsqrt %96 : vector<32x1xf32>
    %98 = vector.broadcast %97 : vector<32x1xf32> to vector<32x32xf32>
    %99 = arith.mulf %89, %98 : vector<32x32xf32>
    %100 = vector.broadcast %81 : vector<1x32xf32> to vector<32x32xf32>
    %101 = arith.mulf %99, %100 : vector<32x32xf32>
    %102 = vector.broadcast %83 : vector<1x32xf32> to vector<32x32xf32>
    %103 = arith.addf %101, %102 : vector<32x32xf32>
    %cst_56 = arith.constant 0.000000e+00 : f32
    %104 = vector.broadcast %cst_56 : f32 to vector<32x32xf32>
    %105 = arith.cmpf ogt, %103, %104 : vector<32x32xf32>
    %cst_57 = arith.constant 2.000000e-01 : f32
    %106 = vector.broadcast %cst_57 : f32 to vector<32x32xf32>
    %107 = arith.mulf %106, %103 : vector<32x32xf32>
    %108 = arith.select %105, %103, %107 : vector<32x32xi1>, vector<32x32xf32>
    %c0_58 = arith.constant 0 : index
    %c0_59 = arith.constant 0 : index
    %109 = vector.load %arg7[%c0_58, %c0_59] : memref<32x64xf32, #tpu.memory_space<vmem>>, vector<32x64xf32>
    %cst_60 = arith.constant dense<0.000000e+00> : vector<32x64xf32>
    %110 = tpu.matmul %108, %109, %cst_60 {dimension_numbers = #tpu.dot_dimension_numbers<[1], [0], [0], [1], [0, 0, 1, 1], [], []>} : vector<32x32xf32>, vector<32x64xf32>, vector<32x64xf32> -> vector<32x64xf32>
    %c0_61 = arith.constant 0 : index
    %c0_62 = arith.constant 0 : index
    %111 = vector.load %arg8[%c0_61, %c0_62] : memref<1x64xf32, #tpu.memory_space<vmem>>, vector<1x64xf32>
    %112 = vector.broadcast %111 : vector<1x64xf32> to vector<32x64xf32>
    %113 = arith.addf %110, %112 : vector<32x64xf32>
    %cst_63 = arith.constant dense<0xFF800000> : vector<32xf32>
    %114 = vector.multi_reduction <maximumf>, %113, %cst_63 [1] : vector<32x64xf32> to vector<32xf32>
    %115 = vector.shape_cast %114 : vector<32xf32> to vector<32x1xf32>
    %116 = tpu.iota {dimensions = array<i32: 1>} : vector<32x64xi32>
    %117 = vector.broadcast %115 : vector<32x1xf32> to vector<32x64xf32>
    %118 = arith.cmpf oeq, %113, %117 : vector<32x64xf32>
    %c64_i32 = arith.constant 64 : i32
    %119 = vector.broadcast %c64_i32 : i32 to vector<32x64xi32>
    %120 = arith.select %118, %116, %119 : vector<32x64xi1>, vector<32x64xi32>
    %cst_64 = arith.constant dense<2147483647> : vector<32xi32>
    %121 = vector.multi_reduction <minsi>, %120, %cst_64 [1] : vector<32x64xi32> to vector<32xi32>
    %122 = vector.shape_cast %121 : vector<32xi32> to vector<32x1xi32>
    %123 = vector.broadcast %122 : vector<32x1xi32> to vector<32x64xi32>
    %124 = arith.cmpi eq, %116, %123 : vector<32x64xi32>
    %125 = arith.extui %124 : vector<32x64xi1> to vector<32x64xi32>
    %126 = arith.sitofp %125 : vector<32x64xi32> to vector<32x64xf32>
    %127 = arith.truncf %0 : vector<32x32xf32> to vector<32x32xbf16>
    %c0_65 = arith.constant 0 : index
    %c0_66 = arith.constant 0 : index
    %c0_67 = arith.constant 0 : index
    %128 = vector.load %arg3[%c0_65, %c0_66, %c0_67] : memref<9x32x32xbf16, #tpu.memory_space<vmem>>, vector<1x32x32xbf16>
    %129 = vector.shape_cast %128 : vector<1x32x32xbf16> to vector<32x32xbf16>
    %cst_68 = arith.constant dense<0.000000e+00> : vector<32x32xf32>
    %130 = tpu.matmul %127, %129, %cst_68 {dimension_numbers = #tpu.dot_dimension_numbers<[1], [0], [0], [1], [0, 0, 1, 1], [], []>} : vector<32x32xbf16>, vector<32x32xbf16>, vector<32x32xf32> -> vector<32x32xf32>
    %c3 = arith.constant 3 : index
    %c0_69 = arith.constant 0 : index
    %c0_70 = arith.constant 0 : index
    %131 = vector.load %arg4[%c3, %c0_69, %c0_70] : memref<12x1x32xf32, #tpu.memory_space<vmem>>, vector<1x1x32xf32>
    %132 = vector.shape_cast %131 : vector<1x1x32xf32> to vector<1x32xf32>
    %133 = vector.broadcast %132 : vector<1x32xf32> to vector<32x32xf32>
    %134 = arith.addf %130, %133 : vector<32x32xf32>
    %c3_71 = arith.constant 3 : index
    %c0_72 = arith.constant 0 : index
    %c0_73 = arith.constant 0 : index
    %135 = vector.load %arg5[%c3_71, %c0_72, %c0_73] : memref<12x1x32xf32, #tpu.memory_space<vmem>>, vector<1x1x32xf32>
    %136 = vector.shape_cast %135 : vector<1x1x32xf32> to vector<1x32xf32>
    %c3_74 = arith.constant 3 : index
    %c0_75 = arith.constant 0 : index
    %c0_76 = arith.constant 0 : index
    %137 = vector.load %arg6[%c3_74, %c0_75, %c0_76] : memref<12x1x32xf32, #tpu.memory_space<vmem>>, vector<1x1x32xf32>
    %138 = vector.shape_cast %137 : vector<1x1x32xf32> to vector<1x32xf32>
    %cst_77 = arith.constant dense<0.000000e+00> : vector<32xf32>
    %139 = vector.multi_reduction <add>, %134, %cst_77 [1] : vector<32x32xf32> to vector<32xf32>
    %140 = vector.shape_cast %139 : vector<32xf32> to vector<32x1xf32>
    %cst_78 = arith.constant 3.200000e+01 : f32
    %141 = vector.broadcast %cst_78 : f32 to vector<32x1xf32>
    %142 = arith.divf %140, %141 : vector<32x1xf32>
    %143 = vector.broadcast %142 : vector<32x1xf32> to vector<32x32xf32>
    %144 = arith.subf %134, %143 : vector<32x32xf32>
    %145 = arith.mulf %144, %144 : vector<32x32xf32>
    %cst_79 = arith.constant dense<0.000000e+00> : vector<32xf32>
    %146 = vector.multi_reduction <add>, %145, %cst_79 [1] : vector<32x32xf32> to vector<32xf32>
    %147 = vector.shape_cast %146 : vector<32xf32> to vector<32x1xf32>
    %cst_80 = arith.constant 3.200000e+01 : f32
    %148 = vector.broadcast %cst_80 : f32 to vector<32x1xf32>
    %149 = arith.divf %147, %148 : vector<32x1xf32>
    %cst_81 = arith.constant 9.99999974E-6 : f32
    %150 = vector.broadcast %cst_81 : f32 to vector<32x1xf32>
    %151 = arith.addf %149, %150 : vector<32x1xf32>
    %152 = math.rsqrt %151 : vector<32x1xf32>
    %153 = vector.broadcast %152 : vector<32x1xf32> to vector<32x32xf32>
    %154 = arith.mulf %144, %153 : vector<32x32xf32>
    %155 = vector.broadcast %136 : vector<1x32xf32> to vector<32x32xf32>
    %156 = arith.mulf %154, %155 : vector<32x32xf32>
    %157 = vector.broadcast %138 : vector<1x32xf32> to vector<32x32xf32>
    %158 = arith.addf %156, %157 : vector<32x32xf32>
    %cst_82 = arith.constant 0.000000e+00 : f32
    %159 = vector.broadcast %cst_82 : f32 to vector<32x32xf32>
    %160 = arith.cmpf ogt, %158, %159 : vector<32x32xf32>
    %cst_83 = arith.constant 2.000000e-01 : f32
    %161 = vector.broadcast %cst_83 : f32 to vector<32x32xf32>
    %162 = arith.mulf %161, %158 : vector<32x32xf32>
    %163 = arith.select %160, %158, %162 : vector<32x32xi1>, vector<32x32xf32>
    %164 = arith.truncf %163 : vector<32x32xf32> to vector<32x32xbf16>
    %c1_84 = arith.constant 1 : index
    %c0_85 = arith.constant 0 : index
    %c0_86 = arith.constant 0 : index
    %165 = vector.load %arg3[%c1_84, %c0_85, %c0_86] : memref<9x32x32xbf16, #tpu.memory_space<vmem>>, vector<1x32x32xbf16>
    %166 = vector.shape_cast %165 : vector<1x32x32xbf16> to vector<32x32xbf16>
    %cst_87 = arith.constant dense<0.000000e+00> : vector<32x32xf32>
    %167 = tpu.matmul %164, %166, %cst_87 {dimension_numbers = #tpu.dot_dimension_numbers<[1], [0], [0], [1], [0, 0, 1, 1], [], []>} : vector<32x32xbf16>, vector<32x32xbf16>, vector<32x32xf32> -> vector<32x32xf32>
    %c4 = arith.constant 4 : index
    %c0_88 = arith.constant 0 : index
    %c0_89 = arith.constant 0 : index
    %168 = vector.load %arg4[%c4, %c0_88, %c0_89] : memref<12x1x32xf32, #tpu.memory_space<vmem>>, vector<1x1x32xf32>
    %169 = vector.shape_cast %168 : vector<1x1x32xf32> to vector<1x32xf32>
    %170 = vector.broadcast %169 : vector<1x32xf32> to vector<32x32xf32>
    %171 = arith.addf %167, %170 : vector<32x32xf32>
    %c4_90 = arith.constant 4 : index
    %c0_91 = arith.constant 0 : index
    %c0_92 = arith.constant 0 : index
    %172 = vector.load %arg5[%c4_90, %c0_91, %c0_92] : memref<12x1x32xf32, #tpu.memory_space<vmem>>, vector<1x1x32xf32>
    %173 = vector.shape_cast %172 : vector<1x1x32xf32> to vector<1x32xf32>
    %c4_93 = arith.constant 4 : index
    %c0_94 = arith.constant 0 : index
    %c0_95 = arith.constant 0 : index
    %174 = vector.load %arg6[%c4_93, %c0_94, %c0_95] : memref<12x1x32xf32, #tpu.memory_space<vmem>>, vector<1x1x32xf32>
    %175 = vector.shape_cast %174 : vector<1x1x32xf32> to vector<1x32xf32>
    %cst_96 = arith.constant dense<0.000000e+00> : vector<32xf32>
    %176 = vector.multi_reduction <add>, %171, %cst_96 [1] : vector<32x32xf32> to vector<32xf32>
    %177 = vector.shape_cast %176 : vector<32xf32> to vector<32x1xf32>
    %cst_97 = arith.constant 3.200000e+01 : f32
    %178 = vector.broadcast %cst_97 : f32 to vector<32x1xf32>
    %179 = arith.divf %177, %178 : vector<32x1xf32>
    %180 = vector.broadcast %179 : vector<32x1xf32> to vector<32x32xf32>
    %181 = arith.subf %171, %180 : vector<32x32xf32>
    %182 = arith.mulf %181, %181 : vector<32x32xf32>
    %cst_98 = arith.constant dense<0.000000e+00> : vector<32xf32>
    %183 = vector.multi_reduction <add>, %182, %cst_98 [1] : vector<32x32xf32> to vector<32xf32>
    %184 = vector.shape_cast %183 : vector<32xf32> to vector<32x1xf32>
    %cst_99 = arith.constant 3.200000e+01 : f32
    %185 = vector.broadcast %cst_99 : f32 to vector<32x1xf32>
    %186 = arith.divf %184, %185 : vector<32x1xf32>
    %cst_100 = arith.constant 9.99999974E-6 : f32
    %187 = vector.broadcast %cst_100 : f32 to vector<32x1xf32>
    %188 = arith.addf %186, %187 : vector<32x1xf32>
    %189 = math.rsqrt %188 : vector<32x1xf32>
    %190 = vector.broadcast %189 : vector<32x1xf32> to vector<32x32xf32>
    %191 = arith.mulf %181, %190 : vector<32x32xf32>
    %192 = vector.broadcast %173 : vector<1x32xf32> to vector<32x32xf32>
    %193 = arith.mulf %191, %192 : vector<32x32xf32>
    %194 = vector.broadcast %175 : vector<1x32xf32> to vector<32x32xf32>
    %195 = arith.addf %193, %194 : vector<32x32xf32>
    %cst_101 = arith.constant 0.000000e+00 : f32
    %196 = vector.broadcast %cst_101 : f32 to vector<32x32xf32>
    %197 = arith.cmpf ogt, %195, %196 : vector<32x32xf32>
    %cst_102 = arith.constant 2.000000e-01 : f32
    %198 = vector.broadcast %cst_102 : f32 to vector<32x32xf32>
    %199 = arith.mulf %198, %195 : vector<32x32xf32>
    %200 = arith.select %197, %195, %199 : vector<32x32xi1>, vector<32x32xf32>
    %201 = arith.truncf %200 : vector<32x32xf32> to vector<32x32xbf16>
    %c2_103 = arith.constant 2 : index
    %c0_104 = arith.constant 0 : index
    %c0_105 = arith.constant 0 : index
    %202 = vector.load %arg3[%c2_103, %c0_104, %c0_105] : memref<9x32x32xbf16, #tpu.memory_space<vmem>>, vector<1x32x32xbf16>
    %203 = vector.shape_cast %202 : vector<1x32x32xbf16> to vector<32x32xbf16>
    %cst_106 = arith.constant dense<0.000000e+00> : vector<32x32xf32>
    %204 = tpu.matmul %201, %203, %cst_106 {dimension_numbers = #tpu.dot_dimension_numbers<[1], [0], [0], [1], [0, 0, 1, 1], [], []>} : vector<32x32xbf16>, vector<32x32xbf16>, vector<32x32xf32> -> vector<32x32xf32>
    %c5 = arith.constant 5 : index
    %c0_107 = arith.constant 0 : index
    %c0_108 = arith.constant 0 : index
    %205 = vector.load %arg4[%c5, %c0_107, %c0_108] : memref<12x1x32xf32, #tpu.memory_space<vmem>>, vector<1x1x32xf32>
    %206 = vector.shape_cast %205 : vector<1x1x32xf32> to vector<1x32xf32>
    %207 = vector.broadcast %206 : vector<1x32xf32> to vector<32x32xf32>
    %208 = arith.addf %204, %207 : vector<32x32xf32>
    %c5_109 = arith.constant 5 : index
    %c0_110 = arith.constant 0 : index
    %c0_111 = arith.constant 0 : index
    %209 = vector.load %arg5[%c5_109, %c0_110, %c0_111] : memref<12x1x32xf32, #tpu.memory_space<vmem>>, vector<1x1x32xf32>
    %210 = vector.shape_cast %209 : vector<1x1x32xf32> to vector<1x32xf32>
    %c5_112 = arith.constant 5 : index
    %c0_113 = arith.constant 0 : index
    %c0_114 = arith.constant 0 : index
    %211 = vector.load %arg6[%c5_112, %c0_113, %c0_114] : memref<12x1x32xf32, #tpu.memory_space<vmem>>, vector<1x1x32xf32>
    %212 = vector.shape_cast %211 : vector<1x1x32xf32> to vector<1x32xf32>
    %cst_115 = arith.constant dense<0.000000e+00> : vector<32xf32>
    %213 = vector.multi_reduction <add>, %208, %cst_115 [1] : vector<32x32xf32> to vector<32xf32>
    %214 = vector.shape_cast %213 : vector<32xf32> to vector<32x1xf32>
    %cst_116 = arith.constant 3.200000e+01 : f32
    %215 = vector.broadcast %cst_116 : f32 to vector<32x1xf32>
    %216 = arith.divf %214, %215 : vector<32x1xf32>
    %217 = vector.broadcast %216 : vector<32x1xf32> to vector<32x32xf32>
    %218 = arith.subf %208, %217 : vector<32x32xf32>
    %219 = arith.mulf %218, %218 : vector<32x32xf32>
    %cst_117 = arith.constant dense<0.000000e+00> : vector<32xf32>
    %220 = vector.multi_reduction <add>, %219, %cst_117 [1] : vector<32x32xf32> to vector<32xf32>
    %221 = vector.shape_cast %220 : vector<32xf32> to vector<32x1xf32>
    %cst_118 = arith.constant 3.200000e+01 : f32
    %222 = vector.broadcast %cst_118 : f32 to vector<32x1xf32>
    %223 = arith.divf %221, %222 : vector<32x1xf32>
    %cst_119 = arith.constant 9.99999974E-6 : f32
    %224 = vector.broadcast %cst_119 : f32 to vector<32x1xf32>
    %225 = arith.addf %223, %224 : vector<32x1xf32>
    %226 = math.rsqrt %225 : vector<32x1xf32>
    %227 = vector.broadcast %226 : vector<32x1xf32> to vector<32x32xf32>
    %228 = arith.mulf %218, %227 : vector<32x32xf32>
    %229 = vector.broadcast %210 : vector<1x32xf32> to vector<32x32xf32>
    %230 = arith.mulf %228, %229 : vector<32x32xf32>
    %231 = vector.broadcast %212 : vector<1x32xf32> to vector<32x32xf32>
    %232 = arith.addf %230, %231 : vector<32x32xf32>
    %cst_120 = arith.constant 0.000000e+00 : f32
    %233 = vector.broadcast %cst_120 : f32 to vector<32x32xf32>
    %234 = arith.cmpf ogt, %232, %233 : vector<32x32xf32>
    %cst_121 = arith.constant 2.000000e-01 : f32
    %235 = vector.broadcast %cst_121 : f32 to vector<32x32xf32>
    %236 = arith.mulf %235, %232 : vector<32x32xf32>
    %237 = arith.select %234, %232, %236 : vector<32x32xi1>, vector<32x32xf32>
    %c0_122 = arith.constant 0 : index
    %c0_123 = arith.constant 0 : index
    %c0_124 = arith.constant 0 : index
    %238 = vector.load %arg9[%c0_122, %c0_123, %c0_124] : memref<3x1x32xf32, #tpu.memory_space<vmem>>, vector<1x1x32xf32>
    %239 = vector.shape_cast %238 : vector<1x1x32xf32> to vector<1x32xf32>
    %240 = vector.broadcast %239 : vector<1x32xf32> to vector<32x32xf32>
    %241 = arith.mulf %237, %240 : vector<32x32xf32>
    %cst_125 = arith.constant dense<0.000000e+00> : vector<32xf32>
    %242 = vector.multi_reduction <add>, %241, %cst_125 [1] : vector<32x32xf32> to vector<32xf32>
    %243 = vector.shape_cast %242 : vector<32xf32> to vector<32x1xf32>
    %c0_126 = arith.constant 0 : index
    %c0_127 = arith.constant 0 : index
    %c0_128 = arith.constant 0 : index
    %244 = vector.load %arg10[%c0_126, %c0_127, %c0_128] : memref<3x1x1xf32, #tpu.memory_space<vmem>>, vector<1x1x1xf32>
    %245 = vector.shape_cast %244 : vector<1x1x1xf32> to vector<1x1xf32>
    %246 = vector.broadcast %245 : vector<1x1xf32> to vector<32x1xf32>
    %247 = arith.addf %243, %246 : vector<32x1xf32>
    %248 = arith.truncf %0 : vector<32x32xf32> to vector<32x32xbf16>
    %c3_129 = arith.constant 3 : index
    %c0_130 = arith.constant 0 : index
    %c0_131 = arith.constant 0 : index
    %249 = vector.load %arg3[%c3_129, %c0_130, %c0_131] : memref<9x32x32xbf16, #tpu.memory_space<vmem>>, vector<1x32x32xbf16>
    %250 = vector.shape_cast %249 : vector<1x32x32xbf16> to vector<32x32xbf16>
    %cst_132 = arith.constant dense<0.000000e+00> : vector<32x32xf32>
    %251 = tpu.matmul %248, %250, %cst_132 {dimension_numbers = #tpu.dot_dimension_numbers<[1], [0], [0], [1], [0, 0, 1, 1], [], []>} : vector<32x32xbf16>, vector<32x32xbf16>, vector<32x32xf32> -> vector<32x32xf32>
    %c6 = arith.constant 6 : index
    %c0_133 = arith.constant 0 : index
    %c0_134 = arith.constant 0 : index
    %252 = vector.load %arg4[%c6, %c0_133, %c0_134] : memref<12x1x32xf32, #tpu.memory_space<vmem>>, vector<1x1x32xf32>
    %253 = vector.shape_cast %252 : vector<1x1x32xf32> to vector<1x32xf32>
    %254 = vector.broadcast %253 : vector<1x32xf32> to vector<32x32xf32>
    %255 = arith.addf %251, %254 : vector<32x32xf32>
    %c6_135 = arith.constant 6 : index
    %c0_136 = arith.constant 0 : index
    %c0_137 = arith.constant 0 : index
    %256 = vector.load %arg5[%c6_135, %c0_136, %c0_137] : memref<12x1x32xf32, #tpu.memory_space<vmem>>, vector<1x1x32xf32>
    %257 = vector.shape_cast %256 : vector<1x1x32xf32> to vector<1x32xf32>
    %c6_138 = arith.constant 6 : index
    %c0_139 = arith.constant 0 : index
    %c0_140 = arith.constant 0 : index
    %258 = vector.load %arg6[%c6_138, %c0_139, %c0_140] : memref<12x1x32xf32, #tpu.memory_space<vmem>>, vector<1x1x32xf32>
    %259 = vector.shape_cast %258 : vector<1x1x32xf32> to vector<1x32xf32>
    %cst_141 = arith.constant dense<0.000000e+00> : vector<32xf32>
    %260 = vector.multi_reduction <add>, %255, %cst_141 [1] : vector<32x32xf32> to vector<32xf32>
    %261 = vector.shape_cast %260 : vector<32xf32> to vector<32x1xf32>
    %cst_142 = arith.constant 3.200000e+01 : f32
    %262 = vector.broadcast %cst_142 : f32 to vector<32x1xf32>
    %263 = arith.divf %261, %262 : vector<32x1xf32>
    %264 = vector.broadcast %263 : vector<32x1xf32> to vector<32x32xf32>
    %265 = arith.subf %255, %264 : vector<32x32xf32>
    %266 = arith.mulf %265, %265 : vector<32x32xf32>
    %cst_143 = arith.constant dense<0.000000e+00> : vector<32xf32>
    %267 = vector.multi_reduction <add>, %266, %cst_143 [1] : vector<32x32xf32> to vector<32xf32>
    %268 = vector.shape_cast %267 : vector<32xf32> to vector<32x1xf32>
    %cst_144 = arith.constant 3.200000e+01 : f32
    %269 = vector.broadcast %cst_144 : f32 to vector<32x1xf32>
    %270 = arith.divf %268, %269 : vector<32x1xf32>
    %cst_145 = arith.constant 9.99999974E-6 : f32
    %271 = vector.broadcast %cst_145 : f32 to vector<32x1xf32>
    %272 = arith.addf %270, %271 : vector<32x1xf32>
    %273 = math.rsqrt %272 : vector<32x1xf32>
    %274 = vector.broadcast %273 : vector<32x1xf32> to vector<32x32xf32>
    %275 = arith.mulf %265, %274 : vector<32x32xf32>
    %276 = vector.broadcast %257 : vector<1x32xf32> to vector<32x32xf32>
    %277 = arith.mulf %275, %276 : vector<32x32xf32>
    %278 = vector.broadcast %259 : vector<1x32xf32> to vector<32x32xf32>
    %279 = arith.addf %277, %278 : vector<32x32xf32>
    %cst_146 = arith.constant 0.000000e+00 : f32
    %280 = vector.broadcast %cst_146 : f32 to vector<32x32xf32>
    %281 = arith.cmpf ogt, %279, %280 : vector<32x32xf32>
    %cst_147 = arith.constant 2.000000e-01 : f32
    %282 = vector.broadcast %cst_147 : f32 to vector<32x32xf32>
    %283 = arith.mulf %282, %279 : vector<32x32xf32>
    %284 = arith.select %281, %279, %283 : vector<32x32xi1>, vector<32x32xf32>
    %285 = arith.truncf %284 : vector<32x32xf32> to vector<32x32xbf16>
    %c4_148 = arith.constant 4 : index
    %c0_149 = arith.constant 0 : index
    %c0_150 = arith.constant 0 : index
    %286 = vector.load %arg3[%c4_148, %c0_149, %c0_150] : memref<9x32x32xbf16, #tpu.memory_space<vmem>>, vector<1x32x32xbf16>
    %287 = vector.shape_cast %286 : vector<1x32x32xbf16> to vector<32x32xbf16>
    %cst_151 = arith.constant dense<0.000000e+00> : vector<32x32xf32>
    %288 = tpu.matmul %285, %287, %cst_151 {dimension_numbers = #tpu.dot_dimension_numbers<[1], [0], [0], [1], [0, 0, 1, 1], [], []>} : vector<32x32xbf16>, vector<32x32xbf16>, vector<32x32xf32> -> vector<32x32xf32>
    %c7 = arith.constant 7 : index
    %c0_152 = arith.constant 0 : index
    %c0_153 = arith.constant 0 : index
    %289 = vector.load %arg4[%c7, %c0_152, %c0_153] : memref<12x1x32xf32, #tpu.memory_space<vmem>>, vector<1x1x32xf32>
    %290 = vector.shape_cast %289 : vector<1x1x32xf32> to vector<1x32xf32>
    %291 = vector.broadcast %290 : vector<1x32xf32> to vector<32x32xf32>
    %292 = arith.addf %288, %291 : vector<32x32xf32>
    %c7_154 = arith.constant 7 : index
    %c0_155 = arith.constant 0 : index
    %c0_156 = arith.constant 0 : index
    %293 = vector.load %arg5[%c7_154, %c0_155, %c0_156] : memref<12x1x32xf32, #tpu.memory_space<vmem>>, vector<1x1x32xf32>
    %294 = vector.shape_cast %293 : vector<1x1x32xf32> to vector<1x32xf32>
    %c7_157 = arith.constant 7 : index
    %c0_158 = arith.constant 0 : index
    %c0_159 = arith.constant 0 : index
    %295 = vector.load %arg6[%c7_157, %c0_158, %c0_159] : memref<12x1x32xf32, #tpu.memory_space<vmem>>, vector<1x1x32xf32>
    %296 = vector.shape_cast %295 : vector<1x1x32xf32> to vector<1x32xf32>
    %cst_160 = arith.constant dense<0.000000e+00> : vector<32xf32>
    %297 = vector.multi_reduction <add>, %292, %cst_160 [1] : vector<32x32xf32> to vector<32xf32>
    %298 = vector.shape_cast %297 : vector<32xf32> to vector<32x1xf32>
    %cst_161 = arith.constant 3.200000e+01 : f32
    %299 = vector.broadcast %cst_161 : f32 to vector<32x1xf32>
    %300 = arith.divf %298, %299 : vector<32x1xf32>
    %301 = vector.broadcast %300 : vector<32x1xf32> to vector<32x32xf32>
    %302 = arith.subf %292, %301 : vector<32x32xf32>
    %303 = arith.mulf %302, %302 : vector<32x32xf32>
    %cst_162 = arith.constant dense<0.000000e+00> : vector<32xf32>
    %304 = vector.multi_reduction <add>, %303, %cst_162 [1] : vector<32x32xf32> to vector<32xf32>
    %305 = vector.shape_cast %304 : vector<32xf32> to vector<32x1xf32>
    %cst_163 = arith.constant 3.200000e+01 : f32
    %306 = vector.broadcast %cst_163 : f32 to vector<32x1xf32>
    %307 = arith.divf %305, %306 : vector<32x1xf32>
    %cst_164 = arith.constant 9.99999974E-6 : f32
    %308 = vector.broadcast %cst_164 : f32 to vector<32x1xf32>
    %309 = arith.addf %307, %308 : vector<32x1xf32>
    %310 = math.rsqrt %309 : vector<32x1xf32>
    %311 = vector.broadcast %310 : vector<32x1xf32> to vector<32x32xf32>
    %312 = arith.mulf %302, %311 : vector<32x32xf32>
    %313 = vector.broadcast %294 : vector<1x32xf32> to vector<32x32xf32>
    %314 = arith.mulf %312, %313 : vector<32x32xf32>
    %315 = vector.broadcast %296 : vector<1x32xf32> to vector<32x32xf32>
    %316 = arith.addf %314, %315 : vector<32x32xf32>
    %cst_165 = arith.constant 0.000000e+00 : f32
    %317 = vector.broadcast %cst_165 : f32 to vector<32x32xf32>
    %318 = arith.cmpf ogt, %316, %317 : vector<32x32xf32>
    %cst_166 = arith.constant 2.000000e-01 : f32
    %319 = vector.broadcast %cst_166 : f32 to vector<32x32xf32>
    %320 = arith.mulf %319, %316 : vector<32x32xf32>
    %321 = arith.select %318, %316, %320 : vector<32x32xi1>, vector<32x32xf32>
    %322 = arith.truncf %321 : vector<32x32xf32> to vector<32x32xbf16>
    %c5_167 = arith.constant 5 : index
    %c0_168 = arith.constant 0 : index
    %c0_169 = arith.constant 0 : index
    %323 = vector.load %arg3[%c5_167, %c0_168, %c0_169] : memref<9x32x32xbf16, #tpu.memory_space<vmem>>, vector<1x32x32xbf16>
    %324 = vector.shape_cast %323 : vector<1x32x32xbf16> to vector<32x32xbf16>
    %cst_170 = arith.constant dense<0.000000e+00> : vector<32x32xf32>
    %325 = tpu.matmul %322, %324, %cst_170 {dimension_numbers = #tpu.dot_dimension_numbers<[1], [0], [0], [1], [0, 0, 1, 1], [], []>} : vector<32x32xbf16>, vector<32x32xbf16>, vector<32x32xf32> -> vector<32x32xf32>
    %c8 = arith.constant 8 : index
    %c0_171 = arith.constant 0 : index
    %c0_172 = arith.constant 0 : index
    %326 = vector.load %arg4[%c8, %c0_171, %c0_172] : memref<12x1x32xf32, #tpu.memory_space<vmem>>, vector<1x1x32xf32>
    %327 = vector.shape_cast %326 : vector<1x1x32xf32> to vector<1x32xf32>
    %328 = vector.broadcast %327 : vector<1x32xf32> to vector<32x32xf32>
    %329 = arith.addf %325, %328 : vector<32x32xf32>
    %c8_173 = arith.constant 8 : index
    %c0_174 = arith.constant 0 : index
    %c0_175 = arith.constant 0 : index
    %330 = vector.load %arg5[%c8_173, %c0_174, %c0_175] : memref<12x1x32xf32, #tpu.memory_space<vmem>>, vector<1x1x32xf32>
    %331 = vector.shape_cast %330 : vector<1x1x32xf32> to vector<1x32xf32>
    %c8_176 = arith.constant 8 : index
    %c0_177 = arith.constant 0 : index
    %c0_178 = arith.constant 0 : index
    %332 = vector.load %arg6[%c8_176, %c0_177, %c0_178] : memref<12x1x32xf32, #tpu.memory_space<vmem>>, vector<1x1x32xf32>
    %333 = vector.shape_cast %332 : vector<1x1x32xf32> to vector<1x32xf32>
    %cst_179 = arith.constant dense<0.000000e+00> : vector<32xf32>
    %334 = vector.multi_reduction <add>, %329, %cst_179 [1] : vector<32x32xf32> to vector<32xf32>
    %335 = vector.shape_cast %334 : vector<32xf32> to vector<32x1xf32>
    %cst_180 = arith.constant 3.200000e+01 : f32
    %336 = vector.broadcast %cst_180 : f32 to vector<32x1xf32>
    %337 = arith.divf %335, %336 : vector<32x1xf32>
    %338 = vector.broadcast %337 : vector<32x1xf32> to vector<32x32xf32>
    %339 = arith.subf %329, %338 : vector<32x32xf32>
    %340 = arith.mulf %339, %339 : vector<32x32xf32>
    %cst_181 = arith.constant dense<0.000000e+00> : vector<32xf32>
    %341 = vector.multi_reduction <add>, %340, %cst_181 [1] : vector<32x32xf32> to vector<32xf32>
    %342 = vector.shape_cast %341 : vector<32xf32> to vector<32x1xf32>
    %cst_182 = arith.constant 3.200000e+01 : f32
    %343 = vector.broadcast %cst_182 : f32 to vector<32x1xf32>
    %344 = arith.divf %342, %343 : vector<32x1xf32>
    %cst_183 = arith.constant 9.99999974E-6 : f32
    %345 = vector.broadcast %cst_183 : f32 to vector<32x1xf32>
    %346 = arith.addf %344, %345 : vector<32x1xf32>
    %347 = math.rsqrt %346 : vector<32x1xf32>
    %348 = vector.broadcast %347 : vector<32x1xf32> to vector<32x32xf32>
    %349 = arith.mulf %339, %348 : vector<32x32xf32>
    %350 = vector.broadcast %331 : vector<1x32xf32> to vector<32x32xf32>
    %351 = arith.mulf %349, %350 : vector<32x32xf32>
    %352 = vector.broadcast %333 : vector<1x32xf32> to vector<32x32xf32>
    %353 = arith.addf %351, %352 : vector<32x32xf32>
    %cst_184 = arith.constant 0.000000e+00 : f32
    %354 = vector.broadcast %cst_184 : f32 to vector<32x32xf32>
    %355 = arith.cmpf ogt, %353, %354 : vector<32x32xf32>
    %cst_185 = arith.constant 2.000000e-01 : f32
    %356 = vector.broadcast %cst_185 : f32 to vector<32x32xf32>
    %357 = arith.mulf %356, %353 : vector<32x32xf32>
    %358 = arith.select %355, %353, %357 : vector<32x32xi1>, vector<32x32xf32>
    %c1_186 = arith.constant 1 : index
    %c0_187 = arith.constant 0 : index
    %c0_188 = arith.constant 0 : index
    %359 = vector.load %arg9[%c1_186, %c0_187, %c0_188] : memref<3x1x32xf32, #tpu.memory_space<vmem>>, vector<1x1x32xf32>
    %360 = vector.shape_cast %359 : vector<1x1x32xf32> to vector<1x32xf32>
    %361 = vector.broadcast %360 : vector<1x32xf32> to vector<32x32xf32>
    %362 = arith.mulf %358, %361 : vector<32x32xf32>
    %cst_189 = arith.constant dense<0.000000e+00> : vector<32xf32>
    %363 = vector.multi_reduction <add>, %362, %cst_189 [1] : vector<32x32xf32> to vector<32xf32>
    %364 = vector.shape_cast %363 : vector<32xf32> to vector<32x1xf32>
    %c1_190 = arith.constant 1 : index
    %c0_191 = arith.constant 0 : index
    %c0_192 = arith.constant 0 : index
    %365 = vector.load %arg10[%c1_190, %c0_191, %c0_192] : memref<3x1x1xf32, #tpu.memory_space<vmem>>, vector<1x1x1xf32>
    %366 = vector.shape_cast %365 : vector<1x1x1xf32> to vector<1x1xf32>
    %367 = vector.broadcast %366 : vector<1x1xf32> to vector<32x1xf32>
    %368 = arith.addf %364, %367 : vector<32x1xf32>
    %369 = arith.truncf %0 : vector<32x32xf32> to vector<32x32xbf16>
    %c6_193 = arith.constant 6 : index
    %c0_194 = arith.constant 0 : index
    %c0_195 = arith.constant 0 : index
    %370 = vector.load %arg3[%c6_193, %c0_194, %c0_195] : memref<9x32x32xbf16, #tpu.memory_space<vmem>>, vector<1x32x32xbf16>
    %371 = vector.shape_cast %370 : vector<1x32x32xbf16> to vector<32x32xbf16>
    %cst_196 = arith.constant dense<0.000000e+00> : vector<32x32xf32>
    %372 = tpu.matmul %369, %371, %cst_196 {dimension_numbers = #tpu.dot_dimension_numbers<[1], [0], [0], [1], [0, 0, 1, 1], [], []>} : vector<32x32xbf16>, vector<32x32xbf16>, vector<32x32xf32> -> vector<32x32xf32>
    %c9 = arith.constant 9 : index
    %c0_197 = arith.constant 0 : index
    %c0_198 = arith.constant 0 : index
    %373 = vector.load %arg4[%c9, %c0_197, %c0_198] : memref<12x1x32xf32, #tpu.memory_space<vmem>>, vector<1x1x32xf32>
    %374 = vector.shape_cast %373 : vector<1x1x32xf32> to vector<1x32xf32>
    %375 = vector.broadcast %374 : vector<1x32xf32> to vector<32x32xf32>
    %376 = arith.addf %372, %375 : vector<32x32xf32>
    %c9_199 = arith.constant 9 : index
    %c0_200 = arith.constant 0 : index
    %c0_201 = arith.constant 0 : index
    %377 = vector.load %arg5[%c9_199, %c0_200, %c0_201] : memref<12x1x32xf32, #tpu.memory_space<vmem>>, vector<1x1x32xf32>
    %378 = vector.shape_cast %377 : vector<1x1x32xf32> to vector<1x32xf32>
    %c9_202 = arith.constant 9 : index
    %c0_203 = arith.constant 0 : index
    %c0_204 = arith.constant 0 : index
    %379 = vector.load %arg6[%c9_202, %c0_203, %c0_204] : memref<12x1x32xf32, #tpu.memory_space<vmem>>, vector<1x1x32xf32>
    %380 = vector.shape_cast %379 : vector<1x1x32xf32> to vector<1x32xf32>
    %cst_205 = arith.constant dense<0.000000e+00> : vector<32xf32>
    %381 = vector.multi_reduction <add>, %376, %cst_205 [1] : vector<32x32xf32> to vector<32xf32>
    %382 = vector.shape_cast %381 : vector<32xf32> to vector<32x1xf32>
    %cst_206 = arith.constant 3.200000e+01 : f32
    %383 = vector.broadcast %cst_206 : f32 to vector<32x1xf32>
    %384 = arith.divf %382, %383 : vector<32x1xf32>
    %385 = vector.broadcast %384 : vector<32x1xf32> to vector<32x32xf32>
    %386 = arith.subf %376, %385 : vector<32x32xf32>
    %387 = arith.mulf %386, %386 : vector<32x32xf32>
    %cst_207 = arith.constant dense<0.000000e+00> : vector<32xf32>
    %388 = vector.multi_reduction <add>, %387, %cst_207 [1] : vector<32x32xf32> to vector<32xf32>
    %389 = vector.shape_cast %388 : vector<32xf32> to vector<32x1xf32>
    %cst_208 = arith.constant 3.200000e+01 : f32
    %390 = vector.broadcast %cst_208 : f32 to vector<32x1xf32>
    %391 = arith.divf %389, %390 : vector<32x1xf32>
    %cst_209 = arith.constant 9.99999974E-6 : f32
    %392 = vector.broadcast %cst_209 : f32 to vector<32x1xf32>
    %393 = arith.addf %391, %392 : vector<32x1xf32>
    %394 = math.rsqrt %393 : vector<32x1xf32>
    %395 = vector.broadcast %394 : vector<32x1xf32> to vector<32x32xf32>
    %396 = arith.mulf %386, %395 : vector<32x32xf32>
    %397 = vector.broadcast %378 : vector<1x32xf32> to vector<32x32xf32>
    %398 = arith.mulf %396, %397 : vector<32x32xf32>
    %399 = vector.broadcast %380 : vector<1x32xf32> to vector<32x32xf32>
    %400 = arith.addf %398, %399 : vector<32x32xf32>
    %cst_210 = arith.constant 0.000000e+00 : f32
    %401 = vector.broadcast %cst_210 : f32 to vector<32x32xf32>
    %402 = arith.cmpf ogt, %400, %401 : vector<32x32xf32>
    %cst_211 = arith.constant 2.000000e-01 : f32
    %403 = vector.broadcast %cst_211 : f32 to vector<32x32xf32>
    %404 = arith.mulf %403, %400 : vector<32x32xf32>
    %405 = arith.select %402, %400, %404 : vector<32x32xi1>, vector<32x32xf32>
    %406 = arith.truncf %405 : vector<32x32xf32> to vector<32x32xbf16>
    %c7_212 = arith.constant 7 : index
    %c0_213 = arith.constant 0 : index
    %c0_214 = arith.constant 0 : index
    %407 = vector.load %arg3[%c7_212, %c0_213, %c0_214] : memref<9x32x32xbf16, #tpu.memory_space<vmem>>, vector<1x32x32xbf16>
    %408 = vector.shape_cast %407 : vector<1x32x32xbf16> to vector<32x32xbf16>
    %cst_215 = arith.constant dense<0.000000e+00> : vector<32x32xf32>
    %409 = tpu.matmul %406, %408, %cst_215 {dimension_numbers = #tpu.dot_dimension_numbers<[1], [0], [0], [1], [0, 0, 1, 1], [], []>} : vector<32x32xbf16>, vector<32x32xbf16>, vector<32x32xf32> -> vector<32x32xf32>
    %c10 = arith.constant 10 : index
    %c0_216 = arith.constant 0 : index
    %c0_217 = arith.constant 0 : index
    %410 = vector.load %arg4[%c10, %c0_216, %c0_217] : memref<12x1x32xf32, #tpu.memory_space<vmem>>, vector<1x1x32xf32>
    %411 = vector.shape_cast %410 : vector<1x1x32xf32> to vector<1x32xf32>
    %412 = vector.broadcast %411 : vector<1x32xf32> to vector<32x32xf32>
    %413 = arith.addf %409, %412 : vector<32x32xf32>
    %c10_218 = arith.constant 10 : index
    %c0_219 = arith.constant 0 : index
    %c0_220 = arith.constant 0 : index
    %414 = vector.load %arg5[%c10_218, %c0_219, %c0_220] : memref<12x1x32xf32, #tpu.memory_space<vmem>>, vector<1x1x32xf32>
    %415 = vector.shape_cast %414 : vector<1x1x32xf32> to vector<1x32xf32>
    %c10_221 = arith.constant 10 : index
    %c0_222 = arith.constant 0 : index
    %c0_223 = arith.constant 0 : index
    %416 = vector.load %arg6[%c10_221, %c0_222, %c0_223] : memref<12x1x32xf32, #tpu.memory_space<vmem>>, vector<1x1x32xf32>
    %417 = vector.shape_cast %416 : vector<1x1x32xf32> to vector<1x32xf32>
    %cst_224 = arith.constant dense<0.000000e+00> : vector<32xf32>
    %418 = vector.multi_reduction <add>, %413, %cst_224 [1] : vector<32x32xf32> to vector<32xf32>
    %419 = vector.shape_cast %418 : vector<32xf32> to vector<32x1xf32>
    %cst_225 = arith.constant 3.200000e+01 : f32
    %420 = vector.broadcast %cst_225 : f32 to vector<32x1xf32>
    %421 = arith.divf %419, %420 : vector<32x1xf32>
    %422 = vector.broadcast %421 : vector<32x1xf32> to vector<32x32xf32>
    %423 = arith.subf %413, %422 : vector<32x32xf32>
    %424 = arith.mulf %423, %423 : vector<32x32xf32>
    %cst_226 = arith.constant dense<0.000000e+00> : vector<32xf32>
    %425 = vector.multi_reduction <add>, %424, %cst_226 [1] : vector<32x32xf32> to vector<32xf32>
    %426 = vector.shape_cast %425 : vector<32xf32> to vector<32x1xf32>
    %cst_227 = arith.constant 3.200000e+01 : f32
    %427 = vector.broadcast %cst_227 : f32 to vector<32x1xf32>
    %428 = arith.divf %426, %427 : vector<32x1xf32>
    %cst_228 = arith.constant 9.99999974E-6 : f32
    %429 = vector.broadcast %cst_228 : f32 to vector<32x1xf32>
    %430 = arith.addf %428, %429 : vector<32x1xf32>
    %431 = math.rsqrt %430 : vector<32x1xf32>
    %432 = vector.broadcast %431 : vector<32x1xf32> to vector<32x32xf32>
    %433 = arith.mulf %423, %432 : vector<32x32xf32>
    %434 = vector.broadcast %415 : vector<1x32xf32> to vector<32x32xf32>
    %435 = arith.mulf %433, %434 : vector<32x32xf32>
    %436 = vector.broadcast %417 : vector<1x32xf32> to vector<32x32xf32>
    %437 = arith.addf %435, %436 : vector<32x32xf32>
    %cst_229 = arith.constant 0.000000e+00 : f32
    %438 = vector.broadcast %cst_229 : f32 to vector<32x32xf32>
    %439 = arith.cmpf ogt, %437, %438 : vector<32x32xf32>
    %cst_230 = arith.constant 2.000000e-01 : f32
    %440 = vector.broadcast %cst_230 : f32 to vector<32x32xf32>
    %441 = arith.mulf %440, %437 : vector<32x32xf32>
    %442 = arith.select %439, %437, %441 : vector<32x32xi1>, vector<32x32xf32>
    %443 = arith.truncf %442 : vector<32x32xf32> to vector<32x32xbf16>
    %c8_231 = arith.constant 8 : index
    %c0_232 = arith.constant 0 : index
    %c0_233 = arith.constant 0 : index
    %444 = vector.load %arg3[%c8_231, %c0_232, %c0_233] : memref<9x32x32xbf16, #tpu.memory_space<vmem>>, vector<1x32x32xbf16>
    %445 = vector.shape_cast %444 : vector<1x32x32xbf16> to vector<32x32xbf16>
    %cst_234 = arith.constant dense<0.000000e+00> : vector<32x32xf32>
    %446 = tpu.matmul %443, %445, %cst_234 {dimension_numbers = #tpu.dot_dimension_numbers<[1], [0], [0], [1], [0, 0, 1, 1], [], []>} : vector<32x32xbf16>, vector<32x32xbf16>, vector<32x32xf32> -> vector<32x32xf32>
    %c11 = arith.constant 11 : index
    %c0_235 = arith.constant 0 : index
    %c0_236 = arith.constant 0 : index
    %447 = vector.load %arg4[%c11, %c0_235, %c0_236] : memref<12x1x32xf32, #tpu.memory_space<vmem>>, vector<1x1x32xf32>
    %448 = vector.shape_cast %447 : vector<1x1x32xf32> to vector<1x32xf32>
    %449 = vector.broadcast %448 : vector<1x32xf32> to vector<32x32xf32>
    %450 = arith.addf %446, %449 : vector<32x32xf32>
    %c11_237 = arith.constant 11 : index
    %c0_238 = arith.constant 0 : index
    %c0_239 = arith.constant 0 : index
    %451 = vector.load %arg5[%c11_237, %c0_238, %c0_239] : memref<12x1x32xf32, #tpu.memory_space<vmem>>, vector<1x1x32xf32>
    %452 = vector.shape_cast %451 : vector<1x1x32xf32> to vector<1x32xf32>
    %c11_240 = arith.constant 11 : index
    %c0_241 = arith.constant 0 : index
    %c0_242 = arith.constant 0 : index
    %453 = vector.load %arg6[%c11_240, %c0_241, %c0_242] : memref<12x1x32xf32, #tpu.memory_space<vmem>>, vector<1x1x32xf32>
    %454 = vector.shape_cast %453 : vector<1x1x32xf32> to vector<1x32xf32>
    %cst_243 = arith.constant dense<0.000000e+00> : vector<32xf32>
    %455 = vector.multi_reduction <add>, %450, %cst_243 [1] : vector<32x32xf32> to vector<32xf32>
    %456 = vector.shape_cast %455 : vector<32xf32> to vector<32x1xf32>
    %cst_244 = arith.constant 3.200000e+01 : f32
    %457 = vector.broadcast %cst_244 : f32 to vector<32x1xf32>
    %458 = arith.divf %456, %457 : vector<32x1xf32>
    %459 = vector.broadcast %458 : vector<32x1xf32> to vector<32x32xf32>
    %460 = arith.subf %450, %459 : vector<32x32xf32>
    %461 = arith.mulf %460, %460 : vector<32x32xf32>
    %cst_245 = arith.constant dense<0.000000e+00> : vector<32xf32>
    %462 = vector.multi_reduction <add>, %461, %cst_245 [1] : vector<32x32xf32> to vector<32xf32>
    %463 = vector.shape_cast %462 : vector<32xf32> to vector<32x1xf32>
    %cst_246 = arith.constant 3.200000e+01 : f32
    %464 = vector.broadcast %cst_246 : f32 to vector<32x1xf32>
    %465 = arith.divf %463, %464 : vector<32x1xf32>
    %cst_247 = arith.constant 9.99999974E-6 : f32
    %466 = vector.broadcast %cst_247 : f32 to vector<32x1xf32>
    %467 = arith.addf %465, %466 : vector<32x1xf32>
    %468 = math.rsqrt %467 : vector<32x1xf32>
    %469 = vector.broadcast %468 : vector<32x1xf32> to vector<32x32xf32>
    %470 = arith.mulf %460, %469 : vector<32x32xf32>
    %471 = vector.broadcast %452 : vector<1x32xf32> to vector<32x32xf32>
    %472 = arith.mulf %470, %471 : vector<32x32xf32>
    %473 = vector.broadcast %454 : vector<1x32xf32> to vector<32x32xf32>
    %474 = arith.addf %472, %473 : vector<32x32xf32>
    %cst_248 = arith.constant 0.000000e+00 : f32
    %475 = vector.broadcast %cst_248 : f32 to vector<32x32xf32>
    %476 = arith.cmpf ogt, %474, %475 : vector<32x32xf32>
    %cst_249 = arith.constant 2.000000e-01 : f32
    %477 = vector.broadcast %cst_249 : f32 to vector<32x32xf32>
    %478 = arith.mulf %477, %474 : vector<32x32xf32>
    %479 = arith.select %476, %474, %478 : vector<32x32xi1>, vector<32x32xf32>
    %c2_250 = arith.constant 2 : index
    %c0_251 = arith.constant 0 : index
    %c0_252 = arith.constant 0 : index
    %480 = vector.load %arg9[%c2_250, %c0_251, %c0_252] : memref<3x1x32xf32, #tpu.memory_space<vmem>>, vector<1x1x32xf32>
    %481 = vector.shape_cast %480 : vector<1x1x32xf32> to vector<1x32xf32>
    %482 = vector.broadcast %481 : vector<1x32xf32> to vector<32x32xf32>
    %483 = arith.mulf %479, %482 : vector<32x32xf32>
    %cst_253 = arith.constant dense<0.000000e+00> : vector<32xf32>
    %484 = vector.multi_reduction <add>, %483, %cst_253 [1] : vector<32x32xf32> to vector<32xf32>
    %485 = vector.shape_cast %484 : vector<32xf32> to vector<32x1xf32>
    %c2_254 = arith.constant 2 : index
    %c0_255 = arith.constant 0 : index
    %c0_256 = arith.constant 0 : index
    %486 = vector.load %arg10[%c2_254, %c0_255, %c0_256] : memref<3x1x1xf32, #tpu.memory_space<vmem>>, vector<1x1x1xf32>
    %487 = vector.shape_cast %486 : vector<1x1x1xf32> to vector<1x1xf32>
    %488 = vector.broadcast %487 : vector<1x1xf32> to vector<32x1xf32>
    %489 = arith.addf %485, %488 : vector<32x1xf32>
    %490 = arith.truncf %126 : vector<32x64xf32> to vector<32x64xbf16>
    %c0_257 = arith.constant 0 : index
    %c0_258 = arith.constant 0 : index
    %491 = vector.load %arg11[%c0_257, %c0_258] : memref<64x128xbf16, #tpu.memory_space<vmem>>, vector<64x128xbf16>
    %cst_259 = arith.constant dense<0.000000e+00> : vector<32x128xf32>
    %492 = tpu.matmul %490, %491, %cst_259 {dimension_numbers = #tpu.dot_dimension_numbers<[1], [0], [0], [1], [0, 0, 1, 1], [], []>} : vector<32x64xbf16>, vector<64x128xbf16>, vector<32x128xf32> -> vector<32x128xf32>
    %493 = math.absf %489 : vector<32x1xf32>
    %494 = arith.mulf %247, %493 : vector<32x1xf32>
    %495 = vector.broadcast %494 : vector<32x1xf32> to vector<32x128xf32>
    %496 = arith.mulf %492, %495 : vector<32x128xf32>
    %c0_260 = arith.constant 0 : index
    %c0_261 = arith.constant 0 : index
    %497 = vector.load %arg12[%c0_260, %c0_261] : memref<32x128xf32, #tpu.memory_space<vmem>>, vector<32x128xf32>
    tpu.vector_store %arg12[%c0_260, %c0_261], %496 {strides = array<i32>} : memref<32x128xf32, #tpu.memory_space<vmem>>, vector<32x128xf32>,
    %498 = math.sin %368 : vector<32x1xf32>
    %c0_262 = arith.constant 0 : index
    %c0_263 = arith.constant 0 : index
    %499 = vector.load %arg13[%c0_262, %c0_263] : memref<32x1xf32, #tpu.memory_space<vmem>>, vector<32x1xf32>
    tpu.vector_store %arg13[%c0_262, %c0_263], %498 {strides = array<i32>} : memref<32x1xf32, #tpu.memory_space<vmem>>, vector<32x1xf32>,
    return
  }
  func.func @transform_0(%arg0: i32) -> (i32, i32) {
    %c0_i32 = arith.constant 0 : i32
    %c0_i32_0 = arith.constant 0 : i32
    return %arg0, %c0_i32 : i32, i32
  }
  func.func @transform_1(%arg0: i32) -> (i32, i32, i32) {
    %c0_i32 = arith.constant 0 : i32
    %c0_i32_0 = arith.constant 0 : i32
    %c0_i32_1 = arith.constant 0 : i32
    %c0_i32_2 = arith.constant 0 : i32
    return %c0_i32, %c0_i32_0, %c0_i32_1 : i32, i32, i32
  }
  func.func @transform_2(%arg0: i32) -> (i32, i32, i32) {
    %c0_i32 = arith.constant 0 : i32
    %c0_i32_0 = arith.constant 0 : i32
    %c0_i32_1 = arith.constant 0 : i32
    %c0_i32_2 = arith.constant 0 : i32
    return %c0_i32, %c0_i32_0, %c0_i32_1 : i32, i32, i32
  }
  func.func @transform_3(%arg0: i32) -> (i32, i32, i32) {
    %c0_i32 = arith.constant 0 : i32
    %c0_i32_0 = arith.constant 0 : i32
    %c0_i32_1 = arith.constant 0 : i32
    %c0_i32_2 = arith.constant 0 : i32
    return %c0_i32, %c0_i32_0, %c0_i32_1 : i32, i32, i32
  }
  func.func @transform_4(%arg0: i32) -> (i32, i32, i32) {
    %c0_i32 = arith.constant 0 : i32
    %c0_i32_0 = arith.constant 0 : i32
    %c0_i32_1 = arith.constant 0 : i32
    %c0_i32_2 = arith.constant 0 : i32
    return %c0_i32, %c0_i32_0, %c0_i32_1 : i32, i32, i32
  }
  func.func @transform_5(%arg0: i32) -> (i32, i32, i32) {
    %c0_i32 = arith.constant 0 : i32
    %c0_i32_0 = arith.constant 0 : i32
    %c0_i32_1 = arith.constant 0 : i32
    %c0_i32_2 = arith.constant 0 : i32
    return %c0_i32, %c0_i32_0, %c0_i32_1 : i32, i32, i32
  }
  func.func @transform_6(%arg0: i32) -> (i32, i32) {
    %c0_i32 = arith.constant 0 : i32
    %c0_i32_0 = arith.constant 0 : i32
    %c0_i32_1 = arith.constant 0 : i32
    return %c0_i32, %c0_i32_0 : i32, i32
  }
  func.func @transform_7(%arg0: i32) -> (i32, i32) {
    %c0_i32 = arith.constant 0 : i32
    %c0_i32_0 = arith.constant 0 : i32
    %c0_i32_1 = arith.constant 0 : i32
    return %c0_i32, %c0_i32_0 : i32, i32
  }
  func.func @transform_8(%arg0: i32) -> (i32, i32, i32) {
    %c0_i32 = arith.constant 0 : i32
    %c0_i32_0 = arith.constant 0 : i32
    %c0_i32_1 = arith.constant 0 : i32
    %c0_i32_2 = arith.constant 0 : i32
    return %c0_i32, %c0_i32_0, %c0_i32_1 : i32, i32, i32
  }
  func.func @transform_9(%arg0: i32) -> (i32, i32, i32) {
    %c0_i32 = arith.constant 0 : i32
    %c0_i32_0 = arith.constant 0 : i32
    %c0_i32_1 = arith.constant 0 : i32
    %c0_i32_2 = arith.constant 0 : i32
    return %c0_i32, %c0_i32_0, %c0_i32_1 : i32, i32, i32
  }
  func.func @transform_10(%arg0: i32) -> (i32, i32) {
    %c0_i32 = arith.constant 0 : i32
    %c0_i32_0 = arith.constant 0 : i32
    %c0_i32_1 = arith.constant 0 : i32
    return %c0_i32, %c0_i32_0 : i32, i32
  }
  func.func @transform_11(%arg0: i32) -> (i32, i32) {
    %c0_i32 = arith.constant 0 : i32
    %c0_i32_0 = arith.constant 0 : i32
    return %arg0, %c0_i32 : i32, i32
  }
  func.func @transform_12(%arg0: i32) -> (i32, i32) {
    %c0_i32 = arith.constant 0 : i32
    %c0_i32_0 = arith.constant 0 : i32
    return %arg0, %c0_i32 : i32, i32
  }
}

</mosaic_0001>

<bundles_post_ra>
// kernel: _lambda_.1
= control target key start
LH: loop header
LB: loop body
LE: loop exit
PB: predicated region body
PF: predicated region fallthrough
CT: control target
= control target key end

     0   :  { %18 = vsyncpa [#allocation3], 0  ;;  %s4889_s0 = inlined_call_operand.vmem [shape: f32[32,32], index: 0, kind: input, shape index: {}]   ;;  %s4890_s1 = inlined_call_operand.hbm [shape: f32[3,32,32], index: 1, kind: input, shape index: {}]   ;;  %s4891_s2 = inlined_call_operand.hbm [shape: bf16[9,32,32], index: 2, kind: input, shape index: {}]   ;;  %s4892_s3 = inlined_call_operand.hbm [shape: f32[12,1,32], index: 3, kind: input, shape index: {}]   ;;  %s4893_s4 = inlined_call_operand.vmem [shape: f32[12,1,32], index: 4, kind: input, shape index: {}]   ;;  %s4894_s5 = inlined_call_operand.vmem [shape: f32[12,1,32], index: 5, kind: input, shape index: {}]   ;;  %s4895_s6 = inlined_call_operand.hbm [shape: f32[32,64], index: 6, kind: input, shape index: {}]   ;;  %s4896_s7 = inlined_call_operand.hbm [shape: f32[1,64], index: 7, kind: input, shape index: {}]   ;;  %s4897_s8 = inlined_call_operand.hbm [shape: f32[3,1,32], index: 8, kind: input, shape index: {}]   ;;  %s4898_s9 = inlined_call_operand.hbm [shape: f32[3,1,1], index: 9, kind: input, shape index: {}]   ;;  %s4899_s10 = inlined_call_operand.hbm [shape: bf16[64,128], index: 10, kind: input, shape index: {}]   ;;  %s4900_s11 = inlined_call_operand.vmem [shape: f32[32,128], index: 11, kind: output, shape index: {0}]   ;;  %s4901_s12 = inlined_call_operand.vmem [shape: f32[32,1], index: 12, kind: output, shape index: {1}]  }
   0x1   :  { %19 = vsyncpa [#allocation5], 0 }
   0x2   :  { %20 = vsyncpa [#allocation8], 0 }
   0x3   :  { %21 = vsyncpa [#allocation11], 0 }
   0x4   :  { %22 = vsyncpa [#allocation14], 0  ;;  %s3826_s21 = smov [#allocation4]  }
   0x5   :  { %s42_s22 = sshll.u32 %s3826_s21, 4  ;;  %s43_s22 = int_to_ptr.vmem [resolvable:$true] %s42_s22 }
   0x6   :  { %s3664_s23 = scalar_lea.vmem %s43_s22, 2304  ;;  %p3669_p1 = scmp.lt.s32.totalorder %s43_s22, %s43_s22 }
   0x7   :  { %p3665_p0 = scmp.ne.s32.totalorder %s43_s22, %s3664_s23  ;;  %p3670_p2 = scmp.lt.s32.totalorder %s3664_s23, %s3664_s23 }
   0x9   :  { %p3671_p3 = por %p3670_p2, %p3669_p1 }
   0xb   :  { %p3672_p4 = pnand %p3671_p3, %p3665_p0 }
   0xd   :  { %3675 = shalt.err (!%p3672_p4)
}
   0xe   :  { %s3827_s24 = smov 64   ;;  %s3828_s25 = smov 4  }
   0xf   :  { %48 = dma.hbm_to_vmem [thread:$0]  %s4891_s2, 2304, %s43_s22, [#allocation5], %s3827_s24, %s3827_s24, %s3828_s25  }
  0x10   :  { %s3829_s28 = smov [#allocation7]  }
  0x11   :  { %s70_s29 = sshll.u32 %s3829_s28, 4  ;;  %s71_s29 = int_to_ptr.vmem [resolvable:$true] %s70_s29 }
  0x12   :  { %s3684_s30 = scalar_lea.vmem %s71_s29, 512  ;;  %p3689_p6 = scmp.lt.s32.totalorder %s71_s29, %s71_s29 }
  0x13   :  { %p3685_p5 = scmp.ne.s32.totalorder %s71_s29, %s3684_s30  ;;  %p3690_p7 = scmp.lt.s32.totalorder %s3684_s30, %s3684_s30 }
  0x15   :  { %p3691_p8 = por %p3690_p7, %p3689_p6 }
  0x17   :  { %p3692_p9 = pnand %p3691_p8, %p3685_p5 }
  0x19   :  { %3695 = shalt.err (!%p3692_p9)
}
  0x1a   :  { %s3830_s13 = smov 128   ;;  %s3831_s14 = smov 8  }
  0x1b   :  { %76 = dma.hbm_to_vmem [thread:$0]  %s4895_s6, 512, %s71_s29, [#allocation8], %s3830_s13, %s3830_s13, %s3831_s14  }
  0x1c   :  { %s3832_s2 = smov [#allocation10]   ;;  %s3833_s18 = smov [#allocation2]  }
  0x1d   :  { %s92_s17 = sshll.u32 %s3832_s2, 4  ;;  %s30_s19 = sshll.u32 %s3833_s18, 4  ;;  %s93_s17 = int_to_ptr.vmem [resolvable:$true] %s92_s17  ;;  %s31_s19 = int_to_ptr.vmem [resolvable:$true] %s30_s19 }
  0x1e   :  { %s3704_s20 = scalar_lea.vmem %s93_s17, 48  ;;  %s3708_s21 = scalar_lea.vmem %s93_s17, 64 }
  0x1f   :  { %p3705_p10 = scmp.ne.s32.totalorder %s93_s17, %s3704_s20  ;;  %p3709_p11 = scmp.lt.s32.totalorder %s93_s17, %s93_s17 }
  0x20   :  { %p3710_p12 = scmp.lt.s32.totalorder %s3708_s21, %s3704_s20 }
  0x22   :  { %p3711_p13 = por %p3710_p12, %p3709_p11 }
  0x24   :  { %p3712_p0 = pnand %p3711_p13, %p3705_p10 }
  0x26   :  { %3715 = shalt.err (!%p3712_p0)
}
  0x27   :  { %s3834_s22 = smov 16   ;;  %s3835_s23 = smov 1  }
  0x28   :  { %98 = dma.hbm_to_vmem [thread:$0]  %s4897_s8, 48, %s93_s17, [#allocation11], %s3834_s22, %s3834_s22, %s3835_s23  }
  0x29   :  { %s3724_s27 = scalar_lea.vmem %s31_s19, 1536  ;;  %p3729_p2 = scmp.lt.s32.totalorder %s31_s19, %s31_s19 }
  0x2a   :  { %p3725_p1 = scmp.ne.s32.totalorder %s31_s19, %s3724_s27  ;;  %p3730_p3 = scmp.lt.s32.totalorder %s3724_s27, %s3724_s27 }
  0x2c   :  { %p3731_p4 = por %p3730_p3, %p3729_p2 }
  0x2e   :  { %p3732_p5 = pnand %p3731_p4, %p3725_p1 }
  0x30   :  { %3735 = shalt.err (!%p3732_p5)
}
  0x31   :  { %36 = dma.hbm_to_vmem [thread:$0]  %s4890_s1, 1536, %s31_s19, [#allocation3], %s3830_s13, %s3830_s13, %s3831_s14  }
  0x32   :  { %s3836_s30 = smov [#allocation6]   ;;  %s3837_s16 = smov [#allocation9]  }
  0x33   :  { %s54_s15 = sshll.u32 %s3836_s30, 4  ;;  %s83_s2 = sshll.u32 %s3837_s16, 4  ;;  %s55_s15 = int_to_ptr.vmem [resolvable:$true] %s54_s15  ;;  %s84_s2 = int_to_ptr.vmem [resolvable:$true] %s83_s2 }
  0x34   :  { %s3744_s8 = scalar_lea.vmem %s55_s15, 192  ;;  %p3749_p7 = scmp.lt.s32.totalorder %s55_s15, %s55_s15 }
  0x35   :  { %p3745_p6 = scmp.ne.s32.totalorder %s55_s15, %s3744_s8  ;;  %p3750_p8 = scmp.lt.s32.totalorder %s3744_s8, %s3744_s8 }
  0x37   :  { %p3751_p9 = por %p3750_p8, %p3749_p7 }
  0x39   :  { %p3752_p10 = pnand %p3751_p9, %p3745_p6 }
  0x3b   :  { %3755 = shalt.err (!%p3752_p10)
}
  0x3c   :  { %60 = dma.hbm_to_vmem [thread:$0]  %s4892_s3, 192, %s55_s15, [#allocation5], %s3834_s22, %s3834_s22, %s3835_s23  }
  0x3d   :  { %s3764_s1 = scalar_lea.vmem %s84_s2, 16  ;;  %s3768_s13 = scalar_lea.vmem %s84_s2, 32 }
  0x3e   :  { %p3765_p11 = scmp.ne.s32.totalorder %s84_s2, %s3764_s1  ;;  %p3769_p12 = scmp.lt.s32.totalorder %s84_s2, %s84_s2 }
  0x3f   :  { %p3770_p13 = scmp.lt.s32.totalorder %s3768_s13, %s3764_s1 }
  0x41   :  { %p3771_p0 = por %p3770_p13, %p3769_p12 }
  0x43   :  { %p3772_p1 = pnand %p3771_p0, %p3765_p11 }
  0x45   :  { %3775 = shalt.err (!%p3772_p1)
}
  0x46   :  { %86 = dma.hbm_to_vmem [thread:$0]  %s4896_s7, 16, %s84_s2, [#allocation8]  }
  0x47   :  { %s3838_s20 = smov [#allocation12]   ;;  %s3839_s6 = smov [#allocation13]  }
  0x48   :  { %s104_s21 = sshll.u32 %s3838_s20, 4  ;;  %s116_s26 = sshll.u32 %s3839_s6, 4  ;;  %s105_s21 = int_to_ptr.vmem [resolvable:$true] %s104_s21  ;;  %s117_s26 = int_to_ptr.vmem [resolvable:$true] %s116_s26 }
  0x49   :  { %s3784_s27 = scalar_lea.vmem %s105_s21, 48  ;;  %s3788_s3 = scalar_lea.vmem %s105_s21, 64 }
  0x4a   :  { %p3785_p2 = scmp.ne.s32.totalorder %s105_s21, %s3784_s27  ;;  %p3789_p3 = scmp.lt.s32.totalorder %s105_s21, %s105_s21 }
  0x4b   :  { %p3790_p4 = scmp.lt.s32.totalorder %s3788_s3, %s3784_s27 }
  0x4d   :  { %p3791_p5 = por %p3790_p4, %p3789_p3 }
  0x4f   :  { %p3792_p6 = pnand %p3791_p5, %p3785_p2 }
  0x51   :  { %3795 = shalt.err (!%p3792_p6)
}
  0x52   :  { %110 = dma.hbm_to_vmem [thread:$0]  %s4898_s9, 48, %s105_s21, [#allocation11], %s3834_s22, %s3834_s22, %s3835_s23  }
  0x53   :  { %s3804_s7 = scalar_lea.vmem %s117_s26, 512  ;;  %p3809_p8 = scmp.lt.s32.totalorder %s117_s26, %s117_s26 }
  0x54   :  { %p3805_p7 = scmp.ne.s32.totalorder %s117_s26, %s3804_s7  ;;  %p3810_p9 = scmp.lt.s32.totalorder %s3804_s7, %s3804_s7 }
  0x56   :  { %p3811_p10 = por %p3810_p9, %p3809_p8 }
  0x58   :  { %p3812_p11 = pnand %p3811_p10, %p3805_p7 }
  0x5a   :  { %3815 = shalt.err (!%p3812_p11)
}
  0x5b   :  { %122 = dma.hbm_to_vmem [thread:$0]  %s4899_s10, 512, %s117_s26, [#allocation14], %s3827_s24, %s3827_s24, %s3828_s25  }
  0x5c   :  { %3816 = dma.done.wait [#allocation3], 1536  }
  0x5d   :  { %3817 = vsyncadd [#allocation3], 4294965760 }
  0x5e   :  { %3818 = dma.done.wait [#allocation5], 2496  }
  0x5f   :  { %3819 = vsyncadd [#allocation5], 4294964800 }
  0x60   :  { %3820 = dma.done.wait [#allocation8], 528  }
  0x61   :  { %3821 = vsyncadd [#allocation8], 4294966768 }
  0x62   :  { %3822 = dma.done.wait [#allocation11], 96  }
  0x63   :  { %3823 = vsyncadd [#allocation11], 4294967200 }
  0x64   :  { %3824 = dma.done.wait [#allocation14], 512  }
  0x65   :  { %3825 = vsyncadd [#allocation14], 4294966784  ;;  %vm163_vm0 = vcmask 261120   ;;  %v155_v0 = vld [vmem:[#allocation2 + $0x18] sm:$0xff]  ;;  %v154_v1 = vld [vmem:[#allocation2 + $0x10] sm:$0xff] }
  0x66   :  { %3342 = vmatprep.subr.mxu0 %v155_v0  ;;  %v153_v2 = vld [vmem:[#allocation2 + $0x8] sm:$0xff]  ;;  %v148_v3 = vld [vmem:[%s4889_s0] sm:$0xff]  ;;  %v150_v7 = vld [vmem:[%s4889_s0 + $0x10] sm:$0xff] }
  0x67   :  { %v149_v4 = vld [vmem:[%s4889_s0 + $0x8] sm:$0xff]  ;;  %3343 = vmatpush3.msra.mxu0 %v155_v0  ;;  %v152_v5 = vld [vmem:[#allocation2] sm:$0xff]  ;;  %3350 = vmatprep.mubr.msk.f32.mxu0 %vm163_vm0, %v148_v3  ;;  %v151_v8 = vld [vmem:[%s4889_s0 + $0x18] sm:$0xff] }
  0x68   :  { %v3965_v6 = vpack.c.bf16 %v149_v4, %v148_v3  ;;  %3344 = vmatprep.subr.mxu0 %v154_v1  ;;  %v3973_v9 = vpack.c.bf16 %v151_v8, %v150_v7  ;;  %v3125_v11 = vld [vmem:[#allocation6] ss:$0 sm:$0xff]  ;;  %v352_v43 = vld [vmem:[#allocation2 + $0x38] sm:$0xff]  ;;  %v350_v45 = vld [vmem:[#allocation2 + $0x28] sm:$0xff] }
  0x69   :  { %3345 = vmatpush3.msra.mxu0 %v154_v1  ;;  %v351_v44 = vld [vmem:[#allocation2 + $0x30] sm:$0xff]  ;;  %3356 = vmatprep.subr.mxu1 %v352_v43  ;;  %v349_v46 = vld [vmem:[#allocation2 + $0x20] sm:$0xff] }
  0x6a   :  { %3346 = vmatprep.subr.mxu0 %v153_v2  ;;  %3357 = vmatpush3.msra.mxu1 %v352_v43  ;;  %v3130_v60 = vld [vmem:[%s4893_s4] ss:$0 sm:$0xff] }
  0x6b   :  { %3347 = vmatpush3.msra.mxu0 %v153_v2  ;;  %3358 = vmatprep.subr.mxu1 %v351_v44  ;;  %v3131_v62 = vld [vmem:[%s4894_s5] ss:$0 sm:$0xff] }
  0x6c   :  { %3348 = vmatprep.subr.mxu0 %v152_v5  ;;  %3359 = vmatpush3.msra.mxu1 %v351_v44 }
  0x6d   :  { %3349 = vmatpush3.msra.mxu0 %v152_v5  ;;  %3360 = vmatprep.subr.mxu1 %v350_v45 }
  0x6e   :  { %3351 = vmatmul.mubr.msk.f32.vlgmr.msra.gmra.mxu0 %vm163_vm0, %v149_v4  ;;  %3361 = vmatpush3.msra.mxu1 %v350_v45 }
  0x6f   :  { %3353 = vmatprep.mubr.msk.f32.mxu0 %vm163_vm0, %v150_v7  ;;  %3362 = vmatprep.subr.mxu1 %v349_v46 }
  0x70   :  { %3363 = vmatpush3.msra.mxu1 %v349_v46 }
  0x72   :  { %3354 = vmatmul.mubr.msk.f32.gmra.mxu0 %vm163_vm0, %v151_v8 }
 0x12e   :  { %v3352_v10 = vpop.f32.mrf.mxu0 }
 0x12f   :  { %v248_v15 = vadd.f32 %v3352_v10, %v3125_v11 }
 0x130   :  { %v242_v12 = vpop.f32.mrf.mxu0 }
 0x131   :  { %v243_v13 = vadd.f32 %v3125_v11, %v242_v12  ;;  %v266_v21 = vsel %vm163_vm0, %v248_v15, 0.0 }
 0x132   :  { %v3355_v14 = vpop.f32.mrf.mxu0 }
 0x133   :  { %v263_v16 = vsel %vm163_vm0, %v243_v13, 0.0  ;;  %v258_v19 = vadd.f32 %v3355_v14, %v3125_v11 }
 0x134   :  { %v252_v17 = vpop.f32.mrf.mxu0  ;;  %264 = vadd.xlane.f32.xlu0 %v263_v16 }
 0x135   :  { %v253_v18 = vadd.f32 %v3125_v11, %v252_v17  ;;  %v272_v22 = vsel %vm163_vm0, %v258_v19, 0.0 }
 0x137   :  { %v269_v20 = vsel %vm163_vm0, %v253_v18, 0.0 }
 0x138   :  { %270 = vadd.xlane.f32.xlu1 %v269_v20  ;;  %267 = vadd.xlane.f32.xlu0 %v266_v21 }
 0x13c   :  { %273 = vadd.xlane.f32.xlu1 %v272_v22 }
 0x1bd   :  { %v265_v23 = vpop.xlane.xlu0 %264 }
 0x1be   :  { %v276_v24 = vmul.f32 0.03125, %v265_v23  ;;  %v3132_v23 = vld [vmem:[#allocation6 + $0x1] ss:$0 sm:$0xff] }
 0x1c0   :  { %v280_v25 = vsub.f32 %v243_v13, %v276_v24 }
 0x1c1   :  { %v271_v26 = vpop.xlane.xlu1 %270  ;;  %v268_v27 = vpop.xlane.xlu0 %267 }
 0x1c2   :  { %v278_v28 = vmul.f32 0.03125, %v271_v26  ;;  %v277_v29 = vmul.f32 0.03125, %v268_v27  ;;  %v284_v30 = vmul.f32 %v280_v25, %v280_v25 }
 0x1c4   :  { %v282_v31 = vsub.f32 %v253_v18, %v278_v28  ;;  %v281_v32 = vsub.f32 %v248_v15, %v277_v29  ;;  %v288_v33 = vsel %vm163_vm0, %v284_v30, 0.0 }
 0x1c5   :  { %v274_v34 = vpop.xlane.xlu1 %273  ;;  %289 = vadd.xlane.f32.xlu0 %v288_v33 }
 0x1c6   :  { %v279_v35 = vmul.f32 0.03125, %v274_v34  ;;  %v286_v36 = vmul.f32 %v282_v31, %v282_v31  ;;  %v285_v37 = vmul.f32 %v281_v32, %v281_v32 }
 0x1c8   :  { %v283_v38 = vsub.f32 %v258_v19, %v279_v35  ;;  %v294_v39 = vsel %vm163_vm0, %v286_v36, 0.0  ;;  %v291_v40 = vsel %vm163_vm0, %v285_v37, 0.0 }
 0x1c9   :  { %295 = vadd.xlane.f32.xlu0 %v294_v39  ;;  %292 = vadd.xlane.f32.xlu1 %v291_v40 }
 0x1ca   :  { %v287_v41 = vmul.f32 %v283_v38, %v283_v38 }
 0x1cc   :  { %v297_v42 = vsel %vm163_vm0, %v287_v41, 0.0 }
 0x1cd   :  { %298 = vadd.xlane.f32.xlu1 %v297_v42 }
 0x24e   :  { %v290_v47 = vpop.xlane.xlu0 %289 }
 0x24f   :  { %v300_v48 = vmul.f32 0.03125, %v290_v47 }
 0x251   :  { %v304_v49 = vadd.f32 1e-05, %v300_v48 }
 0x252   :  { %v293_v50 = vpop.xlane.xlu1 %292  ;;  %v296_v51 = vpop.xlane.xlu0 %295 }
 0x253   :  { %3544 = vrsqrt.f32 %v304_v49  ;;  %v301_v52 = vmul.f32 0.03125, %v293_v50  ;;  %v302_v53 = vmul.f32 0.03125, %v296_v51 }
 0x255   :  { %v305_v54 = vadd.f32 1e-05, %v301_v52  ;;  %v306_v55 = vadd.f32 1e-05, %v302_v53 }
 0x256   :  { %v299_v56 = vpop.xlane.xlu1 %298 }
 0x257   :  { %3546 = vrsqrt.f32 %v305_v54  ;;  %v303_v57 = vmul.f32 0.03125, %v299_v56  ;;  %v550_v56 = vld [vmem:[#allocation2 + $0x58] sm:$0xff] }
 0x258   :  { %3548 = vrsqrt.f32 %v306_v55  ;;  %3370 = vmatprep.subr.mxu0 %v550_v56 }
 0x259   :  { %v307_v58 = vadd.f32 1e-05, %v303_v57  ;;  %v549_v57 = vld [vmem:[#allocation2 + $0x50] sm:$0xff]  ;;  %3371 = vmatpush3.msra.mxu0 %v550_v56 }
 0x25a   :  { %3372 = vmatprep.subr.mxu0 %v549_v57 }
 0x25b   :  { %3550 = vrsqrt.f32 %v307_v58  ;;  %v548_v58 = vld [vmem:[#allocation2 + $0x48] sm:$0xff]  ;;  %3373 = vmatpush3.msra.mxu0 %v549_v57 }
 0x25c   :  { %3374 = vmatprep.subr.mxu0 %v548_v58 }
 0x25d   :  { %3375 = vmatpush3.msra.mxu0 %v548_v58 }
 0x260   :  { %v3545_v59 = vpop.eup %3544 }
 0x261   :  { %v312_v61 = vmul.f32 %v3545_v59, %v280_v25  ;;  %v547_v59 = vld [vmem:[#allocation2 + $0x40] sm:$0xff] }
 0x262   :  { %3376 = vmatprep.subr.mxu0 %v547_v59 }
 0x263   :  { %v322_v63 = vmul.f32 %v3130_v60, %v312_v61  ;;  %3377 = vmatpush3.msra.mxu0 %v547_v59 }
 0x264   :  { %v3547_v0 = vpop.eup %3546 }
 0x265   :  { %v3549_v1 = vpop.eup %3548  ;;  %v332_v2 = vadd.f32 %v3131_v62, %v322_v63  ;;  %v313_v3 = vmul.f32 %v3547_v0, %v281_v32 }
 0x266   :  { %v314_v4 = vmul.f32 %v3549_v1, %v282_v31 }
 0x267   :  { %vm336_vm1 = vcmp.gt.f32.partialorder %v332_v2, 0.0  ;;  %v340_v5 = vmul.f32 0.2, %v332_v2  ;;  %v323_v7 = vmul.f32 %v3130_v60, %v313_v3 }
 0x268   :  { %v3551_v8 = vpop.eup %3550  ;;  %v324_v10 = vmul.f32 %v3130_v60, %v314_v4 }
 0x269   :  { %v344_v11 = vsel %vm336_vm1, %v332_v2, %v340_v5  ;;  %v333_v12 = vadd.f32 %v3131_v62, %v323_v7  ;;  %v315_v13 = vmul.f32 %v3551_v8, %v283_v38 }
 0x26a   :  { %3364 = vmatprep.mubr.msk.f32.mxu1 %vm163_vm0, %v344_v11  ;;  %v334_v14 = vadd.f32 %v3131_v62, %v324_v10 }
 0x26b   :  { %vm337_vm2 = vcmp.gt.f32.partialorder %v333_v12, 0.0  ;;  %v341_v15 = vmul.f32 0.2, %v333_v12  ;;  %v325_v16 = vmul.f32 %v3130_v60, %v315_v13  ;;  %v3522_v60 = vld [vmem:[#allocation4 + $0x8] sm:$0xff]  }
 0x26c   :  { %vm338_vm3 = vcmp.gt.f32.partialorder %v334_v14, 0.0  ;;  %v342_v17 = vmul.f32 0.2, %v334_v14  ;;  %3398 = vmatprep.subr.bf16.mxu0 %v3522_v60 }
 0x26d   :  { %v345_v18 = vsel %vm337_vm2, %v333_v12, %v341_v15  ;;  %v335_v19 = vadd.f32 %v3131_v62, %v325_v16  ;;  %v3139_v12 = vld [vmem:[%s4893_s4 + $0x1] ss:$0 sm:$0xff] }
 0x26e   :  { %3365 = vmatmul.mubr.msk.f32.vlgmr.msra.gmra.mxu1 %vm163_vm0, %v345_v18  ;;  %v346_v20 = vsel %vm338_vm3, %v334_v14, %v342_v17  ;;  %v3140_v15 = vld [vmem:[%s4894_s5 + $0x1] ss:$0 sm:$0xff] }
 0x26f   :  { %3367 = vmatprep.mubr.msk.f32.mxu1 %vm163_vm0, %v346_v20  ;;  %vm339_vm4 = vcmp.gt.f32.partialorder %v335_v19, 0.0  ;;  %v343_v21 = vmul.f32 0.2, %v335_v19 }
 0x271   :  { %v347_v22 = vsel %vm339_vm4, %v335_v19, %v343_v21 }
 0x272   :  { %3368 = vmatmul.mubr.msk.f32.gmra.mxu1 %vm163_vm0, %v347_v22 }
 0x32e   :  { %v3366_v24 = vpop.f32.mrf.mxu1 }
 0x32f   :  { %v445_v25 = vadd.f32 %v3366_v24, %v3132_v23 }
 0x330   :  { %v439_v26 = vpop.f32.mrf.mxu1 }
 0x331   :  { %v440_v27 = vadd.f32 %v3132_v23, %v439_v26  ;;  %v465_v28 = vsel %vm163_vm0, %v445_v25, 0.0 }
 0x332   :  { %466 = vadd.xlane.f32.xlu1 %v465_v28  ;;  %v3369_v29 = vpop.f32.mrf.mxu1 }
 0x333   :  { %v455_v30 = vadd.f32 %v3369_v29, %v3132_v23  ;;  %v462_v31 = vsel %vm163_vm0, %v440_v27, 0.0 }
 0x334   :  { %463 = vadd.xlane.f32.xlu0 %v462_v31  ;;  %v449_v32 = vpop.f32.mrf.mxu1 }
 0x335   :  { %v450_v33 = vadd.f32 %v3132_v23, %v449_v32  ;;  %v471_v34 = vsel %vm163_vm0, %v455_v30, 0.0  ;;  %v3523_v32 = vld [vmem:[#allocation4] sm:$0xff]  }
 0x336   :  { %472 = vadd.xlane.f32.xlu1 %v471_v34 }
 0x337   :  { %v468_v35 = vsel %vm163_vm0, %v450_v33, 0.0 }
 0x338   :  { %469 = vadd.xlane.f32.xlu0 %v468_v35 }
 0x3bb   :  { %v467_v36 = vpop.xlane.xlu1 %466 }
 0x3bc   :  { %v475_v37 = vmul.f32 0.03125, %v467_v36 }
 0x3bd   :  { %v464_v38 = vpop.xlane.xlu0 %463 }
 0x3be   :  { %v479_v39 = vsub.f32 %v445_v25, %v475_v37  ;;  %v474_v40 = vmul.f32 0.03125, %v464_v38  ;;  %v3141_v38 = vld [vmem:[#allocation6 + $0x2] ss:$0 sm:$0xff] }
 0x3bf   :  { %v473_v41 = vpop.xlane.xlu1 %472 }
 0x3c0   :  { %v478_v42 = vsub.f32 %v440_v27, %v474_v40  ;;  %v477_v43 = vmul.f32 0.03125, %v473_v41  ;;  %v483_v44 = vmul.f32 %v479_v39, %v479_v39 }
 0x3c1   :  { %v470_v45 = vpop.xlane.xlu0 %469 }
 0x3c2   :  { %v481_v46 = vsub.f32 %v455_v30, %v477_v43  ;;  %v476_v47 = vmul.f32 0.03125, %v470_v45  ;;  %v489_v48 = vsel %vm163_vm0, %v483_v44, 0.0  ;;  %v482_v49 = vmul.f32 %v478_v42, %v478_v42 }
 0x3c3   :  { %490 = vadd.xlane.f32.xlu1 %v489_v48 }
 0x3c4   :  { %v480_v50 = vsub.f32 %v450_v33, %v476_v47  ;;  %v486_v51 = vsel %vm163_vm0, %v482_v49, 0.0  ;;  %v485_v52 = vmul.f32 %v481_v46, %v481_v46 }
 0x3c5   :  { %487 = vadd.xlane.f32.xlu0 %v486_v51 }
 0x3c6   :  { %v495_v53 = vsel %vm163_vm0, %v485_v52, 0.0  ;;  %v484_v54 = vmul.f32 %v480_v50, %v480_v50  ;;  %v3155_v52 = vld [vmem:[#allocation6 + $0x3] ss:$0 sm:$0xff] }
 0x3c7   :  { %496 = vadd.xlane.f32.xlu1 %v495_v53 }
 0x3c8   :  { %v492_v55 = vsel %vm163_vm0, %v484_v54, 0.0 }
 0x3c9   :  { %493 = vadd.xlane.f32.xlu0 %v492_v55 }
 0x44c   :  { %v491_v61 = vpop.xlane.xlu1 %490 }
 0x44d   :  { %v499_v62 = vmul.f32 0.03125, %v491_v61 }
 0x44e   :  { %v488_v63 = vpop.xlane.xlu0 %487 }
 0x44f   :  { %v503_v0 = vadd.f32 1e-05, %v499_v62  ;;  %v498_v1 = vmul.f32 0.03125, %v488_v63 }
 0x450   :  { %v497_v2 = vpop.xlane.xlu1 %496 }
 0x451   :  { %3552 = vrsqrt.f32 %v503_v0  ;;  %v502_v3 = vadd.f32 1e-05, %v498_v1  ;;  %v501_v4 = vmul.f32 0.03125, %v497_v2 }
 0x452   :  { %v494_v5 = vpop.xlane.xlu0 %493 }
 0x453   :  { %3554 = vrsqrt.f32 %v502_v3  ;;  %v505_v7 = vadd.f32 1e-05, %v501_v4  ;;  %v500_v8 = vmul.f32 0.03125, %v494_v5 }
 0x455   :  { %3556 = vrsqrt.f32 %v505_v7  ;;  %v504_v10 = vadd.f32 1e-05, %v500_v8 }
 0x457   :  { %3558 = vrsqrt.f32 %v504_v10 }
 0x45e   :  { %v3553_v11 = vpop.eup %3552 }
 0x45f   :  { %v511_v13 = vmul.f32 %v3553_v11, %v479_v39 }
 0x460   :  { %v3555_v14 = vpop.eup %3554 }
 0x461   :  { %v510_v16 = vmul.f32 %v3555_v14, %v478_v42  ;;  %v521_v17 = vmul.f32 %v3139_v12, %v511_v13 }
 0x462   :  { %v3557_v18 = vpop.eup %3556 }
 0x463   :  { %v520_v19 = vmul.f32 %v3139_v12, %v510_v16  ;;  %v531_v20 = vadd.f32 %v3140_v15, %v521_v17  ;;  %v513_v21 = vmul.f32 %v3557_v18, %v481_v46 }
 0x464   :  { %v3559_v22 = vpop.eup %3558 }
 0x465   :  { %v530_v23 = vadd.f32 %v3140_v15, %v520_v19  ;;  %v512_v24 = vmul.f32 %v3559_v22, %v480_v50  ;;  %v539_v25 = vmul.f32 0.2, %v531_v20  ;;  %v523_v26 = vmul.f32 %v3139_v12, %v513_v21 }
 0x466   :  { %vm535_vm6 = vcmp.gt.f32.partialorder %v531_v20, 0.0 }
 0x467   :  { %vm534_vm5 = vcmp.gt.f32.partialorder %v530_v23, 0.0  ;;  %v538_v27 = vmul.f32 0.2, %v530_v23  ;;  %v522_v28 = vmul.f32 %v3139_v12, %v512_v24  ;;  %v533_v29 = vadd.f32 %v3140_v15, %v523_v26 }
 0x468   :  { %v543_v33 = vsel %vm535_vm6, %v531_v20, %v539_v25 }
 0x469   :  { %v542_v30 = vsel %vm534_vm5, %v530_v23, %v538_v27  ;;  %v532_v31 = vadd.f32 %v3140_v15, %v522_v28  ;;  %v541_v34 = vmul.f32 0.2, %v533_v29  ;;  %vm537_vm8 = vcmp.gt.f32.partialorder %v533_v29, 0.0 }
 0x46a   :  { %3378 = vmatprep.mubr.msk.f32.mxu0 %vm163_vm0, %v542_v30 }
 0x46b   :  { %3379 = vmatmul.mubr.msk.f32.vlgmr.msra.gmra.mxu0 %vm163_vm0, %v543_v33  ;;  %vm536_vm7 = vcmp.gt.f32.partialorder %v532_v31, 0.0  ;;  %v540_v35 = vmul.f32 0.2, %v532_v31  ;;  %v545_v37 = vsel %vm537_vm8, %v533_v29, %v541_v34 }
 0x46c   :  { %3399 = vmatpush3.bf16.msra.mxu0 %v3522_v60 }
 0x46d   :  { %v544_v36 = vsel %vm536_vm7, %v532_v31, %v540_v35  ;;  %3400 = vmatprep.subr.bf16.mxu0 %v3523_v32 }
 0x46e   :  { %3381 = vmatprep.mubr.msk.f32.mxu0 %vm163_vm0, %v544_v36 }
 0x46f   :  { %3382 = vmatmul.mubr.msk.f32.gmra.mxu0 %vm163_vm0, %v545_v37 }
 0x470   :  { %3401 = vmatpush3.bf16.msra.mxu0 %v3523_v32  ;;  %3402 = vmatprep.mubr.msk.bf16.mxu0 %vm163_vm0, %v3965_v6 }
 0x473   :  { %3403 = vmatmul.mubr.msk.bf16.vlgmr.msra.gmra.mxu0 %vm163_vm0, %v3973_v9 }
 0x52b   :  { %v3380_v39 = vpop.f32.mrf.mxu0 }
 0x52c   :  { %v643_v40 = vadd.f32 %v3380_v39, %v3141_v38 }
 0x52d   :  { %v637_v41 = vpop.f32.mrf.mxu0 }
 0x52e   :  { %v638_v42 = vadd.f32 %v3141_v38, %v637_v41  ;;  %v663_v43 = vsel %vm163_vm0, %v643_v40, 0.0 }
 0x52f   :  { %664 = vadd.xlane.f32.xlu1 %v663_v43  ;;  %v3383_v44 = vpop.f32.mrf.mxu0  ;;  %v746_v43 = vld [vmem:[#allocation7 + $0x10] sm:$0xff] }
 0x530   :  { %v653_v45 = vadd.f32 %v3383_v44, %v3141_v38  ;;  %v660_v46 = vsel %vm163_vm0, %v638_v42, 0.0  ;;  %v745_v44 = vld [vmem:[#allocation7 + $0x8] sm:$0xff] }
 0x531   :  { %661 = vadd.xlane.f32.xlu0 %v660_v46  ;;  %v647_v47 = vpop.f32.mrf.mxu0  ;;  %v4066_v46 = vld [vmem:[#allocation4 + $0x18] sm:$0xff]  }
 0x532   :  { %v648_v48 = vadd.f32 %v3141_v38, %v647_v47  ;;  %v669_v49 = vsel %vm163_vm0, %v653_v45, 0.0 }
 0x533   :  { %670 = vadd.xlane.f32.xlu1 %v669_v49  ;;  %v3404_v50 = vpop.f32.mrf.mxu0 }
 0x534   :  { %v666_v51 = vsel %vm163_vm0, %v648_v48, 0.0  ;;  %v1014_v56 = vadd.f32 %v3404_v50, %v3155_v52 }
 0x535   :  { %v1005_v53 = vpop.f32.mrf.mxu0  ;;  %667 = vadd.xlane.f32.xlu0 %v666_v51 }
 0x536   :  { %v1006_v54 = vadd.f32 %v3155_v52, %v1005_v53  ;;  %v1030_v62 = vsel %vm163_vm0, %v1014_v56, 0.0 }
 0x537   :  { %v3405_v55 = vpop.f32.mrf.mxu0 }
 0x538   :  { %v1024_v57 = vsel %vm163_vm0, %v1006_v54, 0.0  ;;  %v1017_v60 = vadd.f32 %v3405_v55, %v3155_v52 }
 0x539   :  { %v1008_v58 = vpop.f32.mrf.mxu0  ;;  %1025 = vadd.xlane.f32.xlu0 %v1024_v57 }
 0x53a   :  { %v1009_v59 = vadd.f32 %v3155_v52, %v1008_v58  ;;  %v1033_v63 = vsel %vm163_vm0, %v1017_v60, 0.0 }
 0x53c   :  { %v1027_v61 = vsel %vm163_vm0, %v1009_v59, 0.0 }
 0x53d   :  { %1028 = vadd.xlane.f32.xlu1 %v1027_v61  ;;  %1031 = vadd.xlane.f32.xlu0 %v1030_v62 }
 0x541   :  { %1034 = vadd.xlane.f32.xlu1 %v1033_v63 }
 0x5b8   :  { %v665_v0 = vpop.xlane.xlu1 %664 }
 0x5b9   :  { %v673_v1 = vmul.f32 0.03125, %v665_v0 }
 0x5ba   :  { %v662_v2 = vpop.xlane.xlu0 %661 }
 0x5bb   :  { %v4026_v3 = vsub.f32 %v643_v40, %v673_v1  ;;  %v672_v4 = vmul.f32 0.03125, %v662_v2 }
 0x5bc   :  { %v671_v5 = vpop.xlane.xlu1 %670 }
 0x5bd   :  { %v4028_v7 = vsub.f32 %v638_v42, %v672_v4  ;;  %v675_v8 = vmul.f32 0.03125, %v671_v5  ;;  %v681_v10 = vmul.f32 %v4026_v3, %v4026_v3  ;;  %v747_v42 = vld [vmem:[#allocation7 + $0x18] sm:$0xff] }
 0x5be   :  { %v668_v11 = vpop.xlane.xlu0 %667  ;;  %3384 = vmatprep.subr.mxu1 %v747_v42 }
 0x5bf   :  { %v4032_v12 = vsub.f32 %v653_v45, %v675_v8  ;;  %v674_v13 = vmul.f32 0.03125, %v668_v11  ;;  %v687_v14 = vsel %vm163_vm0, %v681_v10, 0.0  ;;  %v680_v15 = vmul.f32 %v4028_v7, %v4028_v7  ;;  %3385 = vmatpush3.msra.mxu1 %v747_v42  ;;  %v744_v45 = vld [vmem:[#allocation7] sm:$0xff] }
 0x5c0   :  { %688 = vadd.xlane.f32.xlu1 %v687_v14  ;;  %3386 = vmatprep.subr.mxu1 %v746_v43  ;;  %v3148_v10 = vld [vmem:[%s4893_s4 + $0x2] ss:$0 sm:$0xff] }
 0x5c1   :  { %v4037_v16 = vsub.f32 %v648_v48, %v674_v13  ;;  %v684_v17 = vsel %vm163_vm0, %v680_v15, 0.0  ;;  %v683_v18 = vmul.f32 %v4032_v12, %v4032_v12  ;;  %3387 = vmatpush3.msra.mxu1 %v746_v43  ;;  %v3149_v15 = vld [vmem:[%s4894_s5 + $0x2] ss:$0 sm:$0xff] }
 0x5c2   :  { %685 = vadd.xlane.f32.xlu0 %v684_v17  ;;  %v1026_v19 = vpop.xlane.xlu0 %1025  ;;  %3388 = vmatprep.subr.mxu1 %v745_v44 }
 0x5c3   :  { %v1036_v20 = vmul.f32 0.03125, %v1026_v19  ;;  %v693_v21 = vsel %vm163_vm0, %v683_v18, 0.0  ;;  %v682_v22 = vmul.f32 %v4037_v16, %v4037_v16  ;;  %3389 = vmatpush3.msra.mxu1 %v745_v44 }
 0x5c4   :  { %694 = vadd.xlane.f32.xlu1 %v693_v21  ;;  %3390 = vmatprep.subr.mxu1 %v744_v45 }
 0x5c5   :  { %v4045_v23 = vsub.f32 %v1006_v54, %v1036_v20  ;;  %v690_v24 = vsel %vm163_vm0, %v682_v22, 0.0  ;;  %3391 = vmatpush3.msra.mxu1 %v744_v45 }
 0x5c6   :  { %v1029_v25 = vpop.xlane.xlu1 %1028  ;;  %691 = vadd.xlane.f32.xlu0 %v690_v24  ;;  %v1032_v26 = vpop.xlane.xlu0 %1031  ;;  %3406 = vmatprep.subr.bf16.mxu1 %v4066_v46 }
 0x5c7   :  { %v1037_v27 = vmul.f32 0.03125, %v1029_v25  ;;  %v1038_v28 = vmul.f32 0.03125, %v1032_v26  ;;  %v1044_v29 = vmul.f32 %v4045_v23, %v4045_v23 }
 0x5c9   :  { %v4050_v30 = vsub.f32 %v1009_v59, %v1037_v27  ;;  %v4052_v31 = vsub.f32 %v1014_v56, %v1038_v28  ;;  %v1048_v32 = vsel %vm163_vm0, %v1044_v29, 0.0 }
 0x5ca   :  { %v1035_v33 = vpop.xlane.xlu1 %1034  ;;  %1049 = vadd.xlane.f32.xlu0 %v1048_v32 }
 0x5cb   :  { %v1039_v34 = vmul.f32 0.03125, %v1035_v33  ;;  %v1045_v35 = vmul.f32 %v4050_v30, %v4050_v30  ;;  %v1046_v36 = vmul.f32 %v4052_v31, %v4052_v31 }
 0x5cd   :  { %v4059_v37 = vsub.f32 %v1017_v60, %v1039_v34  ;;  %v1051_v38 = vsel %vm163_vm0, %v1045_v35, 0.0  ;;  %v1054_v39 = vsel %vm163_vm0, %v1046_v36, 0.0 }
 0x5ce   :  { %1052 = vadd.xlane.f32.xlu1 %v1051_v38  ;;  %1055 = vadd.xlane.f32.xlu0 %v1054_v39  ;;  %v3525_v38 = vld [vmem:[#allocation4 + $0x10] sm:$0xff]  }
 0x5cf   :  { %v1047_v40 = vmul.f32 %v4059_v37, %v4059_v37 }
 0x5d1   :  { %v1057_v41 = vsel %vm163_vm0, %v1047_v40, 0.0  ;;  %v3163_v40 = vld [vmem:[%s4894_s5 + $0x3] ss:$0 sm:$0xff] }
 0x5d2   :  { %1058 = vadd.xlane.f32.xlu1 %v1057_v41 }
 0x649   :  { %v689_v47 = vpop.xlane.xlu1 %688 }
 0x64a   :  { %v697_v48 = vmul.f32 0.03125, %v689_v47 }
 0x64b   :  { %v686_v49 = vpop.xlane.xlu0 %685 }
 0x64c   :  { %v701_v50 = vadd.f32 1e-05, %v697_v48  ;;  %v696_v51 = vmul.f32 0.03125, %v686_v49  ;;  %v3526_v48 = vld [vmem:[#allocation4 + $0x38] sm:$0xff]  }
 0x64d   :  { %v695_v52 = vpop.xlane.xlu1 %694 }
 0x64e   :  { %3560 = vrsqrt.f32 %v701_v50  ;;  %v700_v53 = vadd.f32 1e-05, %v696_v51  ;;  %v699_v54 = vmul.f32 0.03125, %v695_v52 }
 0x64f   :  { %v692_v55 = vpop.xlane.xlu0 %691 }
 0x650   :  { %3562 = vrsqrt.f32 %v700_v53  ;;  %v703_v56 = vadd.f32 1e-05, %v699_v54  ;;  %v698_v57 = vmul.f32 0.03125, %v692_v55 }
 0x652   :  { %3564 = vrsqrt.f32 %v703_v56  ;;  %v702_v58 = vadd.f32 1e-05, %v698_v57 }
 0x653   :  { %v1050_v59 = vpop.xlane.xlu0 %1049 }
 0x654   :  { %3566 = vrsqrt.f32 %v702_v58  ;;  %v1060_v60 = vmul.f32 0.03125, %v1050_v59 }
 0x656   :  { %v1064_v61 = vadd.f32 1e-05, %v1060_v60 }
 0x657   :  { %v1053_v62 = vpop.xlane.xlu1 %1052  ;;  %v1056_v63 = vpop.xlane.xlu0 %1055 }
 0x658   :  { %3568 = vrsqrt.f32 %v1064_v61  ;;  %v1061_v0 = vmul.f32 0.03125, %v1053_v62  ;;  %v1062_v1 = vmul.f32 0.03125, %v1056_v63 }
 0x65a   :  { %v1065_v2 = vadd.f32 1e-05, %v1061_v0  ;;  %v1066_v4 = vadd.f32 1e-05, %v1062_v1  ;;  %v3527_v1 = vld [vmem:[#allocation4 + $0x30] sm:$0xff]  }
 0x65b   :  { %v3561_v5 = vpop.eup %3560  ;;  %v1059_v8 = vpop.xlane.xlu1 %1058 }
 0x65c   :  { %v709_v11 = vmul.f32 %v3561_v5, %v4026_v3  ;;  %3570 = vrsqrt.f32 %v1065_v2  ;;  %v1063_v13 = vmul.f32 0.03125, %v1059_v8 }
 0x65d   :  { %v3563_v14 = vpop.eup %3562  ;;  %3572 = vrsqrt.f32 %v1066_v4 }
 0x65e   :  { %v1067_v17 = vadd.f32 1e-05, %v1063_v13  ;;  %v708_v18 = vmul.f32 %v3563_v14, %v4028_v7  ;;  %v719_v19 = vmul.f32 %v3148_v10, %v709_v11  ;;  %v3162_v7 = vld [vmem:[%s4893_s4 + $0x3] ss:$0 sm:$0xff]  ;;  %v3164_v11 = vld [vmem:[#allocation6 + $0x4] ss:$0 sm:$0xff] }
 0x65f   :  { %v3565_v20 = vpop.eup %3564 }
 0x660   :  { %3574 = vrsqrt.f32 %v1067_v17  ;;  %v718_v21 = vmul.f32 %v3148_v10, %v708_v18  ;;  %v729_v22 = vadd.f32 %v3149_v15, %v719_v19  ;;  %v711_v24 = vmul.f32 %v3565_v20, %v4032_v12 }
 0x661   :  { %v3567_v25 = vpop.eup %3566 }
 0x662   :  { %v728_v3 = vadd.f32 %v3149_v15, %v718_v21  ;;  %v710_v26 = vmul.f32 %v3567_v25, %v4037_v16  ;;  %v737_v27 = vmul.f32 0.2, %v729_v22  ;;  %v721_v28 = vmul.f32 %v3148_v10, %v711_v24 }
 0x663   :  { %vm733_vm10 = vcmp.gt.f32.partialorder %v729_v22, 0.0 }
 0x664   :  { %vm732_vm9 = vcmp.gt.f32.partialorder %v728_v3, 0.0  ;;  %v736_v29 = vmul.f32 0.2, %v728_v3  ;;  %v720_v32 = vmul.f32 %v3148_v10, %v710_v26  ;;  %v731_v34 = vadd.f32 %v3149_v15, %v721_v28 }
 0x665   :  { %v3569_v33 = vpop.eup %3568  ;;  %v741_v16 = vsel %vm733_vm10, %v729_v22, %v737_v27 }
 0x666   :  { %v1072_v35 = vmul.f32 %v3569_v33, %v4045_v23  ;;  %v740_v36 = vsel %vm732_vm9, %v728_v3, %v736_v29  ;;  %v730_v12 = vadd.f32 %v3149_v15, %v720_v32  ;;  %v739_v39 = vmul.f32 0.2, %v731_v34  ;;  %v3184_v3 = vld [vmem:[#allocation6 + $0x6] ss:$0 sm:$0xff] }
 0x667   :  { %3392 = vmatprep.mubr.msk.f32.mxu1 %vm163_vm0, %v740_v36  ;;  %vm735_vm12 = vcmp.gt.f32.partialorder %v731_v34, 0.0 }
 0x668   :  { %3393 = vmatmul.mubr.msk.f32.vlgmr.msra.gmra.mxu1 %vm163_vm0, %v741_v16  ;;  %vm734_vm11 = vcmp.gt.f32.partialorder %v730_v12, 0.0  ;;  %v738_v41 = vmul.f32 0.2, %v730_v12  ;;  %v1082_v42 = vmul.f32 %v3162_v7, %v1072_v35  ;;  %v743_v50 = vsel %vm735_vm12, %v731_v34, %v739_v39 }
 0x669   :  { %v3571_v43 = vpop.eup %3570  ;;  %3407 = vmatpush3.bf16.msra.mxu1 %v4066_v46 }
 0x66a   :  { %v3573_v23 = vpop.eup %3572  ;;  %v1073_v44 = vmul.f32 %v3571_v43, %v4050_v30  ;;  %v742_v45 = vsel %vm734_vm11, %v730_v12, %v738_v41  ;;  %3408 = vmatprep.subr.bf16.mxu1 %v3525_v38  ;;  %v1092_v47 = vadd.f32 %v3163_v40, %v1082_v42 }
 0x66b   :  { %v1074_v49 = vmul.f32 %v3573_v23, %v4052_v31  ;;  %3395 = vmatprep.mubr.msk.f32.mxu1 %vm163_vm0, %v742_v45 }
 0x66c   :  { %3396 = vmatmul.mubr.msk.f32.gmra.mxu1 %vm163_vm0, %v743_v50  ;;  %v1083_v51 = vmul.f32 %v3162_v7, %v1073_v44  ;;  %v1100_v55 = vmul.f32 0.2, %v1092_v47  ;;  %vm1096_vm13 = vcmp.gt.f32.partialorder %v1092_v47, 0.0 }
 0x66d   :  { %v3575_v52 = vpop.eup %3574  ;;  %v1084_v53 = vmul.f32 %v3162_v7, %v1074_v49  ;;  %3409 = vmatpush3.bf16.msra.mxu1 %v3525_v38 }
 0x66e   :  { %v1075_v46 = vmul.f32 %v3575_v52, %v4059_v37  ;;  %v1093_v54 = vadd.f32 %v3163_v40, %v1083_v51  ;;  %3422 = vmatprep.subr.bf16.mxu1 %v3526_v48  ;;  %v1104_v58 = vsel %vm1096_vm13, %v1092_v47, %v1100_v55 }
 0x66f   :  { %v1094_v30 = vadd.f32 %v3163_v40, %v1084_v53 }
 0x670   :  { %v1085_v56 = vmul.f32 %v3162_v7, %v1075_v46  ;;  %vm1097_vm14 = vcmp.gt.f32.partialorder %v1093_v54, 0.0  ;;  %v1101_v57 = vmul.f32 0.2, %v1093_v54 }
 0x671   :  { %v1102_v60 = vmul.f32 0.2, %v1094_v30  ;;  %vm1098_vm15 = vcmp.gt.f32.partialorder %v1094_v30, 0.0 }
 0x672   :  { %v1095_v31 = vadd.f32 %v3163_v40, %v1085_v56  ;;  %v1105_v59 = vsel %vm1097_vm14, %v1093_v54, %v1101_v57 }
 0x673   :  { %v1108_v61 = vpack.c.bf16 %v1105_v59, %v1104_v58  ;;  %v1106_v63 = vsel %vm1098_vm15, %v1094_v30, %v1102_v60 }
 0x674   :  { %vm1099_vm1 = vcmp.gt.f32.partialorder %v1095_v31, 0.0  ;;  %v1103_v62 = vmul.f32 0.2, %v1095_v31 }
 0x675   :  { %3410 = vmatprep.mubr.msk.bf16.mxu1 %vm163_vm0, %v1108_v61 }
 0x676   :  { %v1107_v37 = vsel %vm1099_vm1, %v1095_v31, %v1103_v62 }
 0x677   :  { %v1109_v0 = vpack.c.bf16 %v1107_v37, %v1106_v63 }
 0x679   :  { %3411 = vmatmul.mubr.msk.bf16.vlgmr.msra.gmra.mxu1 %vm163_vm0, %v1109_v0 }
 0x67a   :  { %3423 = vmatpush3.bf16.msra.mxu1 %v3526_v48  ;;  %3426 = vmatprep.mubr.msk.bf16.mxu1 %vm163_vm0, %v3965_v6 }
 0x67b   :  { %3424 = vmatprep.subr.bf16.mxu1 %v3527_v1 }
 0x67e   :  { %3425 = vmatpush3.bf16.msra.mxu1 %v3527_v1 }
 0x681   :  { %3427 = vmatmul.mubr.msk.bf16.vlgmr.msra.gmra.mxu1 %vm163_vm0, %v3973_v9 }
 0x728   :  { %v4100_v2 = vpop.f32.mrf.mxu1 }
 0x72a   :  { %v4102_v4 = vpop.f32.mrf.mxu1 }
 0x72c   :  { %v4104_v5 = vpop.f32.mrf.mxu1 }
 0x72e   :  { %v4106_v8 = vpop.f32.mrf.mxu1 }
 0x739   :  { %v3412_v10 = vpop.f32.mrf.mxu1 }
 0x73a   :  { %v1184_v17 = vadd.f32 %v3412_v10, %v3164_v11 }
 0x73b   :  { %v1175_v13 = vpop.f32.mrf.mxu1 }
 0x73c   :  { %v1176_v14 = vadd.f32 %v3164_v11, %v1175_v13  ;;  %v1200_v25 = vsel %vm163_vm0, %v1184_v17, 0.0 }
 0x73d   :  { %v3413_v15 = vpop.f32.mrf.mxu1 }
 0x73e   :  { %v1194_v18 = vsel %vm163_vm0, %v1176_v14, 0.0  ;;  %v1187_v22 = vadd.f32 %v3413_v15, %v3164_v11 }
 0x73f   :  { %v1178_v19 = vpop.f32.mrf.mxu1  ;;  %1195 = vadd.xlane.f32.xlu0 %v1194_v18 }
 0x740   :  { %v1179_v20 = vadd.f32 %v3164_v11, %v1178_v19  ;;  %v1203_v32 = vsel %vm163_vm0, %v1187_v22, 0.0 }
 0x741   :  { %v3428_v21 = vpop.f32.mrf.mxu1 }
 0x742   :  { %v1197_v24 = vsel %vm163_vm0, %v1179_v20, 0.0  ;;  %v1550_v29 = vadd.f32 %v3428_v21, %v3184_v3  ;;  %v3529_v21 = vld [vmem:[#allocation4 + $0x20] sm:$0xff]  }
 0x743   :  { %v1541_v26 = vpop.f32.mrf.mxu1  ;;  %1198 = vadd.xlane.f32.xlu1 %v1197_v24  ;;  %1201 = vadd.xlane.f32.xlu0 %v1200_v25 }
 0x744   :  { %v1542_v27 = vadd.f32 %v3184_v3, %v1541_v26  ;;  %v1566_v12 = vsel %vm163_vm0, %v1550_v29, 0.0 }
 0x745   :  { %v3429_v28 = vpop.f32.mrf.mxu1 }
 0x746   :  { %v1560_v33 = vsel %vm163_vm0, %v1542_v27, 0.0  ;;  %v1553_v35 = vadd.f32 %v3429_v28, %v3184_v3 }
 0x747   :  { %v1544_v7 = vpop.f32.mrf.mxu1  ;;  %1204 = vadd.xlane.f32.xlu1 %v1203_v32  ;;  %1561 = vadd.xlane.f32.xlu0 %v1560_v33 }
 0x748   :  { %v1545_v34 = vadd.f32 %v3184_v3, %v1544_v7  ;;  %v1569_v38 = vsel %vm163_vm0, %v1553_v35, 0.0 }
 0x74a   :  { %v1563_v36 = vsel %vm163_vm0, %v1545_v34, 0.0 }
 0x74b   :  { %1564 = vadd.xlane.f32.xlu1 %v1563_v36  ;;  %1567 = vadd.xlane.f32.xlu0 %v1566_v12 }
 0x74f   :  { %1570 = vadd.xlane.f32.xlu1 %v1569_v38 }
 0x7c8   :  { %v1196_v16 = vpop.xlane.xlu0 %1195 }
 0x7c9   :  { %v1206_v39 = vmul.f32 0.03125, %v1196_v16 }
 0x7cb   :  { %v4116_v40 = vsub.f32 %v1176_v14, %v1206_v39 }
 0x7cc   :  { %v1199_v41 = vpop.xlane.xlu1 %1198  ;;  %v1202_v42 = vpop.xlane.xlu0 %1201 }
 0x7cd   :  { %v1207_v43 = vmul.f32 0.03125, %v1199_v41  ;;  %v1208_v23 = vmul.f32 0.03125, %v1202_v42  ;;  %v1214_v44 = vmul.f32 %v4116_v40, %v4116_v40 }
 0x7cf   :  { %v4120_v45 = vsub.f32 %v1179_v20, %v1207_v43  ;;  %v4122_v47 = vsub.f32 %v1184_v17, %v1208_v23  ;;  %v1218_v48 = vsel %vm163_vm0, %v1214_v44, 0.0  ;;  %v3528_v20 = vld [vmem:[#allocation4 + $0x28] sm:$0xff]  }
 0x7d0   :  { %v1205_v49 = vpop.xlane.xlu1 %1204  ;;  %1219 = vadd.xlane.f32.xlu0 %v1218_v48  ;;  %v1562_v50 = vpop.xlane.xlu0 %1561  ;;  %3414 = vmatprep.subr.bf16.mxu0 %v3528_v20 }
 0x7d1   :  { %v1209_v51 = vmul.f32 0.03125, %v1205_v49  ;;  %v1572_v52 = vmul.f32 0.03125, %v1562_v50  ;;  %v1215_v53 = vmul.f32 %v4120_v45, %v4120_v45  ;;  %v1216_v46 = vmul.f32 %v4122_v47, %v4122_v47  ;;  %3415 = vmatpush3.bf16.msra.mxu0 %v3528_v20  ;;  %v3171_v50 = vld [vmem:[%s4893_s4 + $0x4] ss:$0 sm:$0xff] }
 0x7d2   :  { %3416 = vmatprep.subr.bf16.mxu0 %v3529_v21 }
 0x7d3   :  { %v4129_v54 = vsub.f32 %v1187_v22, %v1209_v51  ;;  %v4131_v55 = vsub.f32 %v1542_v27, %v1572_v52  ;;  %v1221_v30 = vsel %vm163_vm0, %v1215_v53, 0.0  ;;  %v1224_v56 = vsel %vm163_vm0, %v1216_v46, 0.0  ;;  %v4156_v22 = vld [vmem:[#allocation4 + $0x48] sm:$0xff]   ;;  %v3172_v53 = vld [vmem:[%s4894_s5 + $0x4] ss:$0 sm:$0xff] }
 0x7d4   :  { %1222 = vadd.xlane.f32.xlu1 %v1221_v30  ;;  %v1565_v57 = vpop.xlane.xlu1 %1564  ;;  %1225 = vadd.xlane.f32.xlu0 %v1224_v56  ;;  %v1568_v31 = vpop.xlane.xlu0 %1567 }
 0x7d5   :  { %v1573_v58 = vmul.f32 0.03125, %v1565_v57  ;;  %v1574_v59 = vmul.f32 0.03125, %v1568_v31  ;;  %v1217_v60 = vmul.f32 %v4129_v54, %v4129_v54  ;;  %v1580_v61 = vmul.f32 %v4131_v55, %v4131_v55  ;;  %3417 = vmatpush3.bf16.msra.mxu0 %v3529_v21 }
 0x7d6   :  { %3430 = vmatprep.subr.bf16.mxu0 %v4156_v22 }
 0x7d7   :  { %v4139_v62 = vsub.f32 %v1545_v34, %v1573_v58  ;;  %v4141_v63 = vsub.f32 %v1550_v29, %v1574_v59  ;;  %v1227_v37 = vsel %vm163_vm0, %v1217_v60, 0.0  ;;  %v1584_v0 = vsel %vm163_vm0, %v1580_v61, 0.0 }
 0x7d8   :  { %1228 = vadd.xlane.f32.xlu1 %v1227_v37  ;;  %v1571_v1 = vpop.xlane.xlu1 %1570  ;;  %1585 = vadd.xlane.f32.xlu0 %v1584_v0 }
 0x7d9   :  { %v1575_v10 = vmul.f32 0.03125, %v1571_v1  ;;  %v1581_v11 = vmul.f32 %v4139_v62, %v4139_v62  ;;  %v1582_v13 = vmul.f32 %v4141_v63, %v4141_v63  ;;  %v3191_v1 = vld [vmem:[%s4893_s4 + $0x6] ss:$0 sm:$0xff] }
 0x7db   :  { %v4149_v14 = vsub.f32 %v1553_v35, %v1575_v10  ;;  %v1587_v15 = vsel %vm163_vm0, %v1581_v11, 0.0  ;;  %v1590_v17 = vsel %vm163_vm0, %v1582_v13, 0.0 }
 0x7dc   :  { %1588 = vadd.xlane.f32.xlu1 %v1587_v15  ;;  %1591 = vadd.xlane.f32.xlu0 %v1590_v17 }
 0x7dd   :  { %v1583_v18 = vmul.f32 %v4149_v14, %v4149_v14 }
 0x7df   :  { %v1593_v19 = vsel %vm163_vm0, %v1583_v18, 0.0 }
 0x7e0   :  { %1594 = vadd.xlane.f32.xlu1 %v1593_v19 }
 0x859   :  { %v1220_v24 = vpop.xlane.xlu0 %1219 }
 0x85a   :  { %v1230_v25 = vmul.f32 0.03125, %v1220_v24 }
 0x85c   :  { %v1234_v3 = vadd.f32 1e-05, %v1230_v25 }
 0x85d   :  { %v1223_v26 = vpop.xlane.xlu1 %1222  ;;  %v1226_v27 = vpop.xlane.xlu0 %1225 }
 0x85e   :  { %3576 = vrsqrt.f32 %v1234_v3  ;;  %v1231_v28 = vmul.f32 0.03125, %v1223_v26  ;;  %v1232_v29 = vmul.f32 0.03125, %v1226_v27 }
 0x860   :  { %v1235_v32 = vadd.f32 1e-05, %v1231_v28  ;;  %v1236_v33 = vadd.f32 1e-05, %v1232_v29 }
 0x861   :  { %v1229_v7 = vpop.xlane.xlu1 %1228  ;;  %v1586_v34 = vpop.xlane.xlu0 %1585 }
 0x862   :  { %3578 = vrsqrt.f32 %v1235_v32  ;;  %v1233_v35 = vmul.f32 0.03125, %v1229_v7  ;;  %v1596_v36 = vmul.f32 0.03125, %v1586_v34 }
 0x863   :  { %3580 = vrsqrt.f32 %v1236_v33 }
 0x864   :  { %v1237_v12 = vadd.f32 1e-05, %v1233_v35  ;;  %v1600_v38 = vadd.f32 1e-05, %v1596_v36 }
 0x865   :  { %v1589_v16 = vpop.xlane.xlu1 %1588  ;;  %v1592_v39 = vpop.xlane.xlu0 %1591 }
 0x866   :  { %3582 = vrsqrt.f32 %v1237_v12  ;;  %v1597_v41 = vmul.f32 0.03125, %v1589_v16  ;;  %v1598_v42 = vmul.f32 0.03125, %v1592_v39  ;;  %v3531_v12 = vld [vmem:[#allocation4 + $0x40] sm:$0xff]  }
 0x867   :  { %3584 = vrsqrt.f32 %v1600_v38 }
 0x868   :  { %v1601_v43 = vadd.f32 1e-05, %v1597_v41  ;;  %v1602_v23 = vadd.f32 1e-05, %v1598_v42 }
 0x869   :  { %v1595_v44 = vpop.xlane.xlu1 %1594 }
 0x86a   :  { %3586 = vrsqrt.f32 %v1601_v43  ;;  %v1599_v48 = vmul.f32 0.03125, %v1595_v44 }
 0x86b   :  { %v3577_v49 = vpop.eup %3576  ;;  %3588 = vrsqrt.f32 %v1602_v23  ;;  %v3532_v23 = vld [vmem:[#allocation4 + $0x68] sm:$0xff]  }
 0x86c   :  { %v1242_v51 = vmul.f32 %v3577_v49, %v4116_v40  ;;  %v1603_v52 = vadd.f32 1e-05, %v1599_v48 }
 0x86e   :  { %3590 = vrsqrt.f32 %v1603_v52  ;;  %v1252_v46 = vmul.f32 %v3171_v50, %v1242_v51  ;;  %v3533_v51 = vld [vmem:[#allocation4 + $0x60] sm:$0xff]  }
 0x86f   :  { %v3579_v30 = vpop.eup %3578 }
 0x870   :  { %v3581_v56 = vpop.eup %3580  ;;  %v1243_v57 = vmul.f32 %v3579_v30, %v4120_v45  ;;  %v1262_v31 = vadd.f32 %v3172_v53, %v1252_v46 }
 0x871   :  { %v1244_v58 = vmul.f32 %v3581_v56, %v4122_v47  ;;  %v3192_v47 = vld [vmem:[%s4894_s5 + $0x6] ss:$0 sm:$0xff] }
 0x872   :  { %v1253_v59 = vmul.f32 %v3171_v50, %v1243_v57  ;;  %v1270_v37 = vmul.f32 0.2, %v1262_v31  ;;  %vm1266_vm2 = vcmp.gt.f32.partialorder %v1262_v31, 0.0 }
 0x873   :  { %v3583_v60 = vpop.eup %3582  ;;  %v1254_v61 = vmul.f32 %v3171_v50, %v1244_v58 }
 0x874   :  { %v3585_v0 = vpop.eup %3584  ;;  %v1245_v40 = vmul.f32 %v3583_v60, %v4129_v54  ;;  %v1263_v10 = vadd.f32 %v3172_v53, %v1253_v59  ;;  %v1274_v18 = vsel %vm1266_vm2, %v1262_v31, %v1270_v37  ;;  %v3193_v31 = vld [vmem:[#allocation6 + $0x7] ss:$0 sm:$0xff] }
 0x875   :  { %v1608_v11 = vmul.f32 %v3585_v0, %v4131_v55  ;;  %v1264_v13 = vadd.f32 %v3172_v53, %v1254_v61 }
 0x876   :  { %v1255_v45 = vmul.f32 %v3171_v50, %v1245_v40  ;;  %vm1267_vm3 = vcmp.gt.f32.partialorder %v1263_v10, 0.0  ;;  %v1271_v15 = vmul.f32 0.2, %v1263_v10 }
 0x877   :  { %v3587_v17 = vpop.eup %3586  ;;  %v1272_v19 = vmul.f32 0.2, %v1264_v13  ;;  %v1618_v54 = vmul.f32 %v3191_v1, %v1608_v11  ;;  %vm1268_vm4 = vcmp.gt.f32.partialorder %v1264_v13, 0.0 }
 0x878   :  { %v3589_v20 = vpop.eup %3588  ;;  %v1609_v21 = vmul.f32 %v3587_v17, %v4139_v62  ;;  %v1275_v24 = vsel %vm1267_vm3, %v1263_v10, %v1271_v15  ;;  %v1265_v25 = vadd.f32 %v3172_v53, %v1255_v45  ;;  %vm852_vm3 = vcmask 523264  }
 0x879   :  { %v1610_v55 = vmul.f32 %v3589_v20, %v4141_v63  ;;  %v1278_v3 = vpack.c.bf16 %v1275_v24, %v1274_v18  ;;  %v1628_v26 = vadd.f32 %v3192_v47, %v1618_v54  ;;  %v1276_v33 = vsel %vm1268_vm4, %v1264_v13, %v1272_v19  ;;  %v3213_v13 = vld [vmem:[#allocation6 + $0x9] ss:$0 sm:$0xff] }
 0x87a   :  { %vm1269_vm5 = vcmp.gt.f32.partialorder %v1265_v25, 0.0  ;;  %v1273_v27 = vmul.f32 0.2, %v1265_v25  ;;  %v1619_v28 = vmul.f32 %v3191_v1, %v1609_v21 }
 0x87b   :  { %v3591_v29 = vpop.eup %3590  ;;  %v1620_v32 = vmul.f32 %v3191_v1, %v1610_v55  ;;  %3418 = vmatprep.mubr.msk.bf16.mxu0 %vm163_vm0, %v1278_v3  ;;  %v1636_v62 = vmul.f32 0.2, %v1628_v26  ;;  %vm1632_vm6 = vcmp.gt.f32.partialorder %v1628_v26, 0.0 }
 0x87c   :  { %v1611_v7 = vmul.f32 %v3591_v29, %v4149_v14  ;;  %v1277_v34 = vsel %vm1269_vm5, %v1265_v25, %v1273_v27  ;;  %v1629_v35 = vadd.f32 %v3192_v47, %v1619_v28 }
 0x87d   :  { %v1279_v36 = vpack.c.bf16 %v1277_v34, %v1276_v33  ;;  %v1630_v38 = vadd.f32 %v3192_v47, %v1620_v32  ;;  %v1640_v39 = vsel %vm1632_vm6, %v1628_v26, %v1636_v62 }
 0x87e   :  { %v1621_v63 = vmul.f32 %v3191_v1, %v1611_v7  ;;  %vm1633_vm7 = vcmp.gt.f32.partialorder %v1629_v35, 0.0  ;;  %v1637_v16 = vmul.f32 0.2, %v1629_v35 }
 0x87f   :  { %3419 = vmatmul.mubr.msk.bf16.vlgmr.msra.gmra.mxu0 %vm163_vm0, %v1279_v36  ;;  %v1638_v43 = vmul.f32 0.2, %v1630_v38  ;;  %vm1634_vm8 = vcmp.gt.f32.partialorder %v1630_v38, 0.0 }
 0x880   :  { %3431 = vmatpush3.bf16.msra.mxu0 %v4156_v22  ;;  %v1641_v41 = vsel %vm1633_vm7, %v1629_v35, %v1637_v16  ;;  %v1631_v42 = vadd.f32 %v3192_v47, %v1621_v63  ;;  %v4188_v22 = vld [vmem:[#allocation6 + $0x5] ss:$0 sm:$0xff] }
 0x881   :  { %3432 = vmatprep.subr.bf16.mxu0 %v3531_v12  ;;  %v1644_v14 = vpack.c.bf16 %v1641_v41, %v1640_v39  ;;  %v1642_v48 = vsel %vm1634_vm8, %v1630_v38, %v1638_v43 }
 0x882   :  { %vm1635_vm9 = vcmp.gt.f32.partialorder %v1631_v42, 0.0  ;;  %v1639_v44 = vmul.f32 0.2, %v1631_v42 }
 0x883   :  { %3434 = vmatprep.mubr.msk.bf16.mxu0 %vm163_vm0, %v1644_v14 }
 0x884   :  { %3433 = vmatpush3.bf16.msra.mxu0 %v3531_v12  ;;  %v1643_v49 = vsel %vm1635_vm9, %v1631_v42, %v1639_v44 }
 0x885   :  { %3446 = vmatprep.subr.bf16.mxu0 %v3532_v23  ;;  %v1645_v50 = vpack.c.bf16 %v1643_v49, %v1642_v48 }
 0x887   :  { %3435 = vmatmul.mubr.msk.bf16.vlgmr.msra.gmra.mxu0 %vm163_vm0, %v1645_v50 }
 0x888   :  { %3447 = vmatpush3.bf16.msra.mxu0 %v3532_v23  ;;  %3450 = vmatprep.mubr.msk.bf16.mxu0 %vm163_vm0, %v3965_v6 }
 0x889   :  { %3448 = vmatprep.subr.bf16.mxu0 %v3533_v51 }
 0x88c   :  { %3449 = vmatpush3.bf16.msra.mxu0 %v3533_v51 }
 0x88f   :  { %3451 = vmatmul.mubr.msk.bf16.vlgmr.msra.gmra.mxu0 %vm163_vm0, %v3973_v9 }
 0x93f   :  { %v3420_v52 = vpop.f32.mrf.mxu0 }
 0x940   :  { %v4191_v53 = vadd.f32 %v3420_v52, %v4188_v22 }
 0x941   :  { %v4193_v46 = vpop.f32.mrf.mxu0 }
 0x943   :  { %v3421_v30 = vpop.f32.mrf.mxu0 }
 0x944   :  { %v4196_v56 = vadd.f32 %v3421_v30, %v4188_v22 }
 0x945   :  { %v4198_v57 = vpop.f32.mrf.mxu0 }
 0x947   :  { %v3436_v6 = vpop.f32.mrf.mxu0 }
 0x948   :  { %v1720_v9 = vadd.f32 %v3436_v6, %v3193_v31 }
 0x949   :  { %v1711_v58 = vpop.f32.mrf.mxu0 }
 0x94a   :  { %v1712_v59 = vadd.f32 %v3193_v31, %v1711_v58  ;;  %v1736_v11 = vsel %vm163_vm0, %v1720_v9, 0.0 }
 0x94b   :  { %v3437_v60 = vpop.f32.mrf.mxu0 }
 0x94c   :  { %v1730_v61 = vsel %vm163_vm0, %v1712_v59, 0.0  ;;  %v1723_v1 = vadd.f32 %v3437_v60, %v3193_v31 }
 0x94d   :  { %v1714_v37 = vpop.f32.mrf.mxu0  ;;  %1731 = vadd.xlane.f32.xlu0 %v1730_v61 }
 0x94e   :  { %v1715_v0 = vadd.f32 %v3193_v31, %v1714_v37  ;;  %v1739_v18 = vsel %vm163_vm0, %v1723_v1, 0.0 }
 0x94f   :  { %v3452_v40 = vpop.f32.mrf.mxu0 }
 0x950   :  { %v1733_v10 = vsel %vm163_vm0, %v1715_v0, 0.0  ;;  %v2088_v17 = vadd.f32 %v3452_v40, %v3213_v13 }
 0x951   :  { %v2079_v45 = vpop.f32.mrf.mxu0  ;;  %1734 = vadd.xlane.f32.xlu1 %v1733_v10  ;;  %1737 = vadd.xlane.f32.xlu0 %v1736_v11  ;;  %v3534_v10 = vld [vmem:[#allocation4 + $0x58] sm:$0xff]   ;;  %v3535_v11 = vld [vmem:[#allocation4 + $0x50] sm:$0xff]  }
 0x952   :  { %v2080_v15 = vadd.f32 %v3213_v13, %v2079_v45  ;;  %v2104_v25 = vsel %vm163_vm0, %v2088_v17, 0.0  ;;  %3438 = vmatprep.subr.bf16.mxu1 %v3534_v10 }
 0x953   :  { %v3453_v47 = vpop.f32.mrf.mxu0  ;;  %3439 = vmatpush3.bf16.msra.mxu1 %v3534_v10 }
 0x954   :  { %v2098_v19 = vsel %vm163_vm0, %v2080_v15, 0.0  ;;  %v2091_v21 = vadd.f32 %v3453_v47, %v3213_v13  ;;  %3440 = vmatprep.subr.bf16.mxu1 %v3535_v11 }
 0x955   :  { %v2082_v54 = vpop.f32.mrf.mxu0  ;;  %1740 = vadd.xlane.f32.xlu1 %v1739_v18  ;;  %2099 = vadd.xlane.f32.xlu0 %v2098_v19 }
 0x956   :  { %v2083_v20 = vadd.f32 %v3213_v13, %v2082_v54  ;;  %v2107_v55 = vsel %vm163_vm0, %v2091_v21, 0.0  ;;  %v4248_v13 = vld [vmem:[#allocation4 + $0x78] sm:$0xff]  }
 0x957   :  { %3441 = vmatpush3.bf16.msra.mxu1 %v3535_v11 }
 0x958   :  { %v2101_v24 = vsel %vm163_vm0, %v2083_v20, 0.0  ;;  %3454 = vmatprep.subr.bf16.mxu1 %v4248_v13 }
 0x959   :  { %2102 = vadd.xlane.f32.xlu1 %v2101_v24  ;;  %2105 = vadd.xlane.f32.xlu0 %v2104_v25 }
 0x95d   :  { %2108 = vadd.xlane.f32.xlu1 %v2107_v55 }
 0x9d6   :  { %v1732_v3 = vpop.xlane.xlu0 %1731 }
 0x9d7   :  { %v1742_v26 = vmul.f32 0.03125, %v1732_v3 }
 0x9d9   :  { %v4208_v27 = vsub.f32 %v1712_v59, %v1742_v26 }
 0x9da   :  { %v1735_v28 = vpop.xlane.xlu1 %1734  ;;  %v1738_v29 = vpop.xlane.xlu0 %1737 }
 0x9db   :  { %v1743_v32 = vmul.f32 0.03125, %v1735_v28  ;;  %v1744_v33 = vmul.f32 0.03125, %v1738_v29  ;;  %v1750_v7 = vmul.f32 %v4208_v27, %v4208_v27 }
 0x9dd   :  { %v4212_v34 = vsub.f32 %v1715_v0, %v1743_v32  ;;  %v4214_v35 = vsub.f32 %v1720_v9, %v1744_v33  ;;  %v1754_v62 = vsel %vm163_vm0, %v1750_v7, 0.0 }
 0x9de   :  { %v1741_v36 = vpop.xlane.xlu1 %1740  ;;  %1755 = vadd.xlane.f32.xlu0 %v1754_v62  ;;  %v2100_v12 = vpop.xlane.xlu0 %2099 }
 0x9df   :  { %v1745_v38 = vmul.f32 0.03125, %v1741_v36  ;;  %v2110_v63 = vmul.f32 0.03125, %v2100_v12  ;;  %v1751_v16 = vmul.f32 %v4212_v34, %v4212_v34  ;;  %v1752_v39 = vmul.f32 %v4214_v35, %v4214_v35 }
 0x9e1   :  { %v4221_v41 = vsub.f32 %v1723_v1, %v1745_v38  ;;  %v4223_v42 = vsub.f32 %v2080_v15, %v2110_v63  ;;  %v1757_v43 = vsel %vm163_vm0, %v1751_v16, 0.0  ;;  %v1760_v14 = vsel %vm163_vm0, %v1752_v39, 0.0  ;;  %v3200_v16 = vld [vmem:[%s4893_s4 + $0x7] ss:$0 sm:$0xff] }
 0x9e2   :  { %1758 = vadd.xlane.f32.xlu1 %v1757_v43  ;;  %v2103_v23 = vpop.xlane.xlu1 %2102  ;;  %1761 = vadd.xlane.f32.xlu0 %v1760_v14  ;;  %v2106_v44 = vpop.xlane.xlu0 %2105  ;;  %v3201_v14 = vld [vmem:[%s4894_s5 + $0x7] ss:$0 sm:$0xff] }
 0x9e3   :  { %v2111_v48 = vmul.f32 0.03125, %v2103_v23  ;;  %v2112_v49 = vmul.f32 0.03125, %v2106_v44  ;;  %v1753_v50 = vmul.f32 %v4221_v41, %v4221_v41  ;;  %v2118_v51 = vmul.f32 %v4223_v42, %v4223_v42 }
 0x9e5   :  { %v4231_v52 = vsub.f32 %v2083_v20, %v2111_v48  ;;  %v4233_v30 = vsub.f32 %v2088_v17, %v2112_v49  ;;  %v1763_v6 = vsel %vm163_vm0, %v1753_v50, 0.0  ;;  %v2122_v31 = vsel %vm163_vm0, %v2118_v51, 0.0 }
 0x9e6   :  { %1764 = vadd.xlane.f32.xlu1 %v1763_v6  ;;  %v2109_v58 = vpop.xlane.xlu1 %2108  ;;  %2123 = vadd.xlane.f32.xlu0 %v2122_v31 }
 0x9e7   :  { %v2113_v59 = vmul.f32 0.03125, %v2109_v58  ;;  %v2119_v60 = vmul.f32 %v4231_v52, %v4231_v52  ;;  %v2120_v9 = vmul.f32 %v4233_v30, %v4233_v30 }
 0x9e9   :  { %v4241_v61 = vsub.f32 %v2091_v21, %v2113_v59  ;;  %v2125_v37 = vsel %vm163_vm0, %v2119_v60, 0.0  ;;  %v2128_v0 = vsel %vm163_vm0, %v2120_v9, 0.0  ;;  %v3220_v9 = vld [vmem:[%s4893_s4 + $0x9] ss:$0 sm:$0xff] }
 0x9ea   :  { %2126 = vadd.xlane.f32.xlu1 %v2125_v37  ;;  %2129 = vadd.xlane.f32.xlu0 %v2128_v0 }
 0x9eb   :  { %v2121_v40 = vmul.f32 %v4241_v61, %v4241_v61 }
 0x9ed   :  { %v2131_v1 = vsel %vm163_vm0, %v2121_v40, 0.0 }
 0x9ee   :  { %2132 = vadd.xlane.f32.xlu1 %v2131_v1 }
 0xa67   :  { %v1756_v45 = vpop.xlane.xlu0 %1755 }
 0xa68   :  { %v1766_v15 = vmul.f32 0.03125, %v1756_v45 }
 0xa6a   :  { %v1770_v47 = vadd.f32 1e-05, %v1766_v15 }
 0xa6b   :  { %v1759_v17 = vpop.xlane.xlu1 %1758  ;;  %v1762_v18 = vpop.xlane.xlu0 %1761 }
 0xa6c   :  { %3592 = vrsqrt.f32 %v1770_v47  ;;  %v1767_v19 = vmul.f32 0.03125, %v1759_v17  ;;  %v1768_v54 = vmul.f32 0.03125, %v1762_v18 }
 0xa6e   :  { %v1771_v20 = vadd.f32 1e-05, %v1767_v19  ;;  %v1772_v21 = vadd.f32 1e-05, %v1768_v54 }
 0xa6f   :  { %v1765_v24 = vpop.xlane.xlu1 %1764  ;;  %v2124_v25 = vpop.xlane.xlu0 %2123 }
 0xa70   :  { %3594 = vrsqrt.f32 %v1771_v20  ;;  %v1769_v55 = vmul.f32 0.03125, %v1765_v24  ;;  %v2134_v3 = vmul.f32 0.03125, %v2124_v25 }
 0xa71   :  { %3596 = vrsqrt.f32 %v1772_v21 }
 0xa72   :  { %v1773_v26 = vadd.f32 1e-05, %v1769_v55  ;;  %v2138_v28 = vadd.f32 1e-05, %v2134_v3 }
 0xa73   :  { %v2127_v29 = vpop.xlane.xlu1 %2126  ;;  %v2130_v32 = vpop.xlane.xlu0 %2129 }
 0xa74   :  { %3598 = vrsqrt.f32 %v1773_v26  ;;  %v2135_v33 = vmul.f32 0.03125, %v2127_v29  ;;  %v2136_v7 = vmul.f32 0.03125, %v2130_v32  ;;  %v3537_v32 = vld [vmem:[#allocation4 + $0x70] sm:$0xff]  }
 0xa75   :  { %3600 = vrsqrt.f32 %v2138_v28 }
 0xa76   :  { %v2139_v62 = vadd.f32 1e-05, %v2135_v33  ;;  %v2140_v36 = vadd.f32 1e-05, %v2136_v7 }
 0xa77   :  { %v2133_v12 = vpop.xlane.xlu1 %2132 }
 0xa78   :  { %3602 = vrsqrt.f32 %v2139_v62  ;;  %v2137_v38 = vmul.f32 0.03125, %v2133_v12 }
 0xa79   :  { %v3593_v63 = vpop.eup %3592  ;;  %3604 = vrsqrt.f32 %v2140_v36 }
 0xa7a   :  { %v1778_v39 = vmul.f32 %v3593_v63, %v4208_v27  ;;  %v2141_v43 = vadd.f32 1e-05, %v2137_v38 }
 0xa7c   :  { %3606 = vrsqrt.f32 %v2141_v43  ;;  %v1788_v23 = vmul.f32 %v3200_v16, %v1778_v39 }
 0xa7d   :  { %v3595_v44 = vpop.eup %3594 }
 0xa7e   :  { %v3597_v48 = vpop.eup %3596  ;;  %v1779_v49 = vmul.f32 %v3595_v44, %v4212_v34  ;;  %v1798_v50 = vadd.f32 %v3201_v14, %v1788_v23 }
 0xa7f   :  { %v1780_v51 = vmul.f32 %v3597_v48, %v4214_v35  ;;  %v3221_v35 = vld [vmem:[%s4894_s5 + $0x9] ss:$0 sm:$0xff] }
 0xa80   :  { %v1789_v6 = vmul.f32 %v3200_v16, %v1779_v49  ;;  %v1806_v59 = vmul.f32 0.2, %v1798_v50  ;;  %vm1802_vm10 = vcmp.gt.f32.partialorder %v1798_v50, 0.0  ;;  %v3222_v49 = vld [vmem:[#allocation6 + $0xa] ss:$0 sm:$0xff] }
 0xa81   :  { %v3599_v31 = vpop.eup %3598  ;;  %v1790_v58 = vmul.f32 %v3200_v16, %v1780_v51 }
 0xa82   :  { %v3601_v60 = vpop.eup %3600  ;;  %v1781_v27 = vmul.f32 %v3599_v31, %v4221_v41  ;;  %v1799_v37 = vadd.f32 %v3201_v14, %v1789_v6  ;;  %v1810_v11 = vsel %vm1802_vm10, %v1798_v50, %v1806_v59 }
 0xa83   :  { %v2146_v0 = vmul.f32 %v3601_v60, %v4223_v42  ;;  %v1800_v40 = vadd.f32 %v3201_v14, %v1790_v58 }
 0xa84   :  { %v1791_v34 = vmul.f32 %v3200_v16, %v1781_v27  ;;  %vm1803_vm11 = vcmp.gt.f32.partialorder %v1799_v37, 0.0  ;;  %v1807_v1 = vmul.f32 0.2, %v1799_v37 }
 0xa85   :  { %v3603_v10 = vpop.eup %3602  ;;  %v1808_v45 = vmul.f32 0.2, %v1800_v40  ;;  %v2156_v41 = vmul.f32 %v3220_v9, %v2146_v0  ;;  %vm1804_vm12 = vcmp.gt.f32.partialorder %v1800_v40, 0.0 }
 0xa86   :  { %v3605_v15 = vpop.eup %3604  ;;  %v2147_v47 = vmul.f32 %v3603_v10, %v4231_v52  ;;  %v1811_v17 = vsel %vm1803_vm11, %v1799_v37, %v1807_v1  ;;  %v1801_v18 = vadd.f32 %v3201_v14, %v1791_v34 }
 0xa87   :  { %v2148_v42 = vmul.f32 %v3605_v15, %v4233_v30  ;;  %v1814_v19 = vpack.c.bf16 %v1811_v17, %v1810_v11  ;;  %v2166_v54 = vadd.f32 %v3221_v35, %v2156_v41  ;;  %v1812_v55 = vsel %vm1804_vm12, %v1800_v40, %v1808_v45 }
 0xa88   :  { %vm1805_vm13 = vcmp.gt.f32.partialorder %v1801_v18, 0.0  ;;  %v1809_v20 = vmul.f32 0.2, %v1801_v18  ;;  %v2157_v21 = vmul.f32 %v3220_v9, %v2147_v47 }
 0xa89   :  { %v3607_v24 = vpop.eup %3606  ;;  %v2158_v25 = vmul.f32 %v3220_v9, %v2148_v42  ;;  %3442 = vmatprep.mubr.msk.bf16.mxu1 %vm163_vm0, %v1814_v19  ;;  %v2174_v52 = vmul.f32 0.2, %v2166_v54  ;;  %vm2170_vm14 = vcmp.gt.f32.partialorder %v2166_v54, 0.0 }
 0xa8a   :  { %v2149_v3 = vmul.f32 %v3607_v24, %v4241_v61  ;;  %v1813_v26 = vsel %vm1805_vm13, %v1801_v18, %v1809_v20  ;;  %v2167_v28 = vadd.f32 %v3221_v35, %v2157_v21  ;;  %v3150_v20 = vld [vmem:[#allocation9] ss:$0 sm:$0xff] }
 0xa8b   :  { %v1815_v29 = vpack.c.bf16 %v1813_v26, %v1812_v55  ;;  %v2168_v33 = vadd.f32 %v3221_v35, %v2158_v25  ;;  %v2178_v62 = vsel %vm2170_vm14, %v2166_v54, %v2174_v52  ;;  %v834_v21 = vadd.f32 %v3150_v20, %v4102_v4 }
 0xa8c   :  { %v2159_v30 = vmul.f32 %v3220_v9, %v2149_v3  ;;  %vm2171_vm15 = vcmp.gt.f32.partialorder %v2167_v28, 0.0  ;;  %v2175_v7 = vmul.f32 0.2, %v2167_v28  ;;  %v839_v26 = vadd.f32 %v4100_v2, %v3150_v20  ;;  %v3538_v2 = vld [vmem:[#allocation4 + $0x88] sm:$0xff]  }
 0xa8d   :  { %3443 = vmatmul.mubr.msk.bf16.vlgmr.msra.gmra.mxu1 %vm163_vm0, %v1815_v29  ;;  %v2176_v38 = vmul.f32 0.2, %v2168_v33  ;;  %vm2172_vm1 = vcmp.gt.f32.partialorder %v2168_v33, 0.0  ;;  %v853_v4 = vsel %vm852_vm3, %v834_v21, -inf  ;;  %v849_v29 = vadd.f32 %v4104_v5, %v3150_v20  ;;  %3462 = vmatprep.subr.bf16.mxu0 %v3538_v2 }
 0xa8e   :  { %3455 = vmatpush3.bf16.msra.mxu1 %v4248_v13  ;;  %v2179_v36 = vsel %vm2171_vm15, %v2167_v28, %v2175_v7  ;;  %v2169_v12 = vadd.f32 %v3221_v35, %v2159_v30  ;;  %v844_v28 = vadd.f32 %v3150_v20, %v4106_v8  ;;  %3463 = vmatpush3.bf16.msra.mxu0 %v3538_v2  ;;  %v3539_v8 = vld [vmem:[#allocation4 + $0x80] sm:$0xff]  }
 0xa8f   :  { %3456 = vmatprep.subr.bf16.mxu1 %v3537_v32  ;;  %v2182_v61 = vpack.c.bf16 %v2179_v36, %v2178_v62  ;;  %v2180_v16 = vsel %vm2172_vm1, %v2168_v33, %v2176_v38  ;;  %v862_v30 = vsel %vm852_vm3, %v849_v29, -inf  ;;  %3464 = vmatprep.subr.bf16.mxu0 %v3539_v8  ;;  %v865_v36 = vlaneseq }
 0xa90   :  { %vm2173_vm2 = vcmp.gt.f32.partialorder %v2169_v12, 0.0  ;;  %v2177_v63 = vmul.f32 0.2, %v2169_v12  ;;  %v859_v33 = vsel %vm852_vm3, %v844_v28, -inf }
 0xa91   :  { %3458 = vmatprep.mubr.msk.bf16.mxu1 %vm163_vm0, %v2182_v61 }
 0xa92   :  { %3457 = vmatpush3.bf16.msra.mxu1 %v3537_v32  ;;  %v2181_v39 = vsel %vm2173_vm2, %v2169_v12, %v2177_v63  ;;  %v856_v32 = vsel %vm852_vm3, %v839_v26, -inf  ;;  %3465 = vmatpush3.bf16.msra.mxu0 %v3539_v8 }
 0xa93   :  { %v2183_v43 = vpack.c.bf16 %v2181_v39, %v2180_v16  ;;  %v4316_v16 = vand.u32 127, %v865_v36 }
 0xa95   :  { %3459 = vmatmul.mubr.msk.bf16.vlgmr.msra.gmra.mxu1 %vm163_vm0, %v2183_v43 }
 0xb4d   :  { %v4276_v14 = vpop.f32.mrf.mxu1 }
 0xb4f   :  { %v4278_v13 = vpop.f32.mrf.mxu1 }
 0xb51   :  { %v4280_v23 = vpop.f32.mrf.mxu1 }
 0xb53   :  { %v4282_v44 = vpop.f32.mrf.mxu1 }
 0xb55   :  { %v3460_v48 = vpop.f32.mrf.mxu1 }
 0xb56   :  { %v2258_v31 = vadd.f32 %v3460_v48, %v3222_v49 }
 0xb57   :  { %v2249_v50 = vpop.f32.mrf.mxu1 }
 0xb58   :  { %v2250_v51 = vadd.f32 %v3222_v49, %v2249_v50  ;;  %v2274_v37 = vsel %vm163_vm0, %v2258_v31, 0.0 }
 0xb59   :  { %v3461_v6 = vpop.f32.mrf.mxu1 }
 0xb5a   :  { %v2268_v58 = vsel %vm163_vm0, %v2250_v51, 0.0  ;;  %v2261_v27 = vadd.f32 %v3461_v6, %v3222_v49 }
 0xb5b   :  { %v2252_v59 = vpop.f32.mrf.mxu1  ;;  %2269 = vadd.xlane.f32.xlu0 %v2268_v58 }
 0xb5c   :  { %v2253_v60 = vadd.f32 %v3222_v49, %v2252_v59  ;;  %v2277_v0 = vsel %vm163_vm0, %v2261_v27, 0.0 }
 0xb5e   :  { %v2271_v9 = vsel %vm163_vm0, %v2253_v60, 0.0 }
 0xb5f   :  { %2272 = vadd.xlane.f32.xlu1 %v2271_v9  ;;  %2275 = vadd.xlane.f32.xlu0 %v2274_v37 }
 0xb63   :  { %2278 = vadd.xlane.f32.xlu1 %v2277_v0 }
 0xbe4   :  { %v2270_v40 = vpop.xlane.xlu0 %2269 }
 0xbe5   :  { %v2280_v34 = vmul.f32 0.03125, %v2270_v40 }
 0xbe7   :  { %v4288_v1 = vsub.f32 %v2250_v51, %v2280_v34 }
 0xbe8   :  { %v2273_v35 = vpop.xlane.xlu1 %2272  ;;  %v2276_v10 = vpop.xlane.xlu0 %2275 }
 0xbe9   :  { %v2281_v11 = vmul.f32 0.03125, %v2273_v35  ;;  %v2282_v45 = vmul.f32 0.03125, %v2276_v10  ;;  %v2288_v41 = vmul.f32 %v4288_v1, %v4288_v1 }
 0xbeb   :  { %v4292_v15 = vsub.f32 %v2253_v60, %v2281_v11  ;;  %v4294_v47 = vsub.f32 %v2258_v31, %v2282_v45  ;;  %v2292_v17 = vsel %vm163_vm0, %v2288_v41, 0.0  ;;  %v3202_v45 = vld [vmem:[#allocation6 + $0x8] ss:$0 sm:$0xff]  ;;  %v3229_v41 = vld [vmem:[%s4893_s4 + $0xa] ss:$0 sm:$0xff] }
 0xbec   :  { %v2279_v18 = vpop.xlane.xlu1 %2278  ;;  %2293 = vadd.xlane.f32.xlu0 %v2292_v17 }
 0xbed   :  { %v2283_v42 = vmul.f32 0.03125, %v2279_v18  ;;  %v2289_v19 = vmul.f32 %v4292_v15, %v4292_v15  ;;  %v2290_v54 = vmul.f32 %v4294_v47, %v4294_v47 }
 0xbef   :  { %v4302_v24 = vsub.f32 %v2261_v27, %v2283_v42  ;;  %v2295_v25 = vsel %vm163_vm0, %v2289_v19, 0.0  ;;  %v2298_v55 = vsel %vm163_vm0, %v2290_v54, 0.0  ;;  %v4345_v19 = vadd.f32 %v3202_v45, %v4278_v13 }
 0xbf0   :  { %2296 = vadd.xlane.f32.xlu1 %v2295_v25  ;;  %2299 = vadd.xlane.f32.xlu0 %v2298_v55  ;;  %v3230_v25 = vld [vmem:[%s4894_s5 + $0xa] ss:$0 sm:$0xff]  ;;  %v4358_v13 = vadd.f32 %v4276_v14, %v3202_v45 }
 0xbf1   :  { %v2291_v3 = vmul.f32 %v4302_v24, %v4302_v24 }
 0xbf3   :  { %v2301_v52 = vsel %vm163_vm0, %v2291_v3, 0.0 }
 0xbf4   :  { %2302 = vadd.xlane.f32.xlu1 %v2301_v52  ;;  %854 = vmax.xlane.f32.xlu0 %v853_v4  ;;  %v1900_v4 = vsel %vm163_vm0, %v4345_v19, 0.0 }
 0xbf8   :  { %857 = vmax.xlane.f32.xlu1 %v856_v32  ;;  %860 = vmax.xlane.f32.xlu0 %v859_v33 }
 0xbfc   :  { %863 = vmax.xlane.f32.xlu1 %v862_v30  ;;  %v4372_v30 = vadd.f32 %v4188_v22, %v4193_v46 }
 0xc75   :  { %v2294_v7 = vpop.xlane.xlu0 %2293 }
 0xc76   :  { %v2304_v62 = vmul.f32 0.03125, %v2294_v7 }
 0xc78   :  { %v2308_v12 = vadd.f32 1e-05, %v2304_v62 }
 0xc79   :  { %v2297_v5 = vpop.xlane.xlu1 %2296  ;;  %v2300_v38 = vpop.xlane.xlu0 %2299 }
 0xc7a   :  { %3608 = vrsqrt.f32 %v2308_v12  ;;  %v2305_v61 = vmul.f32 0.03125, %v2297_v5  ;;  %v2306_v63 = vmul.f32 0.03125, %v2300_v38 }
 0xc7c   :  { %v2309_v39 = vadd.f32 1e-05, %v2305_v61  ;;  %v2310_v43 = vadd.f32 1e-05, %v2306_v63 }
 0xc7d   :  { %v2303_v48 = vpop.xlane.xlu1 %2302  ;;  %v855_v49 = vpop.xlane.xlu0 %854 }
 0xc7e   :  { %3610 = vrsqrt.f32 %v2309_v39  ;;  %v2307_v50 = vmul.f32 0.03125, %v2303_v48  ;;  %vm867_vm4 = vcmp.eq.f32.partialorder %v834_v21, %v855_v49 }
 0xc7f   :  { %3612 = vrsqrt.f32 %v2310_v43  ;;  %v871_v51 = vsel %vm867_vm4, %v4316_v16, 64 }
 0xc80   :  { %v2311_v6 = vadd.f32 1e-05, %v2307_v50  ;;  %v4320_v31 = vsel %vm852_vm3, %v871_v51, 2147483647 }
 0xc81   :  { %v858_v58 = vpop.xlane.xlu1 %857  ;;  %v861_v59 = vpop.xlane.xlu0 %860  ;;  %v877_v60 = vshra.s32 %v4320_v31, 16 }
 0xc82   :  { %3614 = vrsqrt.f32 %v2311_v6  ;;  %vm868_vm5 = vcmp.eq.f32.partialorder %v839_v26, %v858_v58  ;;  %vm869_vm6 = vcmp.eq.f32.partialorder %v844_v28, %v861_v59  ;;  %v4363_v28 = vadd.f32 %v3202_v45, %v4282_v44  ;;  %v3231_v59 = vld [vmem:[#allocation6 + $0xb] ss:$0 sm:$0xff] }
 0xc83   :  { %v872_v27 = vsel %vm868_vm5, %v4316_v16, 64  ;;  %v873_v9 = vsel %vm869_vm6, %v4316_v16, 64  ;;  %v4325_v37 = vcvt.s32.f32 %v877_v60  ;;  %v4375_v44 = vadd.f32 %v4280_v23, %v3202_v45 }
 0xc84   :  { %v4328_v0 = vsel %vm852_vm3, %v872_v27, 2147483647  ;;  %v4331_v40 = vsel %vm852_vm3, %v873_v9, 2147483647  ;;  %v4384_v23 = vadd.f32 %v4188_v22, %v4198_v57 }
 0xc85   :  { %v864_v34 = vpop.xlane.xlu1 %863  ;;  %880 = vmin.xlane.f32.xlu0 %v4325_v37  ;;  %v892_v35 = vshra.s32 %v4328_v0, 16  ;;  %v907_v10 = vshra.s32 %v4331_v40, 16  ;;  %v1909_v5 = vsel %vm163_vm0, %v4375_v44, 0.0 }
 0xc86   :  { %vm870_vm7 = vcmp.eq.f32.partialorder %v849_v29, %v864_v34  ;;  %v1367_v22 = vsel %vm163_vm0, %v4384_v23, 0.0 }
 0xc87   :  { %v3609_v11 = vpop.eup %3608  ;;  %v874_v17 = vsel %vm870_vm7, %v4316_v16, 64  ;;  %v4340_v18 = vcvt.s32.f32 %v892_v35  ;;  %v4342_v42 = vcvt.s32.f32 %v907_v10 }
 0xc88   :  { %v2316_v54 = vmul.f32 %v3609_v11, %v4288_v1  ;;  %v4349_v20 = vsel %vm852_vm3, %v874_v17, 2147483647 }
 0xc89   :  { %895 = vmin.xlane.f32.xlu1 %v4340_v18  ;;  %910 = vmin.xlane.f32.xlu0 %v4342_v42  ;;  %v922_v21 = vshra.s32 %v4349_v20, 16 }
 0xc8a   :  { %v2326_v55 = vmul.f32 %v3229_v41, %v2316_v54 }
 0xc8b   :  { %v3611_v3 = vpop.eup %3610  ;;  %v4360_v26 = vcvt.s32.f32 %v922_v21 }
 0xc8c   :  { %v3613_v1 = vpop.eup %3612  ;;  %v2317_v52 = vmul.f32 %v3611_v3, %v4292_v15  ;;  %v2336_v29 = vadd.f32 %v3230_v25, %v2326_v55  ;;  %v1906_v15 = vsel %vm163_vm0, %v4358_v13, 0.0  ;;  %v876_v3 = vand.u32 65535, %v4320_v31 }
 0xc8d   :  { %v2318_v32 = vmul.f32 %v3613_v1, %v4294_v47  ;;  %925 = vmin.xlane.f32.xlu1 %v4360_v26  ;;  %1901 = vadd.xlane.f32.xlu0 %v1900_v4  ;;  %v1903_v47 = vsel %vm163_vm0, %v4363_v28, 0.0 }
 0xc8e   :  { %v2327_v33 = vmul.f32 %v3229_v41, %v2317_v52  ;;  %v2344_v62 = vmul.f32 0.2, %v2336_v29  ;;  %vm2340_vm8 = vcmp.gt.f32.partialorder %v2336_v29, 0.0 }
 0xc8f   :  { %v3615_v14 = vpop.eup %3614  ;;  %v2328_v2 = vmul.f32 %v3229_v41, %v2318_v32  ;;  %v891_v32 = vand.u32 65535, %v4328_v0 }
 0xc90   :  { %v2319_v8 = vmul.f32 %v3615_v14, %v4302_v24  ;;  %v2337_v7 = vadd.f32 %v3230_v25, %v2327_v33  ;;  %v1364_v24 = vsel %vm163_vm0, %v4372_v30, 0.0  ;;  %v2348_v38 = vsel %vm2340_vm8, %v2336_v29, %v2344_v62 }
 0xc91   :  { %1904 = vadd.xlane.f32.xlu1 %v1903_v47  ;;  %1907 = vadd.xlane.f32.xlu0 %v1906_v15  ;;  %v2338_v36 = vadd.f32 %v3230_v25, %v2328_v2  ;;  %v1370_v29 = vsel %vm163_vm0, %v4191_v53, 0.0  ;;  %v906_v33 = vand.u32 65535, %v4331_v40  ;;  %v878_v14 = vcvt.s32.f32 %v876_v3 }
 0xc92   :  { %v2329_v46 = vmul.f32 %v3229_v41, %v2319_v8  ;;  %vm2341_vm9 = vcmp.gt.f32.partialorder %v2337_v7, 0.0  ;;  %v2345_v12 = vmul.f32 0.2, %v2337_v7  ;;  %v1373_v8 = vsel %vm163_vm0, %v4196_v56, 0.0 }
 0xc93   :  { %v2346_v39 = vmul.f32 0.2, %v2338_v36  ;;  %vm2342_vm10 = vcmp.gt.f32.partialorder %v2338_v36, 0.0  ;;  %v893_v0 = vcvt.s32.f32 %v891_v32  ;;  %v908_v40 = vcvt.s32.f32 %v906_v33 }
 0xc94   :  { %v2349_v61 = vsel %vm2341_vm9, %v2337_v7, %v2345_v12  ;;  %v2339_v63 = vadd.f32 %v3230_v25, %v2329_v46 }
 0xc95   :  { %1910 = vadd.xlane.f32.xlu1 %v1909_v5  ;;  %1365 = vadd.xlane.f32.xlu0 %v1364_v24  ;;  %v2352_v43 = vpack.c.bf16 %v2349_v61, %v2348_v38  ;;  %v2350_v57 = vsel %vm2342_vm10, %v2338_v36, %v2346_v39 }
 0xc96   :  { %vm2343_vm11 = vcmp.gt.f32.partialorder %v2339_v63, 0.0  ;;  %v2347_v48 = vmul.f32 0.2, %v2339_v63 }
 0xc97   :  { %3466 = vmatprep.mubr.msk.bf16.mxu0 %vm163_vm0, %v2352_v43  ;;  %v3540_v43 = vld [vmem:[#allocation13 + $0x18] sm:$0xff]  }
 0xc98   :  { %v2351_v49 = vsel %vm2343_vm11, %v2339_v63, %v2347_v48  ;;  %3470 = vmatprep.subr.bf16.mxu1 %v3540_v43 }
 0xc99   :  { %1368 = vadd.xlane.f32.xlu1 %v1367_v22  ;;  %v2353_v50 = vpack.c.bf16 %v2351_v49, %v2350_v57  ;;  %3471 = vmatpush3.bf16.msra.mxu1 %v3540_v43  ;;  %v3541_v49 = vld [vmem:[#allocation13 + $0x10] sm:$0xff]  }
 0xc9a   :  { %3472 = vmatprep.subr.bf16.mxu1 %v3541_v49 }
 0xc9b   :  { %3467 = vmatmul.mubr.msk.bf16.vlgmr.msra.gmra.mxu0 %vm163_vm0, %v2353_v50 }
 0xc9d   :  { %3473 = vmatpush3.bf16.msra.mxu1 %v3541_v49 }
 0xd0e   :  { %v4394_v51 = vpop.xlane.xlu0 %880 }
 0xd0f   :  { %vm882_vm12 = vcmp.eq.f32.partialorder %v4325_v37, %v4394_v51  ;;  %v887_v32 = vcvt.f32.s32 %v4394_v51 }
 0xd10   :  { %v883_v7 = vsel %vm882_vm12, %v878_v14, inf }
 0xd12   :  { %v4396_v6 = vpop.xlane.xlu1 %895  ;;  %v4398_v58 = vpop.xlane.xlu0 %910 }
 0xd13   :  { %vm897_vm13 = vcmp.eq.f32.partialorder %v4340_v18, %v4396_v6  ;;  %vm912_vm14 = vcmp.eq.f32.partialorder %v4342_v42, %v4398_v58 }
 0xd14   :  { %v898_v36 = vsel %vm897_vm13, %v893_v0, inf  ;;  %v913_v46 = vsel %vm912_vm14, %v908_v40, inf  ;;  %v917_v0 = vcvt.f32.s32 %v4398_v58 }
 0xd16   :  { %v4402_v9 = vpop.xlane.xlu1 %925  ;;  %v1902_v11 = vpop.xlane.xlu0 %1901 }
 0xd17   :  { %v1912_v1 = vmul.f32 0.03125, %v1902_v11  ;;  %vm927_vm15 = vcmp.eq.f32.partialorder %v4360_v26, %v4402_v9 }
 0xd19   :  { %v4426_v31 = vsub.f32 %v4345_v19, %v1912_v1  ;;  %v921_v19 = vand.u32 65535, %v4349_v20 }
 0xd1a   :  { %v1905_v55 = vpop.xlane.xlu1 %1904  ;;  %v1908_v52 = vpop.xlane.xlu0 %1907 }
 0xd1b   :  { %v1913_v2 = vmul.f32 0.03125, %v1905_v55  ;;  %v1914_v47 = vmul.f32 0.03125, %v1908_v52  ;;  %v1920_v12 = vmul.f32 %v4426_v31, %v4426_v31  ;;  %v923_v20 = vcvt.s32.f32 %v921_v19 }
 0xd1d   :  { %v4436_v62 = vsub.f32 %v4363_v28, %v1913_v2  ;;  %v4441_v18 = vsub.f32 %v4358_v13, %v1914_v47  ;;  %v928_v38 = vsel %vm927_vm15, %v923_v20, inf  ;;  %v1924_v28 = vsel %vm163_vm0, %v1920_v12, 0.0 }
 0xd1e   :  { %v1911_v15 = vpop.xlane.xlu1 %1910  ;;  %v1366_v37 = vpop.xlane.xlu0 %1365 }
 0xd1f   :  { %v1915_v5 = vmul.f32 0.03125, %v1911_v15  ;;  %v1376_v42 = vmul.f32 0.03125, %v1366_v37  ;;  %v1921_v61 = vmul.f32 %v4436_v62, %v4436_v62  ;;  %v1922_v26 = vmul.f32 %v4441_v18, %v4441_v18 }
 0xd20   :  { %v902_v37 = vcvt.f32.s32 %v4396_v6 }
 0xd21   :  { %v4449_v63 = vsub.f32 %v4375_v44, %v1915_v5  ;;  %v4452_v13 = vsub.f32 %v4372_v30, %v1376_v42  ;;  %v1927_v48 = vsel %vm163_vm0, %v1921_v61, 0.0  ;;  %v1930_v57 = vsel %vm163_vm0, %v1922_v26, 0.0 }
 0xd22   :  { %v1369_v24 = vpop.xlane.xlu1 %1368  ;;  %v903_v42 = vshll.u32 %v902_v37, 16  ;;  %v3209_v37 = vld [vmem:[%s4893_s4 + $0x8] ss:$0 sm:$0xff] }
 0xd23   :  { %v1377_v39 = vmul.f32 0.03125, %v1369_v24  ;;  %v1923_v44 = vmul.f32 %v4449_v63, %v4449_v63  ;;  %v1384_v30 = vmul.f32 %v4452_v13, %v4452_v13  ;;  %v918_v24 = vshll.u32 %v917_v0, 16 }
 0xd25   :  { %v4458_v22 = vsub.f32 %v4384_v23, %v1377_v39  ;;  %v1933_v50 = vsel %vm163_vm0, %v1923_v44, 0.0 }
 0xd27   :  { %v1385_v23 = vmul.f32 %v4458_v22, %v4458_v22 }
 0xd5b   :  { %v3468_v60 = vpop.f32.mrf.mxu0 }
 0xd5c   :  { %v4400_v27 = vadd.f32 %v3468_v60, %v3231_v59  ;;  %v3542_v60 = vld [vmem:[#allocation13 + $0x8] sm:$0xff]  }
 0xd5d   :  { %v2419_v34 = vpop.f32.mrf.mxu0  ;;  %3474 = vmatprep.subr.bf16.mxu1 %v3542_v60 }
 0xd5e   :  { %v4404_v35 = vadd.f32 %v3231_v59, %v2419_v34  ;;  %v2444_v10 = vsel %vm163_vm0, %v4400_v27, 0.0  ;;  %v1391_v34 = vsel %vm163_vm0, %v1385_v23, 0.0  ;;  %3475 = vmatpush3.bf16.msra.mxu1 %v3542_v60 }
 0xd5f   :  { %v3469_v45 = vpop.f32.mrf.mxu0  ;;  %2445 = vadd.xlane.f32.xlu0 %v2444_v10  ;;  %v3543_v10 = vld [vmem:[#allocation13] sm:$0xff]  }
 0xd60   :  { %v4408_v41 = vadd.f32 %v3469_v45, %v3231_v59  ;;  %v2438_v25 = vsel %vm163_vm0, %v4404_v35, 0.0  ;;  %3476 = vmatprep.subr.bf16.mxu1 %v3543_v10 }
 0xd61   :  { %v2422_v17 = vpop.f32.mrf.mxu0 }
 0xd62   :  { %v4410_v54 = vadd.f32 %v3231_v59, %v2422_v17  ;;  %v2447_v21 = vsel %vm163_vm0, %v4408_v41, 0.0  ;;  %v1388_v59 = vsel %vm163_vm0, %v1384_v30, 0.0  ;;  %3477 = vmatpush3.bf16.msra.mxu1 %v3543_v10 }
 0xd63   :  { %2448 = vadd.xlane.f32.xlu1 %v2447_v21  ;;  %2439 = vadd.xlane.f32.xlu0 %v2438_v25 }
 0xd64   :  { %v2441_v4 = vsel %vm163_vm0, %v4410_v54, 0.0 }
 0xd67   :  { %2442 = vadd.xlane.f32.xlu1 %v2441_v4  ;;  %1371 = vadd.xlane.f32.xlu0 %v1370_v29 }
 0xd6b   :  { %1374 = vadd.xlane.f32.xlu1 %v1373_v8  ;;  %884 = vmin.xlane.f32.xlu0 %v883_v7  ;;  %v888_v7 = vshll.u32 %v887_v32, 16 }
 0xd6f   :  { %899 = vmin.xlane.f32.xlu1 %v898_v36  ;;  %914 = vmin.xlane.f32.xlu0 %v913_v46 }
 0xd73   :  { %929 = vmin.xlane.f32.xlu1 %v928_v38  ;;  %1925 = vadd.xlane.f32.xlu0 %v1924_v28  ;;  %v932_v28 = vcvt.f32.s32 %v4402_v9  ;;  %v3840_v9 = vmov 0.0  }
 0xd75   :  { %v933_v30 = vshll.u32 %v932_v28, 16 }
 0xd77   :  { %1928 = vadd.xlane.f32.xlu1 %v1927_v48  ;;  %1931 = vadd.xlane.f32.xlu0 %v1930_v57 }
 0xd7b   :  { %1934 = vadd.xlane.f32.xlu1 %v1933_v50  ;;  %1389 = vadd.xlane.f32.xlu0 %v1388_v59 }
 0xd7f   :  { %1392 = vadd.xlane.f32.xlu1 %v1391_v34 }
 0xde8   :  { %v2446_v11 = vpop.xlane.xlu0 %2445 }
 0xde9   :  { %v2452_v45 = vmul.f32 0.03125, %v2446_v11 }
 0xdeb   :  { %v4471_v17 = vsub.f32 %v4400_v27, %v2452_v45 }
 0xdec   :  { %v2449_v21 = vpop.xlane.xlu1 %2448  ;;  %v2440_v25 = vpop.xlane.xlu0 %2439 }
 0xded   :  { %v2453_v55 = vmul.f32 0.03125, %v2449_v21  ;;  %v2450_v3 = vmul.f32 0.03125, %v2440_v25  ;;  %v2460_v1 = vmul.f32 %v4471_v17, %v4471_v17 }
 0xdef   :  { %v4476_v52 = vsub.f32 %v4408_v41, %v2453_v55  ;;  %v4479_v4 = vsub.f32 %v4404_v35, %v2450_v3  ;;  %v2468_v29 = vsel %vm163_vm0, %v2460_v1, 0.0 }
 0xdf0   :  { %v2443_v33 = vpop.xlane.xlu1 %2442  ;;  %2469 = vadd.xlane.f32.xlu0 %v2468_v29  ;;  %v1372_v27 = vpop.xlane.xlu0 %1371 }
 0xdf1   :  { %v2451_v14 = vmul.f32 0.03125, %v2443_v33  ;;  %v1378_v2 = vmul.f32 0.03125, %v1372_v27  ;;  %v2461_v15 = vmul.f32 %v4476_v52, %v4476_v52  ;;  %v2458_v8 = vmul.f32 %v4479_v4, %v4479_v4 }
 0xdf3   :  { %v4488_v41 = vsub.f32 %v4410_v54, %v2451_v14  ;;  %v4491_v35 = vsub.f32 %v4191_v53, %v1378_v2  ;;  %v2471_v47 = vsel %vm163_vm0, %v2461_v15, 0.0  ;;  %v2462_v51 = vsel %vm163_vm0, %v2458_v8, 0.0 }
 0xdf4   :  { %2472 = vadd.xlane.f32.xlu1 %v2471_v47  ;;  %v1375_v40 = vpop.xlane.xlu1 %1374  ;;  %2463 = vadd.xlane.f32.xlu0 %v2462_v51  ;;  %v885_v19 = vpop.xlane.xlu0 %884 }
 0xdf5   :  { %v1379_v36 = vmul.f32 0.03125, %v1375_v40  ;;  %v886_v46 = vcvt.f32.s32 %v885_v19  ;;  %v2459_v54 = vmul.f32 %v4488_v41, %v4488_v41  ;;  %v1386_v53 = vmul.f32 %v4491_v35, %v4491_v35  ;;  %v3210_v40 = vld [vmem:[%s4894_s5 + $0x8] ss:$0 sm:$0xff] }
 0xdf7   :  { %v4502_v12 = vsub.f32 %v4196_v56, %v1379_v36  ;;  %v889_v5 = vadd.s32 %v888_v7, %v886_v46  ;;  %v2465_v6 = vsel %vm163_vm0, %v2459_v54, 0.0  ;;  %v1394_v58 = vsel %vm163_vm0, %v1386_v53, 0.0 }
 0xdf8   :  { %2466 = vadd.xlane.f32.xlu1 %v2465_v6  ;;  %v900_v20 = vpop.xlane.xlu1 %899  ;;  %1395 = vadd.xlane.f32.xlu0 %v1394_v58  ;;  %v915_v38 = vpop.xlane.xlu0 %914  ;;  %v3211_v58 = vld [vmem:[#allocation10 + $0x1] ss:$0 sm:$0xff] }
 0xdf9   :  { %v901_v61 = vcvt.f32.s32 %v900_v20  ;;  %v916_v39 = vcvt.f32.s32 %v915_v38  ;;  %v1387_v26 = vmul.f32 %v4502_v12, %v4502_v12  ;;  %vm935_vm1 = vcmp.eq.s32.totalorder %v4316_v16, %v889_v5 }
 0xdfa   :  { %v3242_v59 = vsel %vm935_vm1, 1.0, %v3840_v9 }
 0xdfb   :  { %v904_v56 = vadd.s32 %v903_v42, %v901_v61  ;;  %v919_v43 = vadd.s32 %v918_v24, %v916_v39  ;;  %v1397_v48 = vsel %vm163_vm0, %v1387_v26, 0.0  ;;  %v4529_v39 = vld [vmem:[%s4893_s4 + $0x5] ss:$0 sm:$0xff] }
 0xdfc   :  { %1398 = vadd.xlane.f32.xlu1 %v1397_v48  ;;  %v930_v57 = vpop.xlane.xlu1 %929  ;;  %v1926_v44 = vpop.xlane.xlu0 %1925  ;;  %v4535_v48 = vld [vmem:[%s4894_s5 + $0x5] ss:$0 sm:$0xff] }
 0xdfd   :  { %vm936_vm2 = vcmp.eq.s32.totalorder %v4316_v16, %v904_v56  ;;  %v931_v49 = vcvt.f32.s32 %v930_v57  ;;  %v1936_v50 = vmul.f32 0.03125, %v1926_v44  ;;  %vm937_vm4 = vcmp.eq.s32.totalorder %v4316_v16, %v919_v43 }
 0xdfe   :  { %v3243_v23 = vsel %vm936_vm2, 1.0, %v3840_v9  ;;  %v3244_v55 = vsel %vm937_vm4, 1.0, %v3840_v9 }
 0xdff   :  { %v2566_v60 = vpack.c.bf16 %v3243_v23, %v3242_v59  ;;  %v934_v34 = vadd.s32 %v933_v30, %v931_v49  ;;  %v1940_v10 = vadd.f32 1e-05, %v1936_v50 }
 0xe00   :  { %v1929_v11 = vpop.xlane.xlu1 %1928  ;;  %v1932_v45 = vpop.xlane.xlu0 %1931 }
 0xe01   :  { %vm938_vm5 = vcmp.eq.s32.totalorder %v4316_v16, %v934_v34  ;;  %3616 = vrsqrt.f32 %v1940_v10  ;;  %v1937_v21 = vmul.f32 0.03125, %v1929_v11  ;;  %v1938_v25 = vmul.f32 0.03125, %v1932_v45  ;;  %3478 = vmatprep.mubr.msk.bf16.mxu1 %vm852_vm3, %v2566_v60 }
 0xe02   :  { %v3245_v3 = vsel %vm938_vm5, 1.0, %v3840_v9 }
 0xe03   :  { %v2567_v1 = vpack.c.bf16 %v3245_v3, %v3244_v55  ;;  %v1941_v29 = vadd.f32 1e-05, %v1937_v21  ;;  %v1942_v32 = vadd.f32 1e-05, %v1938_v25  ;;  %v4543_v21 = vld [vmem:[#allocation10] ss:$0 sm:$0xff] }
 0xe04   :  { %v1935_v33 = vpop.xlane.xlu1 %1934  ;;  %v1390_v27 = vpop.xlane.xlu0 %1389 }
 0xe05   :  { %3618 = vrsqrt.f32 %v1941_v29  ;;  %v1939_v14 = vmul.f32 0.03125, %v1935_v33  ;;  %v1400_v2 = vmul.f32 0.03125, %v1390_v27  ;;  %3479 = vmatmul.mubr.msk.bf16.vlgmr.msra.gmra.mxu1 %vm852_vm3, %v2567_v1 }
 0xe06   :  { %3620 = vrsqrt.f32 %v1942_v32 }
 0xe07   :  { %v1943_v15 = vadd.f32 1e-05, %v1939_v14  ;;  %v1404_v16 = vadd.f32 1e-05, %v1400_v2 }
 0xe08   :  { %v1393_v8 = vpop.xlane.xlu1 %1392 }
 0xe09   :  { %3622 = vrsqrt.f32 %v1943_v15  ;;  %v1401_v47 = vmul.f32 0.03125, %v1393_v8 }
 0xe0a   :  { %3624 = vrsqrt.f32 %v1404_v16 }
 0xe0b   :  { %v1405_v51 = vadd.f32 1e-05, %v1401_v47 }
 0xe0d   :  { %3626 = vrsqrt.f32 %v1405_v51 }
 0xe0e   :  { %v3617_v7 = vpop.eup %3616 }
 0xe0f   :  { %v1948_v0 = vmul.f32 %v3617_v7, %v4426_v31 }
 0xe11   :  { %v1958_v19 = vmul.f32 %v3209_v37, %v1948_v0 }
 0xe12   :  { %v3619_v36 = vpop.eup %3618 }
 0xe13   :  { %v3621_v46 = vpop.eup %3620  ;;  %v1968_v54 = vadd.f32 %v3210_v40, %v1958_v19  ;;  %v1949_v53 = vmul.f32 %v3619_v36, %v4436_v62 }
 0xe14   :  { %v1950_v5 = vmul.f32 %v3621_v46, %v4441_v18 }
 0xe15   :  { %vm1972_vm3 = vcmp.gt.f32.partialorder %v1968_v54, 0.0  ;;  %v1976_v6 = vmul.f32 0.2, %v1968_v54  ;;  %v1959_v42 = vmul.f32 %v3209_v37, %v1949_v53 }
 0xe16   :  { %v3623_v24 = vpop.eup %3622  ;;  %v1960_v20 = vmul.f32 %v3209_v37, %v1950_v5 }
 0xe17   :  { %v3625_v38 = vpop.eup %3624  ;;  %v1980_v31 = vsel %vm1972_vm3, %v1968_v54, %v1976_v6  ;;  %v1969_v28 = vadd.f32 %v3210_v40, %v1959_v42  ;;  %v1951_v61 = vmul.f32 %v3623_v24, %v4449_v63 }
 0xe18   :  { %v1992_v26 = vmul.f32 %v3211_v58, %v1980_v31  ;;  %v1970_v62 = vadd.f32 %v3210_v40, %v1960_v20  ;;  %v1412_v18 = vmul.f32 %v3625_v38, %v4452_v13  ;;  %v3238_v38 = vld [vmem:[%s4893_s4 + $0xb] ss:$0 sm:$0xff] }
 0xe19   :  { %vm1973_vm6 = vcmp.gt.f32.partialorder %v1969_v28, 0.0  ;;  %v1977_v56 = vmul.f32 0.2, %v1969_v28  ;;  %v1961_v43 = vmul.f32 %v3209_v37, %v1951_v61 }
 0xe1a   :  { %v3627_v57 = vpop.eup %3626  ;;  %v1996_v63 = vsel %vm163_vm0, %v1992_v26, 0.0  ;;  %vm1974_vm7 = vcmp.gt.f32.partialorder %v1970_v62, 0.0  ;;  %v1978_v44 = vmul.f32 0.2, %v1970_v62  ;;  %v1422_v30 = vmul.f32 %v4529_v39, %v1412_v18 }
 0xe1b   :  { %1997 = vadd.xlane.f32.xlu0 %v1996_v63  ;;  %v1981_v49 = vsel %vm1973_vm6, %v1969_v28, %v1977_v56  ;;  %v1971_v50 = vadd.f32 %v3210_v40, %v1961_v43  ;;  %v1413_v13 = vmul.f32 %v3627_v57, %v4458_v22  ;;  %v3239_v28 = vld [vmem:[%s4894_s5 + $0xb] ss:$0 sm:$0xff]  ;;  %v3240_v63 = vld [vmem:[#allocation10 + $0x2] ss:$0 sm:$0xff] }
 0xe1c   :  { %v1993_v9 = vmul.f32 %v3211_v58, %v1981_v49  ;;  %v1982_v59 = vsel %vm1974_vm7, %v1970_v62, %v1978_v44  ;;  %v1432_v23 = vadd.f32 %v4535_v48, %v1422_v30 }
 0xe1d   :  { %v1994_v60 = vmul.f32 %v3211_v58, %v1982_v59  ;;  %vm1975_vm8 = vcmp.gt.f32.partialorder %v1971_v50, 0.0  ;;  %v1979_v34 = vmul.f32 0.2, %v1971_v50  ;;  %v1423_v10 = vmul.f32 %v4529_v39, %v1413_v13 }
 0xe1e   :  { %v1999_v11 = vsel %vm163_vm0, %v1993_v9, 0.0  ;;  %vm1436_vm9 = vcmp.gt.f32.partialorder %v1432_v23, 0.0  ;;  %v1440_v45 = vmul.f32 0.2, %v1432_v23 }
 0xe1f   :  { %2000 = vadd.xlane.f32.xlu1 %v1999_v11  ;;  %v2002_v25 = vsel %vm163_vm0, %v1994_v60, 0.0  ;;  %v1983_v55 = vsel %vm1975_vm8, %v1971_v50, %v1979_v34  ;;  %v1433_v22 = vadd.f32 %v4535_v48, %v1423_v10 }
 0xe20   :  { %2003 = vadd.xlane.f32.xlu0 %v2002_v25  ;;  %v1995_v3 = vmul.f32 %v3211_v58, %v1983_v55  ;;  %v1444_v1 = vsel %vm1436_vm9, %v1432_v23, %v1440_v45 }
 0xe21   :  { %v1455_v29 = vmul.f32 %v4543_v21, %v1444_v1  ;;  %vm1437_vm10 = vcmp.gt.f32.partialorder %v1433_v22, 0.0  ;;  %v1441_v32 = vmul.f32 0.2, %v1433_v22 }
 0xe22   :  { %v2005_v33 = vsel %vm163_vm0, %v1995_v3, 0.0 }
 0xe23   :  { %2006 = vadd.xlane.f32.xlu1 %v2005_v33  ;;  %v1459_v27 = vsel %vm163_vm0, %v1455_v29, 0.0  ;;  %v1445_v14 = vsel %vm1437_vm10, %v1433_v22, %v1441_v32 }
 0xe24   :  { %1460 = vadd.xlane.f32.xlu0 %v1459_v27  ;;  %v1456_v2 = vmul.f32 %v4543_v21, %v1445_v14 }
 0xe26   :  { %v1462_v15 = vsel %vm163_vm0, %v1456_v2, 0.0 }
 0xe27   :  { %1463 = vadd.xlane.f32.xlu1 %v1462_v15 }
 0xe79   :  { %v2470_v16 = vpop.xlane.xlu0 %2469 }
 0xe7a   :  { %v2476_v8 = vmul.f32 0.03125, %v2470_v16 }
 0xe7c   :  { %v2480_v47 = vadd.f32 1e-05, %v2476_v8 }
 0xe7d   :  { %v2473_v51 = vpop.xlane.xlu1 %2472  ;;  %v2464_v7 = vpop.xlane.xlu0 %2463 }
 0xe7e   :  { %3628 = vrsqrt.f32 %v2480_v47  ;;  %v2477_v37 = vmul.f32 0.03125, %v2473_v51  ;;  %v2474_v0 = vmul.f32 0.03125, %v2464_v7 }
 0xe80   :  { %v2481_v40 = vadd.f32 1e-05, %v2477_v37  ;;  %v2478_v19 = vadd.f32 1e-05, %v2474_v0  ;;  %v4575_v0 = vld [vmem:[#allocation12 + $0x1] ss:$0 sm:$0xff] }
 0xe81   :  { %v2467_v36 = vpop.xlane.xlu1 %2466  ;;  %v1396_v46 = vpop.xlane.xlu0 %1395 }
 0xe82   :  { %3630 = vrsqrt.f32 %v2481_v40  ;;  %v2475_v54 = vmul.f32 0.03125, %v2467_v36  ;;  %v1402_v53 = vmul.f32 0.03125, %v1396_v46 }
 0xe83   :  { %3632 = vrsqrt.f32 %v2478_v19 }
 0xe84   :  { %v2479_v5 = vadd.f32 1e-05, %v2475_v54  ;;  %v1406_v6 = vadd.f32 1e-05, %v1402_v53 }
 0xe85   :  { %v1399_v58 = vpop.xlane.xlu1 %1398 }
 0xe86   :  { %3634 = vrsqrt.f32 %v2479_v5  ;;  %v1403_v42 = vmul.f32 0.03125, %v1399_v58 }
 0xe87   :  { %3636 = vrsqrt.f32 %v1406_v6 }
 0xe88   :  { %v1407_v24 = vadd.f32 1e-05, %v1403_v42 }
 0xe8a   :  { %3638 = vrsqrt.f32 %v1407_v24 }
 0xe8b   :  { %v3629_v20 = vpop.eup %3628 }
 0xe8c   :  { %v2488_v31 = vmul.f32 %v3629_v20, %v4471_v17 }
 0xe8e   :  { %v2498_v61 = vmul.f32 %v3238_v38, %v2488_v31 }
 0xe8f   :  { %v3631_v26 = vpop.eup %3630 }
 0xe90   :  { %v3633_v62 = vpop.eup %3632  ;;  %v2508_v18 = vadd.f32 %v3239_v28, %v2498_v61  ;;  %v2489_v56 = vmul.f32 %v3631_v26, %v4476_v52 }
 0xe91   :  { %v2486_v43 = vmul.f32 %v3633_v62, %v4479_v4 }
 0xe92   :  { %vm2512_vm11 = vcmp.gt.f32.partialorder %v2508_v18, 0.0  ;;  %v2516_v57 = vmul.f32 0.2, %v2508_v18  ;;  %v2499_v44 = vmul.f32 %v3238_v38, %v2489_v56 }
 0xe93   :  { %v3635_v30 = vpop.eup %3634  ;;  %v2496_v49 = vmul.f32 %v3238_v38, %v2486_v43 }
 0xe94   :  { %v3637_v50 = vpop.eup %3636  ;;  %v2520_v17 = vsel %vm2512_vm11, %v2508_v18, %v2516_v57  ;;  %v2509_v13 = vadd.f32 %v3239_v28, %v2499_v44  ;;  %v2487_v9 = vmul.f32 %v3635_v30, %v4488_v41 }
 0xe95   :  { %v2532_v59 = vmul.f32 %v3240_v63, %v2520_v17  ;;  %v2506_v23 = vadd.f32 %v3239_v28, %v2496_v49  ;;  %v1414_v60 = vmul.f32 %v3637_v50, %v4491_v35  ;;  %v3841_v17 = vmov 683565275  }
 0xe96   :  { %vm2513_vm12 = vcmp.gt.f32.partialorder %v2509_v13, 0.0  ;;  %v2517_v34 = vmul.f32 0.2, %v2509_v13  ;;  %v2497_v52 = vmul.f32 %v3238_v38, %v2487_v9  ;;  %v3842_v9 = vmov 2475754826  }
 0xe97   :  { %v3639_v10 = vpop.eup %3638  ;;  %v2540_v4 = vsel %vm163_vm0, %v2532_v59, 0.0  ;;  %vm2510_vm13 = vcmp.gt.f32.partialorder %v2506_v23, 0.0  ;;  %v2514_v11 = vmul.f32 0.2, %v2506_v23  ;;  %v1424_v45 = vmul.f32 %v4529_v39, %v1414_v60 }
 0xe98   :  { %2541 = vadd.xlane.f32.xlu0 %v2540_v4  ;;  %v2521_v25 = vsel %vm2513_vm12, %v2509_v13, %v2517_v34  ;;  %v2507_v55 = vadd.f32 %v3239_v28, %v2497_v52  ;;  %v1415_v22 = vmul.f32 %v3639_v10, %v4502_v12  ;;  %v3843_v60 = vmov 2131351028  }
 0xe99   :  { %v2533_v41 = vmul.f32 %v3240_v63, %v2521_v25  ;;  %v2518_v3 = vsel %vm2510_vm13, %v2506_v23, %v2514_v11  ;;  %v1434_v1 = vadd.f32 %v4535_v48, %v1424_v45  ;;  %v3844_v52 = vmov 2102212464  }
 0xe9a   :  { %v2530_v35 = vmul.f32 %v3240_v63, %v2518_v3  ;;  %vm2511_vm14 = vcmp.gt.f32.partialorder %v2507_v55, 0.0  ;;  %v2515_v29 = vmul.f32 0.2, %v2507_v55  ;;  %v1425_v32 = vmul.f32 %v4529_v39, %v1415_v22 }
 0xe9b   :  { %v2543_v33 = vsel %vm163_vm0, %v2533_v41, 0.0  ;;  %vm1438_vm15 = vcmp.gt.f32.partialorder %v1434_v1, 0.0  ;;  %v1442_v27 = vmul.f32 0.2, %v1434_v1  ;;  %v3845_v4 = vmov 920167782  }
 0xe9c   :  { %2544 = vadd.xlane.f32.xlu1 %v2543_v33  ;;  %v2534_v14 = vsel %vm163_vm0, %v2530_v35, 0.0  ;;  %v2519_v2 = vsel %vm2511_vm14, %v2507_v55, %v2515_v29  ;;  %v1435_v15 = vadd.f32 %v4535_v48, %v1425_v32  ;;  %v3846_v3 = vmov 1326507024  }
 0xe9d   :  { %2535 = vadd.xlane.f32.xlu0 %v2534_v14  ;;  %v2531_v12 = vmul.f32 %v3240_v63, %v2519_v2  ;;  %v1446_v16 = vsel %vm1438_vm15, %v1434_v1, %v1442_v27 }
 0xe9e   :  { %v1457_v8 = vmul.f32 %v4543_v21, %v1446_v16  ;;  %vm1439_vm1 = vcmp.gt.f32.partialorder %v1435_v15, 0.0  ;;  %v1443_v47 = vmul.f32 0.2, %v1435_v15 }
 0xe9f   :  { %v2537_v51 = vsel %vm163_vm0, %v2531_v12, 0.0 }
 0xea0   :  { %2538 = vadd.xlane.f32.xlu1 %v2537_v51  ;;  %v1465_v39 = vsel %vm163_vm0, %v1457_v8, 0.0  ;;  %v1447_v7 = vsel %vm1439_vm1, %v1435_v15, %v1443_v47 }
 0xea1   :  { %1466 = vadd.xlane.f32.xlu0 %v1465_v39  ;;  %v1458_v37 = vmul.f32 %v4543_v21, %v1447_v7 }
 0xea3   :  { %v1468_v48 = vsel %vm163_vm0, %v1458_v37, 0.0 }
 0xea4   :  { %1469 = vadd.xlane.f32.xlu1 %v1468_v48  ;;  %v1998_v40 = vpop.xlane.xlu0 %1997 }
 0xea5   :  { %v4579_v19 = vadd.f32 %v4575_v0, %v1998_v40 }
 0xea7   :  { %v2691_v36 = vand.u32 2147483647, %v4579_v19  ;;  %v2694_v46 = vand.u32 2139095040, %v4579_v19  ;;  %vm2693_vm14 = vcmp.lt.s32.totalorder %v4579_v19, 0 }
 0xea8   :  { %v2001_v54 = vpop.xlane.xlu1 %2000 }
 0xea9   :  { %v2695_v53 = vshrl.u32 %v2694_v46, 23  ;;  %v4584_v5 = vadd.f32 %v4575_v0, %v2001_v54  ;;  %v2004_v6 = vpop.xlane.xlu0 %2003  ;;  %v2698_v21 = vand.u32 8388607, %v2691_v36  ;;  %vm4694_vm15 = vcmp.le.f32.partialorder %v2691_v36, 0.7853982 }
 0xeaa   :  { %v4589_v58 = vadd.f32 %v4575_v0, %v2004_v6 }
 0xeab   :  { %v3252_v42 = vadd.s32 4294967169, %v2695_v53  ;;  %v2795_v24 = vand.u32 2147483647, %v4584_v5  ;;  %v2798_v20 = vand.u32 2139095040, %v4584_v5  ;;  %v2699_v31 = vor.u32 8388608, %v2698_v21 }
 0xeac   :  { %v2902_v26 = vand.u32 2139095040, %v4589_v58  ;;  %v2899_v49 = vand.u32 2147483647, %v4589_v58 }
 0xead   :  { %v2701_v38 = vadd.s32 1, %v3252_v42  ;;  %v2799_v28 = vshrl.u32 %v2798_v20, 23  ;;  %v2802_v61 = vand.u32 8388607, %v2795_v24  ;;  %v4596_v63 = vshll.u32 %v2699_v31, 8 }
 0xeae   :  { %v2903_v56 = vshrl.u32 %v2902_v26, 23  ;;  %v4623_v6 = vand.u32 8388607, %v2899_v49 }
 0xeaf   :  { %vm2702_vm0 = vcmp.gt.s32.totalorder %v2701_v38, 0  ;;  %v3256_v18 = vadd.s32 4294967169, %v2799_v28  ;;  %v2803_v44 = vor.u32 8388608, %v2802_v61 }
 0xeb0   :  { %v2703_v62 = vsel %vm2702_vm0, %v2701_v38, 0  ;;  %v3260_v23 = vadd.s32 4294967169, %v2903_v56 }
 0xeb1   :  { %v2704_v43 = vshrl.u32 %v2703_v62, 5  ;;  %v2705_v57 = vand.u32 31, %v2703_v62  ;;  %v2805_v30 = vadd.s32 1, %v3256_v18  ;;  %v4619_v53 = vshll.u32 %v2803_v44, 8 }
 0xeb2   :  { %v2909_v61 = vadd.s32 1, %v3260_v23 }
 0xeb3   :  { %v2706_v50 = vsub.s32 32, %v2705_v57  ;;  %v2708_v13 = vshll.u32 %v3841_v17, %v2705_v57  ;;  %v2711_v59 = vshll.u32 %v3842_v9, %v2705_v57  ;;  %v2714_v34 = vshll.u32 %v3843_v60, %v2705_v57 }
 0xeb4   :  { %v2717_v10 = vshll.u32 %v3844_v52, %v2705_v57  ;;  %v2720_v11 = vshll.u32 %v3845_v4, %v2705_v57  ;;  %vm2723_vm2 = vcmp.lt.s32.totalorder %v2704_v43, 1  ;;  %vm2724_vm4 = vcmp.lt.s32.totalorder %v2704_v43, 2 }
 0xeb5   :  { %v2709_v45 = vshrl.u32 %v3842_v9, %v2706_v50  ;;  %v2712_v25 = vshrl.u32 %v3843_v60, %v2706_v50  ;;  %v2715_v55 = vshrl.u32 %v3844_v52, %v2706_v50  ;;  %v2707_v22 = vshrl.u32 %v3841_v17, %v2706_v50 }
 0xeb6   :  { %v2718_v41 = vshrl.u32 %v3845_v4, %v2706_v50  ;;  %v2721_v1 = vshrl.u32 %v3846_v3, %v2706_v50  ;;  %vm2725_vm5 = vcmp.lt.s32.totalorder %v2704_v43, 3  ;;  %vm2806_vm3 = vcmp.gt.s32.totalorder %v2805_v30, 0 }
 0xeb7   :  { %v2710_v35 = vor.u32 %v2709_v45, %v2708_v13  ;;  %v2713_v29 = vor.u32 %v2712_v25, %v2711_v59  ;;  %v2716_v32 = vor.u32 %v2715_v55, %v2714_v34  ;;  %vm2726_vm6 = vcmp.lt.s32.totalorder %v2704_v43, 4 }
 0xeb8   :  { %v2719_v33 = vor.u32 %v2718_v41, %v2717_v10  ;;  %v2722_v27 = vor.u32 %v2721_v1, %v2720_v11  ;;  %v2807_v14 = vsel %vm2806_vm3, %v2805_v30, 0  ;;  %vm2910_vm11 = vcmp.gt.s32.totalorder %v2909_v61, 0 }
 0xeb9   :  { %v2727_v2 = vsel %vm2723_vm2, %v2707_v22, %v2710_v35  ;;  %v2728_v15 = vsel %vm2726_vm6, %v2716_v32, 2102212464  ;;  %v2731_v12 = vsel %vm2723_vm2, %v2710_v35, %v2713_v29  ;;  %v2735_v16 = vsel %vm2723_vm2, %v2713_v29, %v2716_v32 }
 0xeba   :  { %v2729_v8 = vsel %vm2725_vm5, %v2713_v29, %v2728_v15  ;;  %v2732_v47 = vsel %vm2726_vm6, %v2719_v33, 920167782  ;;  %v2736_v51 = vsel %vm2726_vm6, %v2722_v27, 1326507024  ;;  %v2808_v39 = vshrl.u32 %v2807_v14, 5 }
 0xebb   :  { %v2730_v7 = vsel %vm2724_vm4, %v2727_v2, %v2729_v8  ;;  %v2733_v37 = vsel %vm2725_vm5, %v2716_v32, %v2732_v47  ;;  %v2737_v48 = vsel %vm2725_vm5, %v2719_v33, %v2736_v51  ;;  %v2809_v40 = vand.u32 31, %v2807_v14 }
 0xebc   :  { %v2734_v46 = vsel %vm2724_vm4, %v2731_v12, %v2733_v37  ;;  %v2738_v54 = vsel %vm2724_vm4, %v2735_v16, %v2737_v48  ;;  %v2746_v31 = vmul.u32 %v4596_v63, %v2730_v7  ;;  %vm2827_vm7 = vcmp.lt.s32.totalorder %v2808_v39, 1 }
 0xebd   :  { %v4626_v21 = vmul.u32.u64.low %v4596_v63, %v2738_v54  ;;  %v4627_v42 = vmul.u32.u64.high %v4596_v63, %v2738_v54, %v4626_v21  ;;  %v4630_v20 = vmul.u32.u64.low %v4596_v63, %v2734_v46  ;;  %v4631_v38 = vmul.u32.u64.high %v4596_v63, %v2734_v46, %v4630_v20 }
 0xebe   :  { %v2810_v28 = vsub.s32 32, %v2809_v40  ;;  %v2812_v26 = vshll.u32 %v3841_v17, %v2809_v40  ;;  %v2815_v62 = vshll.u32 %v3842_v9, %v2809_v40  ;;  %v2818_v18 = vshll.u32 %v3843_v60, %v2809_v40 }
 0xebf   :  { %v2821_v56 = vshll.u32 %v3844_v52, %v2809_v40  ;;  %v2824_v30 = vshll.u32 %v3845_v4, %v2809_v40  ;;  %vm2748_vm8 = vc.u32 %v4627_v42, %v4630_v20  ;;  %v2749_v63 = vadd.s32 1, %v4631_v38 }
 0xec0   :  { %v2813_v43 = vshrl.u32 %v3842_v9, %v2810_v28  ;;  %v2816_v57 = vshrl.u32 %v3843_v60, %v2810_v28  ;;  %v2819_v44 = vshrl.u32 %v3844_v52, %v2810_v28  ;;  %v2822_v50 = vshrl.u32 %v3845_v4, %v2810_v28 }
 0xec1   :  { %vm2828_vm9 = vcmp.lt.s32.totalorder %v2808_v39, 2  ;;  %v2825_v34 = vshrl.u32 %v3846_v3, %v2810_v28  ;;  %v2750_v10 = vsel %vm2748_vm8, %v2749_v63, %v4631_v38  ;;  %v2811_v11 = vshrl.u32 %v3841_v17, %v2810_v28  ;;  %v2007_v28 = vpop.xlane.xlu1 %2006 }
 0xec2   :  { %v2814_v13 = vor.u32 %v2813_v43, %v2812_v26  ;;  %v2817_v59 = vor.u32 %v2816_v57, %v2815_v62  ;;  %v2820_v23 = vor.u32 %v2819_v44, %v2818_v18  ;;  %v2823_v45 = vor.u32 %v2822_v50, %v2821_v56 }
 0xec3   :  { %vm2830_vm10 = vcmp.lt.s32.totalorder %v2808_v39, 4  ;;  %v2751_v25 = vadd.s32 %v2750_v10, %v2746_v31  ;;  %v2826_v55 = vor.u32 %v2825_v34, %v2824_v30  ;;  %vm2829_vm12 = vcmp.lt.s32.totalorder %v2808_v39, 3 }
 0xec4   :  { %v2832_v22 = vsel %vm2830_vm10, %v2820_v23, 2102212464  ;;  %v2835_v41 = vsel %vm2827_vm7, %v2814_v13, %v2817_v59  ;;  %v2836_v1 = vsel %vm2830_vm10, %v2823_v45, 920167782  ;;  %v2839_v35 = vsel %vm2827_vm7, %v2817_v59, %v2820_v23 }
 0xec5   :  { %v2752_v29 = vadd.s32 536870912, %v2751_v25  ;;  %v2831_v32 = vsel %vm2827_vm7, %v2811_v11, %v2814_v13  ;;  %v2837_v33 = vsel %vm2829_vm12, %v2820_v23, %v2836_v1  ;;  %v2840_v27 = vsel %vm2830_vm10, %v2826_v55, 1326507024 }
 0xec6   :  { %v2833_v14 = vsel %vm2829_vm12, %v2817_v59, %v2832_v22  ;;  %v2838_v2 = vsel %vm2828_vm9, %v2835_v41, %v2837_v33  ;;  %v2841_v15 = vsel %vm2829_vm12, %v2823_v45, %v2840_v27  ;;  %v2911_v12 = vsel %vm2910_vm11, %v2909_v61, 0 }
 0xec7   :  { %v2753_v16 = vshrl.u32 %v2752_v29, 30  ;;  %v2842_v8 = vsel %vm2828_vm9, %v2839_v35, %v2841_v15  ;;  %v4656_v47 = vmul.u32.u64.low %v4619_v53, %v2838_v2  ;;  %v4657_v51 = vmul.u32.u64.high %v4619_v53, %v2838_v2, %v4656_v47 }
 0xec8   :  { %v4661_v7 = vmul.u32.u64.low %v4619_v53, %v2842_v8  ;;  %v4662_v37 = vmul.u32.u64.high %v4619_v53, %v2842_v8, %v4661_v7  ;;  %v2913_v48 = vand.u32 31, %v2911_v12  ;;  %v2834_v46 = vsel %vm2828_vm9, %v2831_v32, %v2833_v14 }
 0xec9   :  { %v2754_v40 = vshll.u32 %v2753_v16, 30  ;;  %v2907_v54 = vor.u32 8388608, %v4623_v6  ;;  %v2853_v31 = vadd.s32 1, %v4657_v51  ;;  %v2850_v61 = vmul.u32 %v4619_v53, %v2834_v46 }
 0xeca   :  { %v2914_v21 = vsub.s32 32, %v2913_v48  ;;  %vm2852_vm13 = vc.u32 %v4662_v37, %v4656_v47  ;;  %v4676_v6 = vadd.f32 %v4575_v0, %v2007_v28  ;;  %v2925_v44 = vshll.u32 %v3844_v52, %v2913_v48 }
 0xecb   :  { %v2755_v38 = vsub.s32 %v2751_v25, %v2754_v40  ;;  %v2854_v62 = vsel %vm2852_vm13, %v2853_v31, %v4657_v51  ;;  %v4673_v56 = vshll.u32 %v2907_v54, 8  ;;  %v2777_v30 = vsub.s32 4, %v2753_v16 }
 0xecc   :  { %v2855_v18 = vadd.s32 %v2854_v62, %v2850_v61  ;;  %v2926_v39 = vshrl.u32 %v3845_v4, %v2914_v21  ;;  %v2917_v57 = vshrl.u32 %v3842_v9, %v2914_v21  ;;  %v2920_v53 = vshrl.u32 %v3843_v60, %v2914_v21 }
 0xecd   :  { %v2757_v26 = vsub.s32 0, %v2755_v38  ;;  %v4681_v50 = vshrl.u32 %v2911_v12, 5  ;;  %v2923_v13 = vshrl.u32 %v3844_v52, %v2914_v21  ;;  %v2916_v23 = vshll.u32 %v3841_v17, %v2913_v48 }
 0xece   :  { %v2856_v63 = vadd.s32 536870912, %v2855_v18  ;;  %v2919_v34 = vshll.u32 %v3842_v9, %v2913_v48  ;;  %v2927_v0 = vor.u32 %v2926_v39, %v2925_v44  ;;  %v2747_v10 = vadd.s32 %v4630_v20, %v4627_v42 }
 0xecf   :  { %v3253_v43 = vmin.u32 %v2757_v26, %v2755_v38  ;;  %v2922_v45 = vshll.u32 %v3843_v60, %v2913_v48  ;;  %v2929_v25 = vshrl.u32 %v3846_v3, %v2914_v21  ;;  %v2918_v41 = vor.u32 %v2917_v57, %v2916_v23 }
 0xed0   :  { %v4688_v11 = vshrl.u32 %v2856_v63, 30  ;;  %v2921_v1 = vor.u32 %v2920_v53, %v2919_v34  ;;  %v2928_v35 = vshll.u32 %v3845_v4, %v2913_v48  ;;  %vm2934_vm1 = vcmp.lt.s32.totalorder %v4681_v50, 4 }
 0xed1   :  { %v2759_v59 = vclz %v3253_v43  ;;  %v2924_v42 = vor.u32 %v2923_v13, %v2922_v45  ;;  %v3006_v20 = vand.u32 2139095040, %v4676_v6  ;;  %v2778_v32 = vsel %vm2693_vm14, %v2777_v30, %v2753_v16 }
 0xed2   :  { %v2858_v29 = vshll.u32 %v4688_v11, 30  ;;  %v2930_v36 = vor.u32 %v2929_v25, %v2928_v35  ;;  %v2940_v33 = vsel %vm2934_vm1, %v2927_v0, 920167782  ;;  %v2915_v2 = vshrl.u32 %v3841_v17, %v2914_v21 }
 0xed3   :  { %v3254_v22 = vadd.s32 4294967294, %v2759_v59  ;;  %vm2931_vm2 = vcmp.lt.s32.totalorder %v4681_v50, 1  ;;  %vm2933_vm4 = vcmp.lt.s32.totalorder %v4681_v50, 3  ;;  %vm2932_vm5 = vcmp.lt.s32.totalorder %v4681_v50, 2 }
 0xed4   :  { %v4706_v14 = vsub.s32 %v2855_v18, %v2858_v29  ;;  %v2939_v8 = vsel %vm2931_vm2, %v2918_v41, %v2921_v1  ;;  %v2941_v51 = vsel %vm2933_vm4, %v2924_v42, %v2940_v33  ;;  %v2943_v7 = vsel %vm2931_vm2, %v2921_v1, %v2924_v42 }
 0xed5   :  { %vm3255_vm0 = vcmp.lt.s32.totalorder %v3254_v22, 0  ;;  %v2944_v54 = vsel %vm2934_vm1, %v2930_v36, 1326507024  ;;  %v2936_v31 = vsel %vm2934_vm1, %v2924_v42, 2102212464  ;;  %v2942_v28 = vsel %vm2932_vm5, %v2939_v8, %v2941_v51 }
 0xed6   :  { %v2762_v27 = vsel %vm3255_vm0, 0, %v3254_v22  ;;  %v2861_v16 = vsub.s32 0, %v4706_v14  ;;  %v2945_v61 = vsel %vm2933_vm4, %v2927_v0, %v2944_v54  ;;  %v3007_v18 = vshrl.u32 %v3006_v20, 23 }
 0xed7   :  { %v2763_v15 = vsub.s32 32, %v2762_v27  ;;  %v2767_v12 = vsub.s32 4294967266, %v2762_v27  ;;  %v2764_v48 = vshll.u32 %v2755_v38, %v2762_v27  ;;  %v2946_v38 = vsel %vm2932_vm5, %v2943_v7, %v2945_v61 }
 0xed8   :  { %v3257_v21 = vmin.u32 %v2861_v16, %v4706_v14  ;;  %v2780_v39 = vsel %vm4694_vm15, 0, %v2778_v32  ;;  %v2935_v57 = vsel %vm2931_vm2, %v2915_v2, %v2918_v41  ;;  %v2937_v44 = vsel %vm2933_vm4, %v2921_v1, %v2936_v31 }
 0xed9   :  { %v2765_v40 = vshrl.u32 %v2747_v10, %v2763_v15  ;;  %v2768_v46 = vadd.s32 127, %v2767_v12  ;;  %v4737_v30 = vmul.u32.u64.low %v4673_v56, %v2946_v38  ;;  %v4738_v63 = vmul.u32.u64.high %v4673_v56, %v2946_v38, %v4737_v30 }
 0xeda   :  { %v2863_v43 = vclz %v3257_v21  ;;  %v4741_v59 = vmul.u32.u64.low %v4673_v56, %v2942_v28  ;;  %v4742_v23 = vmul.u32.u64.high %v4673_v56, %v2942_v28, %v4741_v59  ;;  %v3264_v34 = vadd.s32 4294967169, %v3007_v18 }
 0xedb   :  { %v2766_v26 = vor.u32 %v2765_v40, %v2764_v48  ;;  %v2769_v62 = vshll.u32 %v2768_v46, 23  ;;  %vm2797_vm3 = vcmp.lt.s32.totalorder %v4584_v5, 0  ;;  %v2851_v45 = vadd.s32 %v4656_v47, %v4662_v37 }
 0xedc   :  { %v3258_v13 = vadd.s32 4294967294, %v2863_v43  ;;  %v2938_v25 = vsel %vm2932_vm5, %v2935_v57, %v2937_v44  ;;  %v3013_v22 = vadd.s32 1, %v3264_v34  ;;  %v2784_v1 = vadd.s32 3, %v2780_v39 }
 0xedd   :  { %v2770_v53 = vor.u32 4788187, %v2769_v62  ;;  %v2773_v10 = vcvt.s32.f32 %v2766_v26  ;;  %vm2956_vm7 = vc.u32 %v4738_v63, %v4741_v59  ;;  %v3847_v29 = vmov 0  }
 0xede   :  { %vm3259_vm6 = vcmp.lt.s32.totalorder %v3258_v13, 0  ;;  %3520 = vset.pattern.permute.xlu0 %v3847_v29  ;;  %3521 = vset.pattern.permute.xlu1 %v3847_v29  ;;  %v2881_v32 = vsub.s32 4, %v4688_v11  ;;  %v2957_v47 = vadd.s32 1, %v4742_v23  ;;  %v2954_v36 = vmul.u32 %v4673_v56, %v2938_v25 }
 0xedf   :  { %v2771_v0 = vand.u32 2147483647, %v2770_v53  ;;  %v2866_v35 = vsel %vm3259_vm6, 0, %v3258_v13  ;;  %vm3014_vm8 = vcmp.gt.s32.totalorder %v3013_v22, 0  ;;  %v3003_v16 = vand.u32 2147483647, %v4676_v6 }
 0xee0   :  { %v2867_v42 = vsub.s32 32, %v2866_v35  ;;  %v2871_v20 = vsub.s32 4294967266, %v2866_v35  ;;  %v2868_v50 = vshll.u32 %v4706_v14, %v2866_v35  ;;  %v2958_v2 = vsel %vm2956_vm7, %v2957_v47, %v4742_v23 }
 0xee1   :  { %v2774_v41 = vmul.f32 %v2773_v10, %v2771_v0  ;;  %v3015_v15 = vsel %vm3014_vm8, %v3013_v22, 0  ;;  %v2959_v8 = vadd.s32 %v2958_v2, %v2954_v36  ;;  %v4766_v56 = vsel %vm2797_vm3, %v2881_v32, %v4688_v11 }
 0xee2   :  { %v2869_v33 = vshrl.u32 %v2851_v45, %v2867_v42  ;;  %v2872_v27 = vadd.s32 127, %v2871_v20  ;;  %v3017_v51 = vand.u32 31, %v3015_v15  ;;  %v4768_v54 = vand.u32 3, %v2784_v1 }
 0xee3   :  { %v2775_v37 = vxor.u32 2147483648, %v2774_v41  ;;  %v2960_v40 = vadd.s32 536870912, %v2959_v8  ;;  %vm4772_vm9 = vcmp.le.f32.partialorder %v2795_v24, 0.7853982  ;;  %v3010_v11 = vand.u32 8388607, %v3003_v16 }
 0xee4   :  { %v2870_v14 = vor.u32 %v2869_v33, %v2868_v50  ;;  %v2873_v48 = vshll.u32 %v2872_v27, 23  ;;  %v3018_v46 = vsub.s32 32, %v3017_v51  ;;  %v2884_v31 = vsel %vm4772_vm9, 0, %v4766_v56 }
 0xee5   :  { %v2776_v12 = vsel %vm2693_vm14, %v2775_v37, %v2774_v41  ;;  %v4779_v28 = vshrl.u32 %v2960_v40, 30  ;;  %v3016_v39 = vshrl.u32 %v3015_v15, 5  ;;  %v3020_v43 = vshll.u32 %v3841_v17, %v3017_v51 }
 0xee6   :  { %v2779_v7 = vsel %vm4694_vm15, %v4579_v19, %v2776_v12  ;;  %v2874_v55 = vor.u32 4788187, %v2873_v48  ;;  %v3021_v61 = vshrl.u32 %v3842_v9, %v3018_v46  ;;  %v2877_v62 = vcvt.s32.f32 %v2870_v14 }
 0xee7   :  { %3640 = vcosq.f32 %v2779_v7  ;;  %v3024_v38 = vshrl.u32 %v3843_v60, %v3018_v46  ;;  %v3027_v24 = vshrl.u32 %v3844_v52, %v3018_v46  ;;  %v2962_v18 = vshll.u32 %v4779_v28, 30 }
 0xee8   :  { %3642 = vsinq.f32 %v2779_v7  ;;  %v2875_v26 = vand.u32 2147483647, %v2874_v55  ;;  %v3026_v57 = vshll.u32 %v3843_v60, %v3017_v51  ;;  %v3023_v44 = vshll.u32 %v3842_v9, %v3017_v51 }
 0xee9   :  { %v3029_v30 = vshll.u32 %v3844_v52, %v3017_v51  ;;  %v3030_v13 = vshrl.u32 %v3845_v4, %v3018_v46  ;;  %v4792_v23 = vsub.s32 %v2959_v8, %v2962_v18  ;;  %v3022_v34 = vor.u32 %v3021_v61, %v3020_v43 }
 0xeea   :  { %v2878_v53 = vmul.f32 %v2877_v62, %v2875_v26  ;;  %v3028_v0 = vor.u32 %v3027_v24, %v3026_v57  ;;  %v3033_v10 = vshrl.u32 %v3846_v3, %v3018_v46  ;;  %vm2790_vm10 = vcmp.eq.s32.totalorder %v4768_v54, 2 }
 0xeeb   :  { %v3025_v25 = vor.u32 %v3024_v38, %v3023_v44  ;;  %v3031_v22 = vor.u32 %v3030_v13, %v3029_v30  ;;  %v3032_v60 = vshll.u32 %v3845_v4, %v3017_v51  ;;  %vm2787_vm11 = vcmp.eq.s32.totalorder %v4768_v54, 0 }
 0xeec   :  { %v2879_v45 = vxor.u32 2147483648, %v2878_v53  ;;  %v2965_v9 = vsub.s32 0, %v4792_v23  ;;  %v3011_v52 = vor.u32 8388608, %v3010_v11  ;;  %v3019_v41 = vshrl.u32 %v3841_v17, %v3018_v46 }
 0xeed   :  { %vm3035_vm12 = vcmp.lt.s32.totalorder %v3016_v39, 1  ;;  %vm3107_vm13 = vcmask 7168   ;;  %v3034_v3 = vor.u32 %v3033_v10, %v3032_v60  ;;  %vm3037_vm14 = vcmp.lt.s32.totalorder %v3016_v39, 3 }
 0xeee   :  { %v2880_v1 = vsel %vm2797_vm3, %v2879_v45, %v2878_v53  ;;  %vm3038_vm15 = vcmp.lt.s32.totalorder %v3016_v39, 4  ;;  %vm2783_vm1 = vweird.f32 %v4579_v19  ;;  %v3261_v35 = vmin.u32 %v2965_v9, %v4792_v23 }
 0xeef   :  { %v2883_v4 = vsel %vm4772_vm9, %v4584_v5, %v2880_v1  ;;  %v3039_v29 = vsel %vm3035_vm12, %v3019_v41, %v3022_v34  ;;  %v3040_v17 = vsel %vm3038_vm15, %v3028_v0, 2102212464  ;;  %v3043_v20 = vsel %vm3035_vm12, %v3022_v34, %v3025_v25 }
 0xef0   :  { %3644 = vcosq.f32 %v2883_v4  ;;  %v3041_v42 = vsel %vm3037_vm14, %v3025_v25, %v3040_v17  ;;  %v3044_v32 = vsel %vm3038_vm15, %v3031_v22, 920167782  ;;  %v2967_v47 = vclz %v3261_v35 }
 0xef1   :  { %3646 = vsinq.f32 %v2883_v4  ;;  %vm3036_vm0 = vcmp.lt.s32.totalorder %v3016_v39, 2  ;;  %v3047_v37 = vsel %vm3035_vm12, %v3025_v25, %v3028_v0  ;;  %v3045_v33 = vsel %vm3037_vm14, %v3028_v0, %v3044_v32 }
 0xef2   :  { %v3042_v36 = vsel %vm3036_vm0, %v3039_v29, %v3041_v42  ;;  %v3048_v27 = vsel %vm3038_vm15, %v3034_v3, 1326507024  ;;  %v3051_v2 = vshll.u32 %v3011_v52, 8  ;;  %v3262_v8 = vadd.s32 4294967294, %v2967_v47 }
 0xef3   :  { %v3046_v51 = vsel %vm3036_vm0, %v3043_v20, %v3045_v33  ;;  %v3049_v7 = vsel %vm3037_vm14, %v3031_v22, %v3048_v27  ;;  %vm2786_vm4 = vcmp.lt.s32.totalorder %v4768_v54, 2  ;;  %v2888_v62 = vadd.s32 3, %v2884_v31 }
 0xef4   :  { %v3641_v50 = vpop.eup %3640  ;;  %v3050_v48 = vsel %vm3036_vm0, %v3047_v37, %v3049_v7  ;;  %v4816_v40 = vmul.u32.u64.low %v3051_v2, %v3046_v51  ;;  %v4817_v46 = vmul.u32.u64.high %v3051_v2, %v3046_v51, %v4816_v40  ;;  %vm3263_vm2 = vcmp.lt.s32.totalorder %v3262_v8, 0 }
 0xef5   :  { %v3643_v15 = vpop.eup %3642  ;;  %v2791_v12 = vxor.u32 2147483648, %v3641_v50  ;;  %v4822_v11 = vmul.u32.u64.low %v3051_v2, %v3050_v48  ;;  %v4823_v61 = vmul.u32.u64.high %v3051_v2, %v3050_v48, %v4822_v11  ;;  %v2970_v38 = vsel %vm3263_vm2, 0, %v3262_v8 }
 0xef6   :  { %v2788_v14 = vxor.u32 2147483648, %v3643_v15  ;;  %v2955_v18 = vadd.s32 %v4741_v59, %v4738_v63  ;;  %v2971_v39 = vsub.s32 32, %v2970_v38  ;;  %v2975_v43 = vsub.s32 4294967266, %v2970_v38 }
 0xef7   :  { %v2792_v55 = vsel %vm2790_vm10, %v2791_v12, %v3643_v15  ;;  %v3058_v53 = vmul.u32 %v3051_v2, %v3042_v36  ;;  %v3061_v44 = vadd.s32 1, %v4817_v46  ;;  %v2972_v56 = vshll.u32 %v4792_v23, %v2970_v38 }
 0xef8   :  { %v2789_v26 = vsel %vm2787_vm11, %v3641_v50, %v2788_v14  ;;  %v2973_v54 = vshrl.u32 %v2955_v18, %v2971_v39  ;;  %v2976_v21 = vadd.s32 127, %v2975_v43  ;;  %vm3060_vm5 = vc.u32 %v4823_v61, %v4816_v40  ;;  %v1461_v43 = vpop.xlane.xlu0 %1460 }
 0xef9   :  { %v2793_v24 = vsel %vm2786_vm4, %v2789_v26, %v2792_v55  ;;  %v2889_v63 = vand.u32 3, %v2888_v62  ;;  %v3062_v59 = vsel %vm3060_vm5, %v3061_v44, %v4817_v46  ;;  %vm2887_vm8 = vweird.f32 %v4584_v5 }
 0xefa   :  { %v2794_v57 = vsel %vm2783_vm1, nan, %v2793_v24  ;;  %v2974_v19 = vor.u32 %v2973_v54, %v2972_v56  ;;  %v2977_v31 = vshll.u32 %v2976_v21, 23  ;;  %v3063_v30 = vadd.s32 %v3062_v59, %v3058_v53  ;;  %v1464_v56 = vpop.xlane.xlu1 %1463 }
 0xefb   :  { %3108 = vst.msk [vmem:[%s4901_s12] sm:$0xff] %vm3107_vm13, %v2794_v57  ;;  %vm2894_vm3 = vcmp.eq.s32.totalorder %v2889_v63, 2  ;;  %vm2891_vm6 = vcmp.eq.s32.totalorder %v2889_v63, 0  ;;  %vm2890_vm7 = vcmp.lt.s32.totalorder %v2889_v63, 2  ;;  %vm2901_vm9 = vcmp.lt.s32.totalorder %v4589_v58, 0 }
 0xefc   :  { %v2978_v34 = vor.u32 4788187, %v2977_v31  ;;  %v3064_v0 = vadd.s32 536870912, %v3063_v30  ;;  %v2981_v23 = vcvt.s32.f32 %v2974_v19  ;;  %v2985_v17 = vsub.s32 4, %v4779_v28  ;;  %v3241_v63 = vld [vmem:[#allocation12 + $0x2] ss:$0 sm:$0xff] }
 0xefd   :  { %v3645_v13 = vpop.eup %3644  ;;  %vm2900_vm10 = vcmp.le.f32.partialorder %v2899_v49, 0.7853982  ;;  %v3059_v2 = vadd.s32 %v4816_v40, %v4823_v61  ;;  %vm2991_vm1 = vweird.f32 %v4589_v58  ;;  %vm3005_vm0 = vcmp.lt.s32.totalorder %v4676_v6, 0  ;;  %v3183_v31 = vld [vmem:[#allocation12] ss:$0 sm:$0xff] }
 0xefe   :  { %v3647_v10 = vpop.eup %3646  ;;  %v2895_v45 = vxor.u32 2147483648, %v3645_v13  ;;  %v2979_v22 = vand.u32 2147483647, %v2978_v34  ;;  %v4845_v60 = vshrl.u32 %v3064_v0, 30  ;;  %v2986_v47 = vsel %vm2901_vm9, %v2985_v17, %v4779_v28 }
 0xeff   :  { %v2892_v25 = vxor.u32 2147483648, %v3647_v10  ;;  %v2988_v50 = vsel %vm2900_vm10, 0, %v2986_v47  ;;  %vm3004_vm2 = vcmp.le.f32.partialorder %v3003_v16, 0.7853982 }
 0xf00   :  { %v2896_v9 = vsel %vm2894_vm3, %v2895_v45, %v3647_v10  ;;  %v2982_v41 = vmul.f32 %v2981_v23, %v2979_v22  ;;  %v3066_v1 = vshll.u32 %v4845_v60, 30  ;;  %v2992_v33 = vadd.s32 3, %v2988_v50 }
 0xf01   :  { %v2893_v52 = vsel %vm2891_vm6, %v3645_v13, %v2892_v25  ;;  %v3089_v53 = vsub.s32 4, %v4845_v60  ;;  %v1478_v10 = vadd.f32 %v3183_v31, %v1461_v43  ;;  %vm3095_vm6 = vweird.f32 %v4676_v6 }
 0xf02   :  { %v2897_v3 = vsel %vm2890_vm7, %v2893_v52, %v2896_v9  ;;  %v2983_v35 = vxor.u32 2147483648, %v2982_v41  ;;  %v3067_v29 = vsub.s32 %v3063_v30, %v3066_v1  ;;  %v2993_v7 = vand.u32 3, %v2992_v33 }
 0xf03   :  { %v2898_v4 = vsel %vm2887_vm8, nan, %v2897_v3  ;;  %v3090_v21 = vsel %vm3005_vm0, %v3089_v53, %v4845_v60 }
 0xf04   :  { %3109 = vst.msk [vmem:[%s4901_s12 + $0x8] sm:$0xff] %vm3107_vm13, %v2898_v4  ;;  %v2984_v42 = vsel %vm2901_vm9, %v2983_v35, %v2982_v41  ;;  %v3069_v20 = vsub.s32 0, %v3067_v29  ;;  %vm2998_vm12 = vcmp.eq.s32.totalorder %v2993_v7, 2  ;;  %vm2995_vm14 = vcmp.eq.s32.totalorder %v2993_v7, 0 }
 0xf05   :  { %v2987_v5 = vsel %vm2900_vm10, %v4589_v58, %v2984_v42  ;;  %vm2994_vm15 = vcmp.lt.s32.totalorder %v2993_v7, 2  ;;  %v3092_v19 = vsel %vm3004_vm2, 0, %v3090_v21  ;;  %v1479_v35 = vadd.f32 %v3183_v31, %v1464_v56 }
 0xf06   :  { %3648 = vcosq.f32 %v2987_v5  ;;  %v3265_v32 = vmin.u32 %v3069_v20, %v3067_v29  ;;  %v3096_v0 = vadd.s32 3, %v3092_v19 }
 0xf07   :  { %3650 = vsinq.f32 %v2987_v5 }
 0xf08   :  { %v3071_v37 = vclz %v3265_v32  ;;  %v3097_v41 = vand.u32 3, %v3096_v0 }
 0xf0a   :  { %v3266_v36 = vadd.s32 4294967294, %v3071_v37  ;;  %vm3102_vm4 = vcmp.eq.s32.totalorder %v3097_v41, 2  ;;  %vm3099_vm5 = vcmp.eq.s32.totalorder %v3097_v41, 0  ;;  %vm3098_vm3 = vcmp.lt.s32.totalorder %v3097_v41, 2 }
 0xf0c   :  { %vm3267_vm11 = vcmp.lt.s32.totalorder %v3266_v36, 0 }
 0xf0d   :  { %v3074_v27 = vsel %vm3267_vm11, 0, %v3266_v36 }
 0xf0e   :  { %v3075_v15 = vsub.s32 32, %v3074_v27  ;;  %v3079_v49 = vsub.s32 4294967266, %v3074_v27  ;;  %v3076_v12 = vshll.u32 %v3067_v29, %v3074_v27 }
 0xf10   :  { %v3077_v8 = vshrl.u32 %v3059_v2, %v3075_v15  ;;  %v3080_v51 = vadd.s32 127, %v3079_v49  ;;  %v3480_v2 = vpop.f32.mrf.mxu1 }
 0xf12   :  { %v3078_v14 = vor.u32 %v3077_v8, %v3076_v12  ;;  %v3081_v48 = vshll.u32 %v3080_v51, 23  ;;  %v2640_v15 = vpop.f32.mrf.mxu1 }
 0xf13   :  { %v3649_v46 = vpop.eup %3648 }
 0xf14   :  { %v3651_v28 = vpop.eup %3650  ;;  %v2999_v55 = vxor.u32 2147483648, %v3649_v46  ;;  %v3082_v11 = vor.u32 4788187, %v3081_v48  ;;  %v3085_v24 = vcvt.s32.f32 %v3078_v14  ;;  %v3481_v8 = vpop.f32.mrf.mxu1 }
 0xf15   :  { %v2996_v26 = vxor.u32 2147483648, %v3651_v28 }
 0xf16   :  { %v3000_v62 = vsel %vm2998_vm12, %v2999_v55, %v3651_v28  ;;  %v3083_v38 = vand.u32 2147483647, %v3082_v11  ;;  %v2643_v7 = vpop.f32.mrf.mxu1 }
 0xf17   :  { %v2997_v40 = vsel %vm2995_vm14, %v3649_v46, %v2996_v26 }
 0xf18   :  { %v3001_v61 = vsel %vm2994_vm15, %v2997_v40, %v3000_v62  ;;  %v3086_v18 = vmul.f32 %v3085_v24, %v3083_v38 }
 0xf19   :  { %v3002_v39 = vsel %vm2991_vm1, nan, %v3001_v61 }
 0xf1a   :  { %3110 = vst.msk [vmem:[%s4901_s12 + $0x10] sm:$0xff] %vm3107_vm13, %v3002_v39  ;;  %v3087_v57 = vxor.u32 2147483648, %v3086_v18 }
 0xf1c   :  { %v3088_v44 = vsel %vm3005_vm0, %v3087_v57, %v3086_v18 }
 0xf1d   :  { %v3091_v58 = vsel %vm3004_vm2, %v4676_v6, %v3088_v44 }
 0xf1e   :  { %3652 = vcosq.f32 %v3091_v58 }
 0xf1f   :  { %3654 = vsinq.f32 %v3091_v58 }
 0xf21   :  { %v2542_v54 = vpop.xlane.xlu0 %2541 }
 0xf22   :  { %v2556_v13 = vadd.f32 %v3241_v63, %v2542_v54 }
 0xf24   :  { %v2657_v23 = vand.u32 2147483647, %v2556_v13 }
 0xf25   :  { %v2545_v59 = vpop.xlane.xlu1 %2544 }
 0xf26   :  { %v2536_v30 = vpop.xlane.xlu0 %2535  ;;  %v2557_v29 = vadd.f32 %v3241_v63, %v2545_v59 }
 0xf27   :  { %v2554_v34 = vadd.f32 %v3241_v63, %v2536_v30 }
 0xf28   :  { %v2658_v50 = vand.u32 2147483647, %v2557_v29 }
 0xf29   :  { %v2655_v45 = vand.u32 2147483647, %v2554_v34  ;;  %v2539_v16 = vpop.xlane.xlu1 %2538 }
 0xf2a   :  { %v2555_v25 = vadd.f32 %v3241_v63, %v2539_v16  ;;  %v1467_v22 = vpop.xlane.xlu0 %1466 }
 0xf2b   :  { %v2659_v9 = vmul.f32 %v2655_v45, %v1478_v10  ;;  %v1480_v52 = vadd.f32 %v3183_v31, %v1467_v22  ;;  %v3653_v4 = vpop.eup %3652 }
 0xf2c   :  { %v2656_v1 = vand.u32 2147483647, %v2555_v25  ;;  %v3655_v17 = vpop.eup %3654  ;;  %v3103_v42 = vxor.u32 2147483648, %v3653_v4 }
 0xf2d   :  { %v2661_v60 = vmul.f32 %v2657_v23, %v1480_v52  ;;  %2665 = vperm.xlu0 %3520, %v2659_v9   ;;  %v1470_v3 = vpop.xlane.xlu1 %1469  ;;  %v3100_v20 = vxor.u32 2147483648, %v3655_v17 }
 0xf2e   :  { %v2660_v5 = vmul.f32 %v2656_v1, %v1479_v35  ;;  %v1481_v32 = vadd.f32 %v3183_v31, %v1470_v3  ;;  %v3104_v47 = vsel %vm3102_vm4, %v3103_v42, %v3655_v17 }
 0xf2f   :  { %2675 = vperm.xlu1 %3521, %v2661_v60   ;;  %v3101_v37 = vsel %vm3099_vm5, %v3653_v4, %v3100_v20 }
 0xf30   :  { %v3105_v36 = vsel %vm3098_vm3, %v3101_v37, %v3104_v47  ;;  %v2662_v27 = vmul.f32 %v2658_v50, %v1481_v32 }
 0xf31   :  { %v3106_v33 = vsel %vm3095_vm6, nan, %v3105_v36 }
 0xf32   :  { %3111 = vst.msk [vmem:[%s4901_s12 + $0x18] sm:$0xff] %vm3107_vm13, %v3106_v33 }
 0xf33   :  { %2670 = vperm.xlu1 %3521, %v2660_v5  }
 0xf37   :  { %2680 = vperm.xlu1 %3521, %v2662_v27  }
 0xfa8   :  { %v2666_v49 = vpop.permute.xlu0 %2665 }
 0xfa9   :  { %v2683_v12 = vmul.f32 %v2666_v49, %v2640_v15 }
 0xfaa   :  { %v2676_v51 = vpop.permute.xlu1 %2675 }
 0xfab   :  { %2687 = vst [vmem:[%s4900_s11] sm:$0xff] %v2683_v12  ;;  %v2685_v6 = vmul.f32 %v3480_v2, %v2676_v51 }
 0xfad   :  { %2689 = vst [vmem:[%s4900_s11 + $0x10] sm:$0xff] %v2685_v6 }
 0xfae   :  { %v2671_v14 = vpop.permute.xlu1 %2670 }
 0xfaf   :  { %v2684_v48 = vmul.f32 %v2671_v14, %v2643_v7 }
 0xfb1   :  { %2688 = vst [vmem:[%s4900_s11 + $0x8] sm:$0xff] %v2684_v48 }
 0xfb2   :  { %v2681_v46 = vpop.permute.xlu1 %2680 }
 0xfb3   :  { %v2686_v28 = vmul.f32 %v3481_v8, %v2681_v46 }
 0xfb5   :  { %2690 = vst [vmem:[%s4900_s11 + $0x18] sm:$0xff] %v2686_v28 }
 0xfb6   :  { %3120 = vsyncpa [#allocation3], 1 }
 0xfb7   :  { %3121 = vsyncpa [#allocation5], 1 }
 0xfb8   :  { %3122 = vsyncpa [#allocation8], 1 }
 0xfb9   :  { %3123 = vsyncpa [#allocation11], 1 }
 0xfba   :  { %3124 = vsyncpa [#allocation14], 1 }

// kernel: reverse.2
= control target key start
LH: loop header
LB: loop body
LE: loop exit
PB: predicated region body
PF: predicated region fallthrough
CT: control target
= control target key end

     0   :  { %v2_v0 = vlaneseq  ;;  %s386_s0 = inlined_call_operand.vmem [shape: f32[2,16,768], index: 0, kind: input, shape index: {}]   ;;  %s387_s1 = inlined_call_operand.vmem [shape: f32[2,16,768], index: 1, kind: output, shape index: {}]  }
   0x2   :  { %v342_v1 = vsub.s32 127, %v2_v0 }
   0x4   :  { %4 = vset.pattern.permute.xlu0 %v342_v1 }
   0x5   :  { %s345_s6 = smov 0   ;;  %s347_s7 = smov 0  }
   0x6   :  { %s349_s8 = smov 0  }
   0x7 LB: > { %s265_s9 = sadd.s32 4294967295, %s330_s8   ;;  %s22_s10 = sadd.s32 1, %s326_s7  ;;  %s330_s8 = sphi %s349_s8, %s10_s8   ;;  %s326_s7 = sphi %s347_s7, %s389_s7   ;;  %s322_s6 = sphi %s345_s6, %s388_s6  }
   0x8   : > { %p23_p0 = scmp.ge.s32.totalorder %s22_s10, 6  ;;  %p267_p1 = scmp.ge.s32.totalorder %s330_s8, 6 }
   0x9   : > { %s45_s11 = sand.u32 (!%p267_p1), 1, %s330_s8   ;;  %s48_s12 = ssub.s32 (!%p267_p1), 5, %s326_s7 }
   0xa   : > { %s391_s10 = smov (%p23_p0, %s22_s10), 0  ;;  %43 = sbr.rel (%p267_p1) target bundleno = 18 (0x12), region = 16 }
   0xb   : > { %s268_s13 = sshll.u32 (!%p267_p1), %s45_s11, 5  ;;  %s269_s14 = sshll.u32 (!%p267_p1), %s48_s12, 3 }
   0xc   : > { %s56_s17 = scalar_lea.vmem (!%p267_p1), %s386_s0, %s269_s14  ;;  %s47_s18 = scalar_lea.vmem (!%p267_p1), [#allocation0], %s268_s13 }
   0xf   : > { %v91_v2 = vld [vmem:[%s56_s17] sm:$0xff]  ;;  %v93_v3 = vld [vmem:[%s56_s17 + $0x30] sm:$0xff] }
  0x10   : > { %v95_v4 = vld [vmem:[%s56_s17 + $0x60] sm:$0xff]  ;;  %92 = vst [vmem:[%s47_s18] sm:$0xff] %v91_v2  ;;  %94 = vst [vmem:[%s47_s18 + $0x8] sm:$0xff] %v93_v3  ;;  %v97_v5 = vld [vmem:[%s56_s17 + $0x90] sm:$0xff] }
  0x11   : > { %96 = vst [vmem:[%s47_s18 + $0x10] sm:$0xff] %v95_v4  ;;  %98 = vst [vmem:[%s47_s18 + $0x18] sm:$0xff] %v97_v5 }
  0x12 PF: > { %p270_p2 = scmp.ge.s32.totalorder %s330_s8, 1  ;;  %p103_p3 = scmp.lt.s32.totalorder %s330_s8, 7 }
  0x14   : > { %p104_p4 = pnand %p270_p2, %p103_p3 }
  0x15   : > { %s110_s19 = sand.u32 (!%p104_p4), 1, %s265_s9   ;;  %s280_s22 = sshll.u32 (!%p104_p4), %s322_s6, 3 }
  0x16   : > { %107 = sbr.rel (%p104_p4) target bundleno = 157 (0x9d), region = 54  ;;  %s271_s20 = sshll.u32 (!%p104_p4), %s110_s19, 5 }
  0x17   : > { %s112_s21 = scalar_lea.vmem (!%p104_p4), [#allocation0], %s271_s20  ;;  %s159_s25 = scalar_lea.vmem (!%p104_p4), %s387_s1, %s280_s22 }
  0x1b   : > { %307 = vset.pattern.permute.xlu1 %v342_v1  ;;  %v275_v6 = vld [vmem:[%s112_s21 + $0x10] sm:$0xff]  ;;  %v126_v7 = vld [vmem:[%s112_s21] sm:$0xff]  ;;  %v277_v8 = vld [vmem:[%s112_s21 + $0x18] sm:$0xff] }
  0x1c   : > { %139 = vperm.xlu1 %307, %v275_v6   ;;  %127 = vperm.xlu0 %4, %v126_v7   ;;  %v273_v9 = vld [vmem:[%s112_s21 + $0x8] sm:$0xff] }
  0x20   : > { %145 = vperm.xlu1 %307, %v277_v8   ;;  %133 = vperm.xlu0 %4, %v273_v9  }
  0x97   : > { %v140_v10 = vpop.permute.xlu1 %139  ;;  %v128_v11 = vpop.permute.xlu0 %127 }
  0x98   : > { %199 = vst [vmem:[%s159_s25 + $0x60] sm:$0xff] %v140_v10  ;;  %195 = vst [vmem:[%s159_s25] sm:$0xff] %v128_v11 }
  0x9b   : > { %v146_v12 = vpop.permute.xlu1 %145  ;;  %v134_v13 = vpop.permute.xlu0 %133 }
  0x9c   : > { %201 = vst [vmem:[%s159_s25 + $0x90] sm:$0xff] %v146_v12  ;;  %197 = vst [vmem:[%s159_s25 + $0x30] sm:$0xff] %v134_v13 }
  0x9d PF: > { %s10_s8 = sadd.s32 1, %s330_s8   ;;  %s388_s6 = smov %s326_s7 }
  0x9e   : > { %p7_p5 = scmp.ge.s32.totalorder %s10_s8, 8   ;;  %s389_s7 = smov %s391_s10 }
  0xa0   :  { %9 = sbr.rel (!%p7_p5) target bundleno = 7 (0x7), region = 124 }

</bundles_post_ra>
